<compile_context>
chip_gen: v5e
topology: v5e:2x2
jax: 0.10.0
libtpu: 0.0.40
codegen_flags: <defaults>
</compile_context>

<pallas_src>
import numpy as np
import jax
import jax.numpy as jnp
from jax.experimental import pallas as pl
from jax.experimental.pallas import tpu as pltpu

# ----------------------------- static config (small, synthetic) --------------
LMAX = 2
MMAX = 1
C_SPH = 4                 # sphere_channels
C_HID = 8                 # hidden_channels
C_IN = 2 * C_SPH          # so2_conv_1 input channels (source || target)
EDGE_CH = [8, 16, 16]     # edge_channels_list
CUTOFF = 5.0
N_NODES = 8
N_EDGES = 16
TE_MAX = 1024             # max edges per grid step (multiple of 128; edges on lanes)

KFULL = (LMAX + 1) ** 2                                   # 9 (all m)
FULL = [(l, m) for l in range(LMAX + 1) for m in range(-l, l + 1)]
LP = [(l, m) for l in range(LMAX + 1)                      # l-primary, |m|<=mmax
      for m in range(-min(l, MMAX), min(l, MMAX) + 1)]
KMASK = len(LP)                                            # 7
OUT_MASK = np.array([FULL.index(lm) for lm in LP], dtype=np.int32)
# m-primary ordering: m=0 block (l asc), then per m>=1: +m coeffs then -m coeffs
MP = [(l, 0) for l in range(LMAX + 1)]
for m in range(1, MMAX + 1):
    MP += [(l, m) for l in range(m, LMAX + 1)]
    MP += [(l, -m) for l in range(m, LMAX + 1)]
PERM = np.array([LP.index(lm) for lm in MP], dtype=np.int32)
INV_PERM = np.argsort(PERM).astype(np.int32)
SEL = OUT_MASK[PERM]                       # m-primary indices into full basis
M_SIZE = [LMAX + 1] + [LMAX - m + 1 for m in range(1, MMAX + 1)]   # [3, 2]
N0, N1 = M_SIZE[0], M_SIZE[1]

# SO(2)-conv feature sizes
M0_IN_1 = N0 * C_IN                    # 24
M1_IN_1 = N1 * C_IN                    # 16
EXTRA = LMAX * C_HID                   # 16 gating scalars
M0_OUT_1 = N0 * C_HID + EXTRA          # 40
M1_OUT_1 = 2 * C_HID * N1              # 32
NUM_RAD = M0_IN_1 + M1_IN_1            # 40
M0_IN_2 = N0 * C_HID                   # 24
M1_IN_2 = N1 * C_HID                   # 16
M0_OUT_2 = N0 * C_SPH                  # 12
M1_OUT_2 = 2 * C_SPH * N1              # 16

CPAD = 8                               # conv-2 output rows padded per coefficient
OUT_GROUPS = (KFULL + 1) // 2          # 5: two coefficients per 8-row output group
OUT_ROWS = OUT_GROUPS * CPAD           # 40 (36 real rows)

_LN_EPS = 1e-5

# Kernel feature order for conv-1 inputs = [src blocks | tgt blocks]; these
# permutations map the kernel order to the reference (interleaved) order and
# are folded into the weight columns / radial-MLP output rows on the host.
P0 = np.array([k * C_IN + c for k in range(N0) for c in range(C_SPH)]
              + [k * C_IN + C_SPH + c for k in range(N0) for c in range(C_SPH)],
              dtype=np.int32)
P1 = np.array([k * C_IN + c for k in range(N1) for c in range(C_SPH)]
              + [k * C_IN + C_SPH + c for k in range(N1) for c in range(C_SPH)],
              dtype=np.int32)
P_RAD = np.concatenate([P0, M0_IN_1 + P1]).astype(np.int32)

# Packed bias / LN-affine column vector: static row offsets (all multiples of 8).
_BSZ = [EDGE_CH[1]] * 3 + [EDGE_CH[2]] * 3 + [NUM_RAD, M0_OUT_1, N0 * CPAD]
_BOFF = np.cumsum([0] + _BSZ)
(OFF_RB1, OFF_RG1, OFF_RB1A, OFF_RB2, OFF_RG2, OFF_RB2A,
 OFF_RB3, OFF_C1B0, OFF_C2B0) = [int(v) for v in _BOFF[:9]]
BROWS = int(_BOFF[9])                  # 200


# ----------------------------- small helpers ----------------------------------
def _round_up(v, m):
    return ((v + m - 1) // m) * m


def _layernorm(h, g, b):
    # row-wise layernorm (reference orientation: features on last axis)
    mu = jnp.mean(h, axis=-1, keepdims=True)
    var = jnp.mean((h - mu) ** 2, axis=-1, keepdims=True)
    return (h - mu) * jax.lax.rsqrt(var + _LN_EPS) * g + b


def _tree_sum(xs):
    # balanced pairwise sum -> multiple accumulators / ILP for the VLIW packer
    xs = list(xs)
    while len(xs) > 1:
        nxt = [xs[i] + xs[i + 1] for i in range(0, len(xs) - 1, 2)]
        if len(xs) % 2 == 1:
            nxt.append(xs[-1])
        xs = nxt
    return xs[0]


def _ln_cols(h, g, b):
    # layernorm over the feature (sublane) axis; stats via ones-matmul on the MXU
    n = h.shape[0]
    ones = jnp.full((1, n), 1.0 / n, dtype=jnp.float32)
    mu = jnp.dot(ones, h, preferred_element_type=jnp.float32)       # (1, TE)
    d = h - mu
    var = jnp.dot(ones, d * d, preferred_element_type=jnp.float32)  # (1, TE)
    return d * jax.lax.rsqrt(var + _LN_EPS) * g + b


# ----------------------------- the Pallas kernel ------------------------------
def edgewise_kernel(xs_ref, xt_ref, wg_ref, xe_ref,
                    rW1_ref, rW2_ref, rW3_ref,
                    c1W0_ref, c1W1_ref, c2W0_ref, c2W1_ref, bvec_ref,
                    out_ref, xs_f, xt_f):
    f32 = jnp.float32
    te = out_ref.shape[1]

    # ---- upcast the bf16 node-feature streams once into f32 VMEM scratch -----
    # (chunked so liveness stays bounded; each 4-row block is reused 7x below)
    def cast_copy(dst, src, rows, chunk=16):
        for r in range(0, rows, chunk):
            n = min(chunk, rows - r)
            dst[r:r + n, :] = src[r:r + n, :].astype(f32)

    cast_copy(xs_f, xs_ref, KFULL * C_SPH)
    cast_copy(xt_f, xt_ref, KFULL * C_SPH)

    def bvec(off, n):
        return bvec_ref[off:off + n, :]                  # (n, 1) column

    # ---- radial MLP (features on sublanes; LN stats via ones-matmul on MXU) --
    xe = xe_ref[0:EDGE_CH[0], :]                         # (8, TE) f32
    h = jnp.dot(rW1_ref[...], xe, preferred_element_type=f32) + bvec(OFF_RB1, EDGE_CH[1])
    h = jax.nn.silu(_ln_cols(h, bvec(OFF_RG1, EDGE_CH[1]), bvec(OFF_RB1A, EDGE_CH[1])))
    h = jnp.dot(rW2_ref[...], h, preferred_element_type=f32) + bvec(OFF_RB2, EDGE_CH[2])
    h = jax.nn.silu(_ln_cols(h, bvec(OFF_RG2, EDGE_CH[2]), bvec(OFF_RB2A, EDGE_CH[2])))
    rad = jnp.dot(rW3_ref[...], h, preferred_element_type=f32) + bvec(OFF_RB3, NUM_RAD)
    rad0 = rad[:M0_IN_1]                                 # (24, TE)
    rad1 = rad[M0_IN_1:]                                 # (16, TE)

    # ---- forward Wigner rotation into the edge frame --------------------------
    # rows of wg_ref are loaded on demand (no whole-slab values), cast to f32 and
    # broadcast against the 4-row node-feature blocks.
    def rotate(ks):
        srcs, tgts = [], []
        for k in ks:
            s_terms, t_terms = [], []
            for j in range(KFULL):
                w = wg_ref[k * KFULL + j: k * KFULL + j + 1, :].astype(f32)
                s_terms.append(w * xs_f[4 * j:4 * j + 4, :])
                t_terms.append(w * xt_f[4 * j:4 * j + 4, :])
            srcs.append(_tree_sum(s_terms))
            tgts.append(_tree_sum(t_terms))
        return srcs, tgts

    # ---- SO(2) conv 1, m = 0 block --------------------------------------------
    s0, t0 = rotate(range(N0))
    x0 = jnp.concatenate(s0 + t0, axis=0) * rad0                       # (24, TE)
    y0f = (jnp.dot(c1W0_ref[...], x0, preferred_element_type=f32)
           + bvec(OFF_C1B0, M0_OUT_1))                                 # (40, TE)
    gates = jax.nn.sigmoid(y0f[:EXTRA])                                # (16, TE)

    # ---- SO(2) conv 1, m = 1 block (two dots, no lane-axis concat) -----------
    sp, tp = rotate(range(N0, N0 + N1))
    x1p = jnp.concatenate(sp + tp, axis=0) * rad1                      # (16, TE)
    y1p = jnp.dot(c1W1_ref[...], x1p, preferred_element_type=f32)      # (32, TE)
    sn, tn = rotate(range(N0 + N1, KMASK))
    x1n = jnp.concatenate(sn + tn, axis=0) * rad1
    y1n = jnp.dot(c1W1_ref[...], x1n, preferred_element_type=f32)
    half1 = M1_OUT_1 // 2
    out_real = y1p[:half1] - y1n[half1:]                               # (16, TE)
    out_imag = y1n[:half1] + y1p[half1:]

    # ---- gate activation -------------------------------------------------------
    act0 = jnp.concatenate([jax.nn.silu(y0f[EXTRA:EXTRA + C_HID]),
                            y0f[EXTRA + C_HID:] * gates], axis=0)      # (24, TE)
    act_pos = out_real * gates
    act_neg = out_imag * gates

    # ---- SO(2) conv 2 (output rows padded to 8-row groups; only top 4 read) --
    z0 = (jnp.dot(c2W0_ref[...], act0, preferred_element_type=f32)
          + bvec(OFF_C2B0, N0 * CPAD))                                  # (24, TE)
    y2p = jnp.dot(c2W1_ref[...], act_pos, preferred_element_type=f32)   # (32, TE)
    y2n = jnp.dot(c2W1_ref[...], act_neg, preferred_element_type=f32)
    half2 = N1 * CPAD
    z_real = y2p[:half2] - y2n[half2:]                                  # (16, TE)
    z_imag = y2n[:half2] + y2p[half2:]

    # ---- polynomial envelope (exponent = 5) ------------------------------------
    d = xe_ref[EDGE_CH[0]:EDGE_CH[0] + 1, :] * (1.0 / CUTOFF)           # (1, TE)
    d2 = d * d
    d4 = d2 * d2
    d5 = d4 * d
    d6 = d5 * d
    d7 = d6 * d
    env = jnp.where(d < 1.0, 1.0 - 21.0 * d5 + 35.0 * d6 - 15.0 * d7,
                    jnp.zeros_like(d))

    zblk = [z0[k * CPAD:k * CPAD + C_SPH] * env for k in range(N0)]
    zblk += [z_real[k * CPAD:k * CPAD + C_SPH] * env for k in range(N1)]
    zblk += [z_imag[k * CPAD:k * CPAD + C_SPH] * env for k in range(N1)]  # 7 x (4, TE)

    # ---- inverse Wigner rotation; pack two coefficients per 8-row output group
    woff = KMASK * KFULL
    zero4 = jnp.zeros((C_SPH, te), f32)

    def rot_back(i):
        terms = [wg_ref[woff + i * KMASK + k: woff + i * KMASK + k + 1, :].astype(f32)
                 * zblk[k] for k in range(KMASK)]
        return _tree_sum(terms)

    for g in range(OUT_GROUPS):
        a = rot_back(2 * g)
        b = rot_back(2 * g + 1) if 2 * g + 1 < KFULL else zero4
        out_ref[g * CPAD:(g + 1) * CPAD, :] = jnp.concatenate([a, b], axis=0)


# ----------------------------- wrapper ----------------------------------------
def edgewise_pallas(x, x_edge, edge_distance, edge_index, wigner, wigner_inv,
                    params, node_offset=0):
    f32, bf16 = jnp.float32, jnp.bfloat16
    E = edge_index.shape[1]
    N = x.shape[0]
    # adaptive tile: up to TE_MAX edges/lane-tile, but keep >= 2 tiles when the
    # edge count allows it (v7x megacore sharding across the "parallel" axis).
    te = int(min(TE_MAX, _round_up(max((E + 1) // 2, 1), 128)))
    e_pad = _round_up(E, te)
    n_tiles = e_pad // te
    pad = e_pad - E

    src, dst = edge_index[0], edge_index[1]

    # Node features: transpose the (small) node table once and gather columns so
    # per-edge data is emitted feature-major / edge-minor directly (no (E,72).T).
    x_feat = x.reshape(N, KFULL * C_SPH).T.astype(bf16)               # (36, N)
    xs_c = jnp.take(x_feat, src, axis=1)                              # (36, E)
    xt_c = jnp.take(x_feat, dst, axis=1)

    # Wigner slabs: one combined bf16 transpose pass (forward rows || inverse rows).
    # TODO(synk): in the real model the per-edge Wigner matrices are built on the
    # fly; emit them edge-minor there to remove this remaining layout pass.
    sel = jnp.asarray(SEL)
    wig = wigner[:, sel, :].reshape(E, KMASK * KFULL)                 # (E, 63)
    wigo = wigner_inv[:, :, sel].reshape(E, KFULL * KMASK)            # (E, 63)
    wg_c = jnp.concatenate([wig, wigo], axis=1).astype(bf16).T        # (126, E)

    # edge scalars stay f32 (tiny, and keeps the radial MLP / envelope exact)
    xe_c = jnp.concatenate([x_edge, edge_distance.reshape(E, 1)], axis=1).astype(f32).T

    def padlane(a):
        return jnp.pad(a, ((0, 0), (0, pad))) if pad else a

    xs_c, xt_c, wg_c, xe_c = map(padlane, (xs_c, xt_c, wg_c, xe_c))

    # weights: (out, in) orientation, conv-1 input columns / radial output rows
    # permuted to the kernel's src-block||tgt-block order; conv-2 rows padded so
    # every coefficient block starts on an 8-row boundary.
    t = lambda w: jnp.asarray(w).T
    p0, p1, prad = jnp.asarray(P0), jnp.asarray(P1), jnp.asarray(P_RAD)
    rW1 = t(params["rW1"])
    rW2 = t(params["rW2"])
    rW3 = t(params["rW3"])[prad]
    c1W0 = t(params["c1W0"])[:, p0]
    c1W1 = t(params["c1W1"])[:, p1]

    sel0 = np.array([k * CPAD + c for k in range(N0) for c in range(C_SPH)])
    c2W0 = jnp.zeros((N0 * CPAD, M0_IN_2), f32).at[sel0].set(t(params["c2W0"]))
    c2b0 = jnp.zeros((N0 * CPAD, 1), f32).at[sel0].set(t(params["c2b0"]))
    sel1 = np.array([h * (N1 * CPAD) + k * CPAD + c
                     for h in range(2) for k in range(N1) for c in range(C_SPH)])
    c2W1 = jnp.zeros((2 * N1 * CPAD, M1_IN_2), f32).at[sel1].set(t(params["c2W1"]))

    # packed biases / LN affines: one (200, 1) column with static row offsets
    bvec = jnp.concatenate([t(params["rb1"]), t(params["rg1"]), t(params["rB1"]),
                            t(params["rb2"]), t(params["rg2"]), t(params["rB2"]),
                            t(params["rb3"])[prad], t(params["c1b0"]), c2b0], axis=0)
    assert bvec.shape == (BROWS, 1)

    per_edge = [xs_c, xt_c, wg_c, xe_c]
    weights = [rW1, rW2, rW3, c1W0, c1W1, c2W0, c2W1, bvec]

    def edge_spec(a):
        return pl.BlockSpec((a.shape[0], te), lambda i: (0, i))

    def w_spec(a):
        return pl.BlockSpec(a.shape, lambda i: (0, 0))

    out_flat = pl.pallas_call(
        edgewise_kernel,
        out_shape=jax.ShapeDtypeStruct((OUT_ROWS, e_pad), f32),
        grid=(n_tiles,),
        in_specs=[edge_spec(a) for a in per_edge] + [w_spec(w) for w in weights],
        out_specs=pl.BlockSpec((OUT_ROWS, te), lambda i: (0, i)),
        scratch_shapes=[pltpu.VMEM((KFULL * C_SPH, te), f32),
                        pltpu.VMEM((KFULL * C_SPH, te), f32)],
        compiler_params=pltpu.CompilerParams(dimension_semantics=("parallel",)),
    )(*per_edge, *weights)

    # scatter-add directly in the kernel's feature-major layout; the only
    # remaining transpose is node-sized, not edge-sized.
    # TODO(synk): the x[edge_index] gather and this index_add_ scatter over nodes
    # are data-dependent and stay in plain JAX glue.
    msg = out_flat[:KFULL * C_SPH, :E]                                 # (36, E)
    acc = jnp.zeros((KFULL * C_SPH, N), f32).at[:, dst - node_offset].add(msg)
    return acc.T.reshape(N, KFULL, C_SPH)


# ----------------------------- pure-JAX reference ------------------------------
def edgewise_reference(x, x_edge, edge_distance, edge_index, wigner, wigner_inv,
                       params, node_offset=0):
    HP = jax.lax.Precision.HIGHEST
    mm = lambda a, b: jnp.dot(a, b, precision=HP)
    E = edge_index.shape[1]
    perm = jnp.asarray(PERM)
    inv_perm = jnp.asarray(INV_PERM)
    out_mask = jnp.asarray(OUT_MASK)
    n0, n1 = M_SIZE[0], M_SIZE[1]

    xs, xt = x[edge_index[0]], x[edge_index[1]]
    xm = jnp.concatenate([xs, xt], axis=2)
    xm = jnp.einsum('eij,ejc->eic', wigner[:, out_mask, :], xm, precision=HP)

    # so2_conv_1 (m-primary)
    xm_mp = xm[:, perm, :]
    r = jax.nn.silu(_layernorm(mm(x_edge, params["rW1"]) + params["rb1"],
                               params["rg1"], params["rB1"]))
    r = jax.nn.silu(_layernorm(mm(r, params["rW2"]) + params["rb2"],
                               params["rg2"], params["rB2"]))
    rad = mm(r, params["rW3"]) + params["rb3"]

    x0 = xm_mp[:, :n0, :].reshape(E, n0 * C_IN) * rad[:, :M0_IN_1]
    y0f = mm(x0, params["c1W0"]) + params["c1b0"]
    gates_raw = y0f[:, :EXTRA]
    y0 = y0f[:, EXTRA:].reshape(E, n0, C_HID)

    x1 = xm_mp[:, n0:, :].reshape(E, 2, n1 * C_IN) * rad[:, M0_IN_1:][:, None, :]
    y1 = jnp.einsum('erk,ko->ero', x1, params["c1W1"], precision=HP)
    half = M1_OUT_1 // 2
    x_r, x_i = y1[..., :half], y1[..., half:]
    y1 = jnp.concatenate([x_r[:, 0:1] - x_i[:, 1:2],
                          x_r[:, 1:2] + x_i[:, 0:1]], axis=1).reshape(E, 2 * n1, C_HID)
    y_lp = jnp.concatenate([y0, y1], axis=1)[:, inv_perm, :]

    # gate activation (l-primary, as in the torch module)
    expand_index = []
    for l in range(1, LMAX + 1):
        expand_index += [l - 1] * min(2 * l + 1, 2 * MMAX + 1)
    expand_index = jnp.asarray(expand_index)
    gates = jax.nn.sigmoid(gates_raw).reshape(E, LMAX, C_HID)[:, expand_index, :]
    y_lp = jnp.concatenate([jax.nn.silu(y_lp[:, :1, :]), y_lp[:, 1:, :] * gates], axis=1)

    # so2_conv_2
    z_mp_in = y_lp[:, perm, :]
    z0 = (mm(z_mp_in[:, :n0, :].reshape(E, n0 * C_HID), params["c2W0"])
          + params["c2b0"]).reshape(E, n0, C_SPH)
    z1in = z_mp_in[:, n0:, :].reshape(E, 2, n1 * C_HID)
    z1 = jnp.einsum('erk,ko->ero', z1in, params["c2W1"], precision=HP)
    half2 = M1_OUT_2 // 2
    zr, zi = z1[..., :half2], z1[..., half2:]
    z1 = jnp.concatenate([zr[:, 0:1] - zi[:, 1:2],
                          zr[:, 1:2] + zi[:, 0:1]], axis=1).reshape(E, 2 * n1, C_SPH)
    z_lp = jnp.concatenate([z0, z1], axis=1)[:, inv_perm, :]

    # envelope
    d = edge_distance / CUTOFF
    env = jnp.where(d < 1.0, 1.0 - 21.0 * d ** 5 + 35.0 * d ** 6 - 15.0 * d ** 7,
                    jnp.zeros_like(d))
    z_lp = z_lp * env[:, None, None]

    out = jnp.einsum('eij,ejc->eic', wigner_inv[:, :, out_mask], z_lp, precision=HP)
    new_emb = jnp.zeros((x.shape[0], KFULL, C_SPH), out.dtype)
    return new_emb.at[edge_index[1] - node_offset].add(out)


# ----------------------------- parameter init ----------------------------------
def init_params(key):
    f32 = jnp.float32
    ks = jax.random.split(key, 16)

    def lin_w(k, fin, fout):
        return jax.random.normal(k, (fin, fout), f32) / np.sqrt(fin)

    def bias(k, n):
        return 0.1 * jax.random.normal(k, (1, n), f32)

    p = {}
    p["rW1"] = lin_w(ks[0], EDGE_CH[0], EDGE_CH[1]); p["rb1"] = bias(ks[1], EDGE_CH[1])
    p["rg1"] = 1.0 + 0.1 * jax.random.normal(ks[2], (1, EDGE_CH[1]), f32)
    p["rB1"] = bias(ks[3], EDGE_CH[1])
    p["rW2"] = lin_w(ks[4], EDGE_CH[1], EDGE_CH[2]); p["rb2"] = bias(ks[5], EDGE_CH[2])
    p["rg2"] = 1.0 + 0.1 * jax.random.normal(ks[6], (1, EDGE_CH[2]), f32)
    p["rB2"] = bias(ks[7], EDGE_CH[2])
    p["rW3"] = lin_w(ks[8], EDGE_CH[2], NUM_RAD); p["rb3"] = bias(ks[9], NUM_RAD)
    p["c1W0"] = lin_w(ks[10], M0_IN_1, M0_OUT_1); p["c1b0"] = bias(ks[11], M0_OUT_1)
    p["c1W1"] = lin_w(ks[12], M1_IN_1, M1_OUT_1)
    p["c2W0"] = lin_w(ks[13], M0_IN_2, M0_OUT_2); p["c2b0"] = bias(ks[14], M0_OUT_2)
    p["c2W1"] = lin_w(ks[15], M1_IN_2, M1_OUT_2)
    return p


# ----------------------------- main --------------------------------------------
if __name__ == "__main__":
    key = jax.random.PRNGKey(0)
    kx, ke, kd, ki, kw, kwi, kp = jax.random.split(key, 7)
    x = jax.random.normal(kx, (N_NODES, KFULL, C_SPH), jnp.float32)
    x_edge = jax.random.normal(ke, (N_EDGES, EDGE_CH[0]), jnp.float32)
    edge_distance = jax.random.uniform(kd, (N_EDGES,), jnp.float32, 0.5, CUTOFF * 1.2)
    edge_index = jax.random.randint(ki, (2, N_EDGES), 0, N_NODES)
    wigner = 0.3 * jax.random.normal(kw, (N_EDGES, KFULL, KFULL), jnp.float32)
    wigner_inv = 0.3 * jax.random.normal(kwi, (N_EDGES, KFULL, KFULL), jnp.float32)
    params = init_params(kp)

    out = edgewise_pallas(x, x_edge, edge_distance, edge_index,
                          wigner, wigner_inv, params)
    out = jax.block_until_ready(out)

    ref = edgewise_reference(x, x_edge, edge_distance, edge_index,
                             wigner, wigner_inv, params)
    ref = jax.block_until_ready(ref)

    assert out.shape == (N_NODES, KFULL, C_SPH)
    np.testing.assert_allclose(np.asarray(out), np.asarray(ref),
                               rtol=2e-2, atol=2e-2)
    print("KERNEL_OK")
</pallas_src>

<mosaic_0001>
module attributes {stable_mosaic.version = 11 : i64} {
  func.func @edgewise_kernel(%arg0: i32, %arg1: memref<36x128xbf16, #tpu.memory_space<vmem>>, %arg2: memref<36x128xbf16, #tpu.memory_space<vmem>>, %arg3: memref<126x128xbf16, #tpu.memory_space<vmem>>, %arg4: memref<9x128xf32, #tpu.memory_space<vmem>>, %arg5: memref<16x8xf32, #tpu.memory_space<vmem>>, %arg6: memref<16x16xf32, #tpu.memory_space<vmem>>, %arg7: memref<40x16xf32, #tpu.memory_space<vmem>>, %arg8: memref<40x24xf32, #tpu.memory_space<vmem>>, %arg9: memref<32x16xf32, #tpu.memory_space<vmem>>, %arg10: memref<24x24xf32, #tpu.memory_space<vmem>>, %arg11: memref<32x16xf32, #tpu.memory_space<vmem>>, %arg12: memref<200x1xf32, #tpu.memory_space<vmem>>, %arg13: memref<40x128xf32, #tpu.memory_space<vmem>>, %arg14: memref<36x128xf32, #tpu.memory_space<vmem>>, %arg15: memref<36x128xf32, #tpu.memory_space<vmem>>) attributes {dimension_semantics = [#tpu.dimension_semantics<parallel>], iteration_bounds = array<i64: 1>, scalar_prefetch = 0 : i64, scratch_operands = 2 : i64, tpu.core_type = #tpu.core_type<tc>, window_params = [{transform_indices = @transform_0, window_bounds = array<i64: 36, 128>}, {transform_indices = @transform_1, window_bounds = array<i64: 36, 128>}, {transform_indices = @transform_2, window_bounds = array<i64: 126, 128>}, {transform_indices = @transform_3, window_bounds = array<i64: 9, 128>}, {pipeline_mode = #tpu.pipeline_mode<synchronous>, transform_indices = @transform_4, window_bounds = array<i64: 16, 8>}, {pipeline_mode = #tpu.pipeline_mode<synchronous>, transform_indices = @transform_5, window_bounds = array<i64: 16, 16>}, {pipeline_mode = #tpu.pipeline_mode<synchronous>, transform_indices = @transform_6, window_bounds = array<i64: 40, 16>}, {pipeline_mode = #tpu.pipeline_mode<synchronous>, transform_indices = @transform_7, window_bounds = array<i64: 40, 24>}, {pipeline_mode = #tpu.pipeline_mode<synchronous>, transform_indices = @transform_8, window_bounds = array<i64: 32, 16>}, {pipeline_mode = #tpu.pipeline_mode<synchronous>, transform_indices = @transform_9, window_bounds = array<i64: 24, 24>}, {pipeline_mode = #tpu.pipeline_mode<synchronous>, transform_indices = @transform_10, window_bounds = array<i64: 32, 16>}, {pipeline_mode = #tpu.pipeline_mode<synchronous>, transform_indices = @transform_11, window_bounds = array<i64: 200, 1>}, {transform_indices = @transform_12, window_bounds = array<i64: 40, 128>}]} {
    %c0 = arith.constant 0 : index
    %c0_0 = arith.constant 0 : index
    %0 = vector.load %arg1[%c0, %c0_0] : memref<36x128xbf16, #tpu.memory_space<vmem>>, vector<16x128xbf16>
    %1 = arith.extf %0 : vector<16x128xbf16> to vector<16x128xf32>
    %c0_1 = arith.constant 0 : index
    %c0_2 = arith.constant 0 : index
    %2 = vector.load %arg14[%c0_1, %c0_2] : memref<36x128xf32, #tpu.memory_space<vmem>>, vector<16x128xf32>
    tpu.vector_store %arg14[%c0_1, %c0_2], %1 {strides = array<i32>} : memref<36x128xf32, #tpu.memory_space<vmem>>, vector<16x128xf32>,
    %c16 = arith.constant 16 : index
    %c0_3 = arith.constant 0 : index
    %3 = vector.load %arg1[%c16, %c0_3] : memref<36x128xbf16, #tpu.memory_space<vmem>>, vector<16x128xbf16>
    %4 = arith.extf %3 : vector<16x128xbf16> to vector<16x128xf32>
    %c16_4 = arith.constant 16 : index
    %c0_5 = arith.constant 0 : index
    %5 = vector.load %arg14[%c16_4, %c0_5] : memref<36x128xf32, #tpu.memory_space<vmem>>, vector<16x128xf32>
    tpu.vector_store %arg14[%c16_4, %c0_5], %4 {strides = array<i32>} : memref<36x128xf32, #tpu.memory_space<vmem>>, vector<16x128xf32>,
    %c32 = arith.constant 32 : index
    %c0_6 = arith.constant 0 : index
    %6 = vector.load %arg1[%c32, %c0_6] : memref<36x128xbf16, #tpu.memory_space<vmem>>, vector<4x128xbf16>
    %7 = arith.extf %6 : vector<4x128xbf16> to vector<4x128xf32>
    %c32_7 = arith.constant 32 : index
    %c0_8 = arith.constant 0 : index
    %8 = vector.load %arg14[%c32_7, %c0_8] : memref<36x128xf32, #tpu.memory_space<vmem>>, vector<4x128xf32>
    tpu.vector_store %arg14[%c32_7, %c0_8], %7 {strides = array<i32>} : memref<36x128xf32, #tpu.memory_space<vmem>>, vector<4x128xf32>,
    %c0_9 = arith.constant 0 : index
    %c0_10 = arith.constant 0 : index
    %9 = vector.load %arg2[%c0_9, %c0_10] : memref<36x128xbf16, #tpu.memory_space<vmem>>, vector<16x128xbf16>
    %10 = arith.extf %9 : vector<16x128xbf16> to vector<16x128xf32>
    %c0_11 = arith.constant 0 : index
    %c0_12 = arith.constant 0 : index
    %11 = vector.load %arg15[%c0_11, %c0_12] : memref<36x128xf32, #tpu.memory_space<vmem>>, vector<16x128xf32>
    tpu.vector_store %arg15[%c0_11, %c0_12], %10 {strides = array<i32>} : memref<36x128xf32, #tpu.memory_space<vmem>>, vector<16x128xf32>,
    %c16_13 = arith.constant 16 : index
    %c0_14 = arith.constant 0 : index
    %12 = vector.load %arg2[%c16_13, %c0_14] : memref<36x128xbf16, #tpu.memory_space<vmem>>, vector<16x128xbf16>
    %13 = arith.extf %12 : vector<16x128xbf16> to vector<16x128xf32>
    %c16_15 = arith.constant 16 : index
    %c0_16 = arith.constant 0 : index
    %14 = vector.load %arg15[%c16_15, %c0_16] : memref<36x128xf32, #tpu.memory_space<vmem>>, vector<16x128xf32>
    tpu.vector_store %arg15[%c16_15, %c0_16], %13 {strides = array<i32>} : memref<36x128xf32, #tpu.memory_space<vmem>>, vector<16x128xf32>,
    %c32_17 = arith.constant 32 : index
    %c0_18 = arith.constant 0 : index
    %15 = vector.load %arg2[%c32_17, %c0_18] : memref<36x128xbf16, #tpu.memory_space<vmem>>, vector<4x128xbf16>
    %16 = arith.extf %15 : vector<4x128xbf16> to vector<4x128xf32>
    %c32_19 = arith.constant 32 : index
    %c0_20 = arith.constant 0 : index
    %17 = vector.load %arg15[%c32_19, %c0_20] : memref<36x128xf32, #tpu.memory_space<vmem>>, vector<4x128xf32>
    tpu.vector_store %arg15[%c32_19, %c0_20], %16 {strides = array<i32>} : memref<36x128xf32, #tpu.memory_space<vmem>>, vector<4x128xf32>,
    %c0_21 = arith.constant 0 : index
    %c0_22 = arith.constant 0 : index
    %18 = vector.load %arg4[%c0_21, %c0_22] : memref<9x128xf32, #tpu.memory_space<vmem>>, vector<8x128xf32>
    %c0_23 = arith.constant 0 : index
    %c0_24 = arith.constant 0 : index
    %19 = vector.load %arg5[%c0_23, %c0_24] : memref<16x8xf32, #tpu.memory_space<vmem>>, vector<16x8xf32>
    %cst = arith.constant dense<0.000000e+00> : vector<16x128xf32>
    %20 = tpu.matmul %19, %18, %cst {dimension_numbers = #tpu.dot_dimension_numbers<[1], [0], [0], [1], [0, 0, 1, 1], [], []>} : vector<16x8xf32>, vector<8x128xf32>, vector<16x128xf32> -> vector<16x128xf32>
    %c0_25 = arith.constant 0 : index
    %c0_26 = arith.constant 0 : index
    %21 = vector.load %arg12[%c0_25, %c0_26] : memref<200x1xf32, #tpu.memory_space<vmem>>, vector<16x1xf32>
    %22 = vector.broadcast %21 : vector<16x1xf32> to vector<16x128xf32>
    %23 = arith.addf %20, %22 : vector<16x128xf32>
    %c16_27 = arith.constant 16 : index
    %c0_28 = arith.constant 0 : index
    %24 = vector.load %arg12[%c16_27, %c0_28] : memref<200x1xf32, #tpu.memory_space<vmem>>, vector<16x1xf32>
    %c32_29 = arith.constant 32 : index
    %c0_30 = arith.constant 0 : index
    %25 = vector.load %arg12[%c32_29, %c0_30] : memref<200x1xf32, #tpu.memory_space<vmem>>, vector<16x1xf32>
    %cst_31 = arith.constant 6.250000e-02 : f32
    %26 = vector.broadcast %cst_31 : f32 to vector<1x16xf32>
    %cst_32 = arith.constant dense<0.000000e+00> : vector<1x128xf32>
    %27 = tpu.matmul %26, %23, %cst_32 {dimension_numbers = #tpu.dot_dimension_numbers<[1], [0], [0], [1], [0, 0, 1, 1], [], []>} : vector<1x16xf32>, vector<16x128xf32>, vector<1x128xf32> -> vector<1x128xf32>
    %28 = vector.broadcast %27 : vector<1x128xf32> to vector<16x128xf32>
    %29 = arith.subf %23, %28 : vector<16x128xf32>
    %30 = arith.mulf %29, %29 : vector<16x128xf32>
    %cst_33 = arith.constant dense<0.000000e+00> : vector<1x128xf32>
    %31 = tpu.matmul %26, %30, %cst_33 {dimension_numbers = #tpu.dot_dimension_numbers<[1], [0], [0], [1], [0, 0, 1, 1], [], []>} : vector<1x16xf32>, vector<16x128xf32>, vector<1x128xf32> -> vector<1x128xf32>
    %cst_34 = arith.constant 9.99999974E-6 : f32
    %32 = vector.broadcast %cst_34 : f32 to vector<1x128xf32>
    %33 = arith.addf %31, %32 : vector<1x128xf32>
    %34 = math.rsqrt %33 : vector<1x128xf32>
    %35 = vector.broadcast %34 : vector<1x128xf32> to vector<16x128xf32>
    %36 = arith.mulf %29, %35 : vector<16x128xf32>
    %37 = vector.broadcast %24 : vector<16x1xf32> to vector<16x128xf32>
    %38 = arith.mulf %36, %37 : vector<16x128xf32>
    %39 = vector.broadcast %25 : vector<16x1xf32> to vector<16x128xf32>
    %40 = arith.addf %38, %39 : vector<16x128xf32>
    %41 = arith.negf %40 : vector<16x128xf32>
    %42 = math.exp %41 : vector<16x128xf32>
    %cst_35 = arith.constant 1.000000e+00 : f32
    %43 = vector.broadcast %cst_35 : f32 to vector<16x128xf32>
    %44 = arith.addf %43, %42 : vector<16x128xf32>
    %45 = arith.divf %43, %44 : vector<16x128xf32>
    %46 = arith.mulf %40, %45 : vector<16x128xf32>
    %c0_36 = arith.constant 0 : index
    %c0_37 = arith.constant 0 : index
    %47 = vector.load %arg6[%c0_36, %c0_37] : memref<16x16xf32, #tpu.memory_space<vmem>>, vector<16x16xf32>
    %cst_38 = arith.constant dense<0.000000e+00> : vector<16x128xf32>
    %48 = tpu.matmul %47, %46, %cst_38 {dimension_numbers = #tpu.dot_dimension_numbers<[1], [0], [0], [1], [0, 0, 1, 1], [], []>} : vector<16x16xf32>, vector<16x128xf32>, vector<16x128xf32> -> vector<16x128xf32>
    %c48 = arith.constant 48 : index
    %c0_39 = arith.constant 0 : index
    %49 = vector.load %arg12[%c48, %c0_39] : memref<200x1xf32, #tpu.memory_space<vmem>>, vector<16x1xf32>
    %50 = vector.broadcast %49 : vector<16x1xf32> to vector<16x128xf32>
    %51 = arith.addf %48, %50 : vector<16x128xf32>
    %c64 = arith.constant 64 : index
    %c0_40 = arith.constant 0 : index
    %52 = vector.load %arg12[%c64, %c0_40] : memref<200x1xf32, #tpu.memory_space<vmem>>, vector<16x1xf32>
    %c80 = arith.constant 80 : index
    %c0_41 = arith.constant 0 : index
    %53 = vector.load %arg12[%c80, %c0_41] : memref<200x1xf32, #tpu.memory_space<vmem>>, vector<16x1xf32>
    %cst_42 = arith.constant 6.250000e-02 : f32
    %54 = vector.broadcast %cst_42 : f32 to vector<1x16xf32>
    %cst_43 = arith.constant dense<0.000000e+00> : vector<1x128xf32>
    %55 = tpu.matmul %54, %51, %cst_43 {dimension_numbers = #tpu.dot_dimension_numbers<[1], [0], [0], [1], [0, 0, 1, 1], [], []>} : vector<1x16xf32>, vector<16x128xf32>, vector<1x128xf32> -> vector<1x128xf32>
    %56 = vector.broadcast %55 : vector<1x128xf32> to vector<16x128xf32>
    %57 = arith.subf %51, %56 : vector<16x128xf32>
    %58 = arith.mulf %57, %57 : vector<16x128xf32>
    %cst_44 = arith.constant dense<0.000000e+00> : vector<1x128xf32>
    %59 = tpu.matmul %54, %58, %cst_44 {dimension_numbers = #tpu.dot_dimension_numbers<[1], [0], [0], [1], [0, 0, 1, 1], [], []>} : vector<1x16xf32>, vector<16x128xf32>, vector<1x128xf32> -> vector<1x128xf32>
    %cst_45 = arith.constant 9.99999974E-6 : f32
    %60 = vector.broadcast %cst_45 : f32 to vector<1x128xf32>
    %61 = arith.addf %59, %60 : vector<1x128xf32>
    %62 = math.rsqrt %61 : vector<1x128xf32>
    %63 = vector.broadcast %62 : vector<1x128xf32> to vector<16x128xf32>
    %64 = arith.mulf %57, %63 : vector<16x128xf32>
    %65 = vector.broadcast %52 : vector<16x1xf32> to vector<16x128xf32>
    %66 = arith.mulf %64, %65 : vector<16x128xf32>
    %67 = vector.broadcast %53 : vector<16x1xf32> to vector<16x128xf32>
    %68 = arith.addf %66, %67 : vector<16x128xf32>
    %69 = arith.negf %68 : vector<16x128xf32>
    %70 = math.exp %69 : vector<16x128xf32>
    %cst_46 = arith.constant 1.000000e+00 : f32
    %71 = vector.broadcast %cst_46 : f32 to vector<16x128xf32>
    %72 = arith.addf %71, %70 : vector<16x128xf32>
    %73 = arith.divf %71, %72 : vector<16x128xf32>
    %74 = arith.mulf %68, %73 : vector<16x128xf32>
    %c0_47 = arith.constant 0 : index
    %c0_48 = arith.constant 0 : index
    %75 = vector.load %arg7[%c0_47, %c0_48] : memref<40x16xf32, #tpu.memory_space<vmem>>, vector<40x16xf32>
    %cst_49 = arith.constant dense<0.000000e+00> : vector<40x128xf32>
    %76 = tpu.matmul %75, %74, %cst_49 {dimension_numbers = #tpu.dot_dimension_numbers<[1], [0], [0], [1], [0, 0, 1, 1], [], []>} : vector<40x16xf32>, vector<16x128xf32>, vector<40x128xf32> -> vector<40x128xf32>
    %c96 = arith.constant 96 : index
    %c0_50 = arith.constant 0 : index
    %77 = vector.load %arg12[%c96, %c0_50] : memref<200x1xf32, #tpu.memory_space<vmem>>, vector<40x1xf32>
    %78 = vector.broadcast %77 : vector<40x1xf32> to vector<40x128xf32>
    %79 = arith.addf %76, %78 : vector<40x128xf32>
    %80 = vector.extract_strided_slice %79 {offsets = [0, 0], sizes = [24, 128], strides = [1, 1]} : vector<40x128xf32> to vector<24x128xf32>
    %81 = vector.extract_strided_slice %79 {offsets = [24, 0], sizes = [16, 128], strides = [1, 1]} : vector<40x128xf32> to vector<16x128xf32>
    %c0_51 = arith.constant 0 : index
    %c0_52 = arith.constant 0 : index
    %82 = vector.load %arg3[%c0_51, %c0_52] : memref<126x128xbf16, #tpu.memory_space<vmem>>, vector<1x128xbf16>
    %83 = arith.extf %82 : vector<1x128xbf16> to vector<1x128xf32>
    %c0_53 = arith.constant 0 : index
    %c0_54 = arith.constant 0 : index
    %84 = vector.load %arg14[%c0_53, %c0_54] : memref<36x128xf32, #tpu.memory_space<vmem>>, vector<4x128xf32>
    %85 = vector.broadcast %83 : vector<1x128xf32> to vector<4x128xf32>
    %86 = arith.mulf %85, %84 : vector<4x128xf32>
    %c0_55 = arith.constant 0 : index
    %c0_56 = arith.constant 0 : index
    %87 = vector.load %arg15[%c0_55, %c0_56] : memref<36x128xf32, #tpu.memory_space<vmem>>, vector<4x128xf32>
    %88 = vector.broadcast %83 : vector<1x128xf32> to vector<4x128xf32>
    %89 = arith.mulf %88, %87 : vector<4x128xf32>
    %c1 = arith.constant 1 : index
    %c0_57 = arith.constant 0 : index
    %90 = vector.load %arg3[%c1, %c0_57] : memref<126x128xbf16, #tpu.memory_space<vmem>>, vector<1x128xbf16>
    %91 = arith.extf %90 : vector<1x128xbf16> to vector<1x128xf32>
    %c4 = arith.constant 4 : index
    %c0_58 = arith.constant 0 : index
    %92 = vector.load %arg14[%c4, %c0_58] : memref<36x128xf32, #tpu.memory_space<vmem>>, vector<4x128xf32>
    %93 = vector.broadcast %91 : vector<1x128xf32> to vector<4x128xf32>
    %94 = arith.mulf %93, %92 : vector<4x128xf32>
    %c4_59 = arith.constant 4 : index
    %c0_60 = arith.constant 0 : index
    %95 = vector.load %arg15[%c4_59, %c0_60] : memref<36x128xf32, #tpu.memory_space<vmem>>, vector<4x128xf32>
    %96 = vector.broadcast %91 : vector<1x128xf32> to vector<4x128xf32>
    %97 = arith.mulf %96, %95 : vector<4x128xf32>
    %c2 = arith.constant 2 : index
    %c0_61 = arith.constant 0 : index
    %98 = vector.load %arg3[%c2, %c0_61] : memref<126x128xbf16, #tpu.memory_space<vmem>>, vector<1x128xbf16>
    %99 = arith.extf %98 : vector<1x128xbf16> to vector<1x128xf32>
    %c8 = arith.constant 8 : index
    %c0_62 = arith.constant 0 : index
    %100 = vector.load %arg14[%c8, %c0_62] : memref<36x128xf32, #tpu.memory_space<vmem>>, vector<4x128xf32>
    %101 = vector.broadcast %99 : vector<1x128xf32> to vector<4x128xf32>
    %102 = arith.mulf %101, %100 : vector<4x128xf32>
    %c8_63 = arith.constant 8 : index
    %c0_64 = arith.constant 0 : index
    %103 = vector.load %arg15[%c8_63, %c0_64] : memref<36x128xf32, #tpu.memory_space<vmem>>, vector<4x128xf32>
    %104 = vector.broadcast %99 : vector<1x128xf32> to vector<4x128xf32>
    %105 = arith.mulf %104, %103 : vector<4x128xf32>
    %c3 = arith.constant 3 : index
    %c0_65 = arith.constant 0 : index
    %106 = vector.load %arg3[%c3, %c0_65] : memref<126x128xbf16, #tpu.memory_space<vmem>>, vector<1x128xbf16>
    %107 = arith.extf %106 : vector<1x128xbf16> to vector<1x128xf32>
    %c12 = arith.constant 12 : index
    %c0_66 = arith.constant 0 : index
    %108 = vector.load %arg14[%c12, %c0_66] : memref<36x128xf32, #tpu.memory_space<vmem>>, vector<4x128xf32>
    %109 = vector.broadcast %107 : vector<1x128xf32> to vector<4x128xf32>
    %110 = arith.mulf %109, %108 : vector<4x128xf32>
    %c12_67 = arith.constant 12 : index
    %c0_68 = arith.constant 0 : index
    %111 = vector.load %arg15[%c12_67, %c0_68] : memref<36x128xf32, #tpu.memory_space<vmem>>, vector<4x128xf32>
    %112 = vector.broadcast %107 : vector<1x128xf32> to vector<4x128xf32>
    %113 = arith.mulf %112, %111 : vector<4x128xf32>
    %c4_69 = arith.constant 4 : index
    %c0_70 = arith.constant 0 : index
    %114 = vector.load %arg3[%c4_69, %c0_70] : memref<126x128xbf16, #tpu.memory_space<vmem>>, vector<1x128xbf16>
    %115 = arith.extf %114 : vector<1x128xbf16> to vector<1x128xf32>
    %c16_71 = arith.constant 16 : index
    %c0_72 = arith.constant 0 : index
    %116 = vector.load %arg14[%c16_71, %c0_72] : memref<36x128xf32, #tpu.memory_space<vmem>>, vector<4x128xf32>
    %117 = vector.broadcast %115 : vector<1x128xf32> to vector<4x128xf32>
    %118 = arith.mulf %117, %116 : vector<4x128xf32>
    %c16_73 = arith.constant 16 : index
    %c0_74 = arith.constant 0 : index
    %119 = vector.load %arg15[%c16_73, %c0_74] : memref<36x128xf32, #tpu.memory_space<vmem>>, vector<4x128xf32>
    %120 = vector.broadcast %115 : vector<1x128xf32> to vector<4x128xf32>
    %121 = arith.mulf %120, %119 : vector<4x128xf32>
    %c5 = arith.constant 5 : index
    %c0_75 = arith.constant 0 : index
    %122 = vector.load %arg3[%c5, %c0_75] : memref<126x128xbf16, #tpu.memory_space<vmem>>, vector<1x128xbf16>
    %123 = arith.extf %122 : vector<1x128xbf16> to vector<1x128xf32>
    %c20 = arith.constant 20 : index
    %c0_76 = arith.constant 0 : index
    %124 = vector.load %arg14[%c20, %c0_76] : memref<36x128xf32, #tpu.memory_space<vmem>>, vector<4x128xf32>
    %125 = vector.broadcast %123 : vector<1x128xf32> to vector<4x128xf32>
    %126 = arith.mulf %125, %124 : vector<4x128xf32>
    %c20_77 = arith.constant 20 : index
    %c0_78 = arith.constant 0 : index
    %127 = vector.load %arg15[%c20_77, %c0_78] : memref<36x128xf32, #tpu.memory_space<vmem>>, vector<4x128xf32>
    %128 = vector.broadcast %123 : vector<1x128xf32> to vector<4x128xf32>
    %129 = arith.mulf %128, %127 : vector<4x128xf32>
    %c6 = arith.constant 6 : index
    %c0_79 = arith.constant 0 : index
    %130 = vector.load %arg3[%c6, %c0_79] : memref<126x128xbf16, #tpu.memory_space<vmem>>, vector<1x128xbf16>
    %131 = arith.extf %130 : vector<1x128xbf16> to vector<1x128xf32>
    %c24 = arith.constant 24 : index
    %c0_80 = arith.constant 0 : index
    %132 = vector.load %arg14[%c24, %c0_80] : memref<36x128xf32, #tpu.memory_space<vmem>>, vector<4x128xf32>
    %133 = vector.broadcast %131 : vector<1x128xf32> to vector<4x128xf32>
    %134 = arith.mulf %133, %132 : vector<4x128xf32>
    %c24_81 = arith.constant 24 : index
    %c0_82 = arith.constant 0 : index
    %135 = vector.load %arg15[%c24_81, %c0_82] : memref<36x128xf32, #tpu.memory_space<vmem>>, vector<4x128xf32>
    %136 = vector.broadcast %131 : vector<1x128xf32> to vector<4x128xf32>
    %137 = arith.mulf %136, %135 : vector<4x128xf32>
    %c7 = arith.constant 7 : index
    %c0_83 = arith.constant 0 : index
    %138 = vector.load %arg3[%c7, %c0_83] : memref<126x128xbf16, #tpu.memory_space<vmem>>, vector<1x128xbf16>
    %139 = arith.extf %138 : vector<1x128xbf16> to vector<1x128xf32>
    %c28 = arith.constant 28 : index
    %c0_84 = arith.constant 0 : index
    %140 = vector.load %arg14[%c28, %c0_84] : memref<36x128xf32, #tpu.memory_space<vmem>>, vector<4x128xf32>
    %141 = vector.broadcast %139 : vector<1x128xf32> to vector<4x128xf32>
    %142 = arith.mulf %141, %140 : vector<4x128xf32>
    %c28_85 = arith.constant 28 : index
    %c0_86 = arith.constant 0 : index
    %143 = vector.load %arg15[%c28_85, %c0_86] : memref<36x128xf32, #tpu.memory_space<vmem>>, vector<4x128xf32>
    %144 = vector.broadcast %139 : vector<1x128xf32> to vector<4x128xf32>
    %145 = arith.mulf %144, %143 : vector<4x128xf32>
    %c8_87 = arith.constant 8 : index
    %c0_88 = arith.constant 0 : index
    %146 = vector.load %arg3[%c8_87, %c0_88] : memref<126x128xbf16, #tpu.memory_space<vmem>>, vector<1x128xbf16>
    %147 = arith.extf %146 : vector<1x128xbf16> to vector<1x128xf32>
    %c32_89 = arith.constant 32 : index
    %c0_90 = arith.constant 0 : index
    %148 = vector.load %arg14[%c32_89, %c0_90] : memref<36x128xf32, #tpu.memory_space<vmem>>, vector<4x128xf32>
    %149 = vector.broadcast %147 : vector<1x128xf32> to vector<4x128xf32>
    %150 = arith.mulf %149, %148 : vector<4x128xf32>
    %c32_91 = arith.constant 32 : index
    %c0_92 = arith.constant 0 : index
    %151 = vector.load %arg15[%c32_91, %c0_92] : memref<36x128xf32, #tpu.memory_space<vmem>>, vector<4x128xf32>
    %152 = vector.broadcast %147 : vector<1x128xf32> to vector<4x128xf32>
    %153 = arith.mulf %152, %151 : vector<4x128xf32>
    %154 = arith.addf %86, %94 : vector<4x128xf32>
    %155 = arith.addf %102, %110 : vector<4x128xf32>
    %156 = arith.addf %118, %126 : vector<4x128xf32>
    %157 = arith.addf %134, %142 : vector<4x128xf32>
    %158 = arith.addf %154, %155 : vector<4x128xf32>
    %159 = arith.addf %156, %157 : vector<4x128xf32>
    %160 = arith.addf %158, %159 : vector<4x128xf32>
    %161 = arith.addf %160, %150 : vector<4x128xf32>
    %162 = arith.addf %89, %97 : vector<4x128xf32>
    %163 = arith.addf %105, %113 : vector<4x128xf32>
    %164 = arith.addf %121, %129 : vector<4x128xf32>
    %165 = arith.addf %137, %145 : vector<4x128xf32>
    %166 = arith.addf %162, %163 : vector<4x128xf32>
    %167 = arith.addf %164, %165 : vector<4x128xf32>
    %168 = arith.addf %166, %167 : vector<4x128xf32>
    %169 = arith.addf %168, %153 : vector<4x128xf32>
    %c9 = arith.constant 9 : index
    %c0_93 = arith.constant 0 : index
    %170 = vector.load %arg3[%c9, %c0_93] : memref<126x128xbf16, #tpu.memory_space<vmem>>, vector<1x128xbf16>
    %171 = arith.extf %170 : vector<1x128xbf16> to vector<1x128xf32>
    %c0_94 = arith.constant 0 : index
    %c0_95 = arith.constant 0 : index
    %172 = vector.load %arg14[%c0_94, %c0_95] : memref<36x128xf32, #tpu.memory_space<vmem>>, vector<4x128xf32>
    %173 = vector.broadcast %171 : vector<1x128xf32> to vector<4x128xf32>
    %174 = arith.mulf %173, %172 : vector<4x128xf32>
    %c0_96 = arith.constant 0 : index
    %c0_97 = arith.constant 0 : index
    %175 = vector.load %arg15[%c0_96, %c0_97] : memref<36x128xf32, #tpu.memory_space<vmem>>, vector<4x128xf32>
    %176 = vector.broadcast %171 : vector<1x128xf32> to vector<4x128xf32>
    %177 = arith.mulf %176, %175 : vector<4x128xf32>
    %c10 = arith.constant 10 : index
    %c0_98 = arith.constant 0 : index
    %178 = vector.load %arg3[%c10, %c0_98] : memref<126x128xbf16, #tpu.memory_space<vmem>>, vector<1x128xbf16>
    %179 = arith.extf %178 : vector<1x128xbf16> to vector<1x128xf32>
    %c4_99 = arith.constant 4 : index
    %c0_100 = arith.constant 0 : index
    %180 = vector.load %arg14[%c4_99, %c0_100] : memref<36x128xf32, #tpu.memory_space<vmem>>, vector<4x128xf32>
    %181 = vector.broadcast %179 : vector<1x128xf32> to vector<4x128xf32>
    %182 = arith.mulf %181, %180 : vector<4x128xf32>
    %c4_101 = arith.constant 4 : index
    %c0_102 = arith.constant 0 : index
    %183 = vector.load %arg15[%c4_101, %c0_102] : memref<36x128xf32, #tpu.memory_space<vmem>>, vector<4x128xf32>
    %184 = vector.broadcast %179 : vector<1x128xf32> to vector<4x128xf32>
    %185 = arith.mulf %184, %183 : vector<4x128xf32>
    %c11 = arith.constant 11 : index
    %c0_103 = arith.constant 0 : index
    %186 = vector.load %arg3[%c11, %c0_103] : memref<126x128xbf16, #tpu.memory_space<vmem>>, vector<1x128xbf16>
    %187 = arith.extf %186 : vector<1x128xbf16> to vector<1x128xf32>
    %c8_104 = arith.constant 8 : index
    %c0_105 = arith.constant 0 : index
    %188 = vector.load %arg14[%c8_104, %c0_105] : memref<36x128xf32, #tpu.memory_space<vmem>>, vector<4x128xf32>
    %189 = vector.broadcast %187 : vector<1x128xf32> to vector<4x128xf32>
    %190 = arith.mulf %189, %188 : vector<4x128xf32>
    %c8_106 = arith.constant 8 : index
    %c0_107 = arith.constant 0 : index
    %191 = vector.load %arg15[%c8_106, %c0_107] : memref<36x128xf32, #tpu.memory_space<vmem>>, vector<4x128xf32>
    %192 = vector.broadcast %187 : vector<1x128xf32> to vector<4x128xf32>
    %193 = arith.mulf %192, %191 : vector<4x128xf32>
    %c12_108 = arith.constant 12 : index
    %c0_109 = arith.constant 0 : index
    %194 = vector.load %arg3[%c12_108, %c0_109] : memref<126x128xbf16, #tpu.memory_space<vmem>>, vector<1x128xbf16>
    %195 = arith.extf %194 : vector<1x128xbf16> to vector<1x128xf32>
    %c12_110 = arith.constant 12 : index
    %c0_111 = arith.constant 0 : index
    %196 = vector.load %arg14[%c12_110, %c0_111] : memref<36x128xf32, #tpu.memory_space<vmem>>, vector<4x128xf32>
    %197 = vector.broadcast %195 : vector<1x128xf32> to vector<4x128xf32>
    %198 = arith.mulf %197, %196 : vector<4x128xf32>
    %c12_112 = arith.constant 12 : index
    %c0_113 = arith.constant 0 : index
    %199 = vector.load %arg15[%c12_112, %c0_113] : memref<36x128xf32, #tpu.memory_space<vmem>>, vector<4x128xf32>
    %200 = vector.broadcast %195 : vector<1x128xf32> to vector<4x128xf32>
    %201 = arith.mulf %200, %199 : vector<4x128xf32>
    %c13 = arith.constant 13 : index
    %c0_114 = arith.constant 0 : index
    %202 = vector.load %arg3[%c13, %c0_114] : memref<126x128xbf16, #tpu.memory_space<vmem>>, vector<1x128xbf16>
    %203 = arith.extf %202 : vector<1x128xbf16> to vector<1x128xf32>
    %c16_115 = arith.constant 16 : index
    %c0_116 = arith.constant 0 : index
    %204 = vector.load %arg14[%c16_115, %c0_116] : memref<36x128xf32, #tpu.memory_space<vmem>>, vector<4x128xf32>
    %205 = vector.broadcast %203 : vector<1x128xf32> to vector<4x128xf32>
    %206 = arith.mulf %205, %204 : vector<4x128xf32>
    %c16_117 = arith.constant 16 : index
    %c0_118 = arith.constant 0 : index
    %207 = vector.load %arg15[%c16_117, %c0_118] : memref<36x128xf32, #tpu.memory_space<vmem>>, vector<4x128xf32>
    %208 = vector.broadcast %203 : vector<1x128xf32> to vector<4x128xf32>
    %209 = arith.mulf %208, %207 : vector<4x128xf32>
    %c14 = arith.constant 14 : index
    %c0_119 = arith.constant 0 : index
    %210 = vector.load %arg3[%c14, %c0_119] : memref<126x128xbf16, #tpu.memory_space<vmem>>, vector<1x128xbf16>
    %211 = arith.extf %210 : vector<1x128xbf16> to vector<1x128xf32>
    %c20_120 = arith.constant 20 : index
    %c0_121 = arith.constant 0 : index
    %212 = vector.load %arg14[%c20_120, %c0_121] : memref<36x128xf32, #tpu.memory_space<vmem>>, vector<4x128xf32>
    %213 = vector.broadcast %211 : vector<1x128xf32> to vector<4x128xf32>
    %214 = arith.mulf %213, %212 : vector<4x128xf32>
    %c20_122 = arith.constant 20 : index
    %c0_123 = arith.constant 0 : index
    %215 = vector.load %arg15[%c20_122, %c0_123] : memref<36x128xf32, #tpu.memory_space<vmem>>, vector<4x128xf32>
    %216 = vector.broadcast %211 : vector<1x128xf32> to vector<4x128xf32>
    %217 = arith.mulf %216, %215 : vector<4x128xf32>
    %c15 = arith.constant 15 : index
    %c0_124 = arith.constant 0 : index
    %218 = vector.load %arg3[%c15, %c0_124] : memref<126x128xbf16, #tpu.memory_space<vmem>>, vector<1x128xbf16>
    %219 = arith.extf %218 : vector<1x128xbf16> to vector<1x128xf32>
    %c24_125 = arith.constant 24 : index
    %c0_126 = arith.constant 0 : index
    %220 = vector.load %arg14[%c24_125, %c0_126] : memref<36x128xf32, #tpu.memory_space<vmem>>, vector<4x128xf32>
    %221 = vector.broadcast %219 : vector<1x128xf32> to vector<4x128xf32>
    %222 = arith.mulf %221, %220 : vector<4x128xf32>
    %c24_127 = arith.constant 24 : index
    %c0_128 = arith.constant 0 : index
    %223 = vector.load %arg15[%c24_127, %c0_128] : memref<36x128xf32, #tpu.memory_space<vmem>>, vector<4x128xf32>
    %224 = vector.broadcast %219 : vector<1x128xf32> to vector<4x128xf32>
    %225 = arith.mulf %224, %223 : vector<4x128xf32>
    %c16_129 = arith.constant 16 : index
    %c0_130 = arith.constant 0 : index
    %226 = vector.load %arg3[%c16_129, %c0_130] : memref<126x128xbf16, #tpu.memory_space<vmem>>, vector<1x128xbf16>
    %227 = arith.extf %226 : vector<1x128xbf16> to vector<1x128xf32>
    %c28_131 = arith.constant 28 : index
    %c0_132 = arith.constant 0 : index
    %228 = vector.load %arg14[%c28_131, %c0_132] : memref<36x128xf32, #tpu.memory_space<vmem>>, vector<4x128xf32>
    %229 = vector.broadcast %227 : vector<1x128xf32> to vector<4x128xf32>
    %230 = arith.mulf %229, %228 : vector<4x128xf32>
    %c28_133 = arith.constant 28 : index
    %c0_134 = arith.constant 0 : index
    %231 = vector.load %arg15[%c28_133, %c0_134] : memref<36x128xf32, #tpu.memory_space<vmem>>, vector<4x128xf32>
    %232 = vector.broadcast %227 : vector<1x128xf32> to vector<4x128xf32>
    %233 = arith.mulf %232, %231 : vector<4x128xf32>
    %c17 = arith.constant 17 : index
    %c0_135 = arith.constant 0 : index
    %234 = vector.load %arg3[%c17, %c0_135] : memref<126x128xbf16, #tpu.memory_space<vmem>>, vector<1x128xbf16>
    %235 = arith.extf %234 : vector<1x128xbf16> to vector<1x128xf32>
    %c32_136 = arith.constant 32 : index
    %c0_137 = arith.constant 0 : index
    %236 = vector.load %arg14[%c32_136, %c0_137] : memref<36x128xf32, #tpu.memory_space<vmem>>, vector<4x128xf32>
    %237 = vector.broadcast %235 : vector<1x128xf32> to vector<4x128xf32>
    %238 = arith.mulf %237, %236 : vector<4x128xf32>
    %c32_138 = arith.constant 32 : index
    %c0_139 = arith.constant 0 : index
    %239 = vector.load %arg15[%c32_138, %c0_139] : memref<36x128xf32, #tpu.memory_space<vmem>>, vector<4x128xf32>
    %240 = vector.broadcast %235 : vector<1x128xf32> to vector<4x128xf32>
    %241 = arith.mulf %240, %239 : vector<4x128xf32>
    %242 = arith.addf %174, %182 : vector<4x128xf32>
    %243 = arith.addf %190, %198 : vector<4x128xf32>
    %244 = arith.addf %206, %214 : vector<4x128xf32>
    %245 = arith.addf %222, %230 : vector<4x128xf32>
    %246 = arith.addf %242, %243 : vector<4x128xf32>
    %247 = arith.addf %244, %245 : vector<4x128xf32>
    %248 = arith.addf %246, %247 : vector<4x128xf32>
    %249 = arith.addf %248, %238 : vector<4x128xf32>
    %250 = arith.addf %177, %185 : vector<4x128xf32>
    %251 = arith.addf %193, %201 : vector<4x128xf32>
    %252 = arith.addf %209, %217 : vector<4x128xf32>
    %253 = arith.addf %225, %233 : vector<4x128xf32>
    %254 = arith.addf %250, %251 : vector<4x128xf32>
    %255 = arith.addf %252, %253 : vector<4x128xf32>
    %256 = arith.addf %254, %255 : vector<4x128xf32>
    %257 = arith.addf %256, %241 : vector<4x128xf32>
    %c18 = arith.constant 18 : index
    %c0_140 = arith.constant 0 : index
    %258 = vector.load %arg3[%c18, %c0_140] : memref<126x128xbf16, #tpu.memory_space<vmem>>, vector<1x128xbf16>
    %259 = arith.extf %258 : vector<1x128xbf16> to vector<1x128xf32>
    %c0_141 = arith.constant 0 : index
    %c0_142 = arith.constant 0 : index
    %260 = vector.load %arg14[%c0_141, %c0_142] : memref<36x128xf32, #tpu.memory_space<vmem>>, vector<4x128xf32>
    %261 = vector.broadcast %259 : vector<1x128xf32> to vector<4x128xf32>
    %262 = arith.mulf %261, %260 : vector<4x128xf32>
    %c0_143 = arith.constant 0 : index
    %c0_144 = arith.constant 0 : index
    %263 = vector.load %arg15[%c0_143, %c0_144] : memref<36x128xf32, #tpu.memory_space<vmem>>, vector<4x128xf32>
    %264 = vector.broadcast %259 : vector<1x128xf32> to vector<4x128xf32>
    %265 = arith.mulf %264, %263 : vector<4x128xf32>
    %c19 = arith.constant 19 : index
    %c0_145 = arith.constant 0 : index
    %266 = vector.load %arg3[%c19, %c0_145] : memref<126x128xbf16, #tpu.memory_space<vmem>>, vector<1x128xbf16>
    %267 = arith.extf %266 : vector<1x128xbf16> to vector<1x128xf32>
    %c4_146 = arith.constant 4 : index
    %c0_147 = arith.constant 0 : index
    %268 = vector.load %arg14[%c4_146, %c0_147] : memref<36x128xf32, #tpu.memory_space<vmem>>, vector<4x128xf32>
    %269 = vector.broadcast %267 : vector<1x128xf32> to vector<4x128xf32>
    %270 = arith.mulf %269, %268 : vector<4x128xf32>
    %c4_148 = arith.constant 4 : index
    %c0_149 = arith.constant 0 : index
    %271 = vector.load %arg15[%c4_148, %c0_149] : memref<36x128xf32, #tpu.memory_space<vmem>>, vector<4x128xf32>
    %272 = vector.broadcast %267 : vector<1x128xf32> to vector<4x128xf32>
    %273 = arith.mulf %272, %271 : vector<4x128xf32>
    %c20_150 = arith.constant 20 : index
    %c0_151 = arith.constant 0 : index
    %274 = vector.load %arg3[%c20_150, %c0_151] : memref<126x128xbf16, #tpu.memory_space<vmem>>, vector<1x128xbf16>
    %275 = arith.extf %274 : vector<1x128xbf16> to vector<1x128xf32>
    %c8_152 = arith.constant 8 : index
    %c0_153 = arith.constant 0 : index
    %276 = vector.load %arg14[%c8_152, %c0_153] : memref<36x128xf32, #tpu.memory_space<vmem>>, vector<4x128xf32>
    %277 = vector.broadcast %275 : vector<1x128xf32> to vector<4x128xf32>
    %278 = arith.mulf %277, %276 : vector<4x128xf32>
    %c8_154 = arith.constant 8 : index
    %c0_155 = arith.constant 0 : index
    %279 = vector.load %arg15[%c8_154, %c0_155] : memref<36x128xf32, #tpu.memory_space<vmem>>, vector<4x128xf32>
    %280 = vector.broadcast %275 : vector<1x128xf32> to vector<4x128xf32>
    %281 = arith.mulf %280, %279 : vector<4x128xf32>
    %c21 = arith.constant 21 : index
    %c0_156 = arith.constant 0 : index
    %282 = vector.load %arg3[%c21, %c0_156] : memref<126x128xbf16, #tpu.memory_space<vmem>>, vector<1x128xbf16>
    %283 = arith.extf %282 : vector<1x128xbf16> to vector<1x128xf32>
    %c12_157 = arith.constant 12 : index
    %c0_158 = arith.constant 0 : index
    %284 = vector.load %arg14[%c12_157, %c0_158] : memref<36x128xf32, #tpu.memory_space<vmem>>, vector<4x128xf32>
    %285 = vector.broadcast %283 : vector<1x128xf32> to vector<4x128xf32>
    %286 = arith.mulf %285, %284 : vector<4x128xf32>
    %c12_159 = arith.constant 12 : index
    %c0_160 = arith.constant 0 : index
    %287 = vector.load %arg15[%c12_159, %c0_160] : memref<36x128xf32, #tpu.memory_space<vmem>>, vector<4x128xf32>
    %288 = vector.broadcast %283 : vector<1x128xf32> to vector<4x128xf32>
    %289 = arith.mulf %288, %287 : vector<4x128xf32>
    %c22 = arith.constant 22 : index
    %c0_161 = arith.constant 0 : index
    %290 = vector.load %arg3[%c22, %c0_161] : memref<126x128xbf16, #tpu.memory_space<vmem>>, vector<1x128xbf16>
    %291 = arith.extf %290 : vector<1x128xbf16> to vector<1x128xf32>
    %c16_162 = arith.constant 16 : index
    %c0_163 = arith.constant 0 : index
    %292 = vector.load %arg14[%c16_162, %c0_163] : memref<36x128xf32, #tpu.memory_space<vmem>>, vector<4x128xf32>
    %293 = vector.broadcast %291 : vector<1x128xf32> to vector<4x128xf32>
    %294 = arith.mulf %293, %292 : vector<4x128xf32>
    %c16_164 = arith.constant 16 : index
    %c0_165 = arith.constant 0 : index
    %295 = vector.load %arg15[%c16_164, %c0_165] : memref<36x128xf32, #tpu.memory_space<vmem>>, vector<4x128xf32>
    %296 = vector.broadcast %291 : vector<1x128xf32> to vector<4x128xf32>
    %297 = arith.mulf %296, %295 : vector<4x128xf32>
    %c23 = arith.constant 23 : index
    %c0_166 = arith.constant 0 : index
    %298 = vector.load %arg3[%c23, %c0_166] : memref<126x128xbf16, #tpu.memory_space<vmem>>, vector<1x128xbf16>
    %299 = arith.extf %298 : vector<1x128xbf16> to vector<1x128xf32>
    %c20_167 = arith.constant 20 : index
    %c0_168 = arith.constant 0 : index
    %300 = vector.load %arg14[%c20_167, %c0_168] : memref<36x128xf32, #tpu.memory_space<vmem>>, vector<4x128xf32>
    %301 = vector.broadcast %299 : vector<1x128xf32> to vector<4x128xf32>
    %302 = arith.mulf %301, %300 : vector<4x128xf32>
    %c20_169 = arith.constant 20 : index
    %c0_170 = arith.constant 0 : index
    %303 = vector.load %arg15[%c20_169, %c0_170] : memref<36x128xf32, #tpu.memory_space<vmem>>, vector<4x128xf32>
    %304 = vector.broadcast %299 : vector<1x128xf32> to vector<4x128xf32>
    %305 = arith.mulf %304, %303 : vector<4x128xf32>
    %c24_171 = arith.constant 24 : index
    %c0_172 = arith.constant 0 : index
    %306 = vector.load %arg3[%c24_171, %c0_172] : memref<126x128xbf16, #tpu.memory_space<vmem>>, vector<1x128xbf16>
    %307 = arith.extf %306 : vector<1x128xbf16> to vector<1x128xf32>
    %c24_173 = arith.constant 24 : index
    %c0_174 = arith.constant 0 : index
    %308 = vector.load %arg14[%c24_173, %c0_174] : memref<36x128xf32, #tpu.memory_space<vmem>>, vector<4x128xf32>
    %309 = vector.broadcast %307 : vector<1x128xf32> to vector<4x128xf32>
    %310 = arith.mulf %309, %308 : vector<4x128xf32>
    %c24_175 = arith.constant 24 : index
    %c0_176 = arith.constant 0 : index
    %311 = vector.load %arg15[%c24_175, %c0_176] : memref<36x128xf32, #tpu.memory_space<vmem>>, vector<4x128xf32>
    %312 = vector.broadcast %307 : vector<1x128xf32> to vector<4x128xf32>
    %313 = arith.mulf %312, %311 : vector<4x128xf32>
    %c25 = arith.constant 25 : index
    %c0_177 = arith.constant 0 : index
    %314 = vector.load %arg3[%c25, %c0_177] : memref<126x128xbf16, #tpu.memory_space<vmem>>, vector<1x128xbf16>
    %315 = arith.extf %314 : vector<1x128xbf16> to vector<1x128xf32>
    %c28_178 = arith.constant 28 : index
    %c0_179 = arith.constant 0 : index
    %316 = vector.load %arg14[%c28_178, %c0_179] : memref<36x128xf32, #tpu.memory_space<vmem>>, vector<4x128xf32>
    %317 = vector.broadcast %315 : vector<1x128xf32> to vector<4x128xf32>
    %318 = arith.mulf %317, %316 : vector<4x128xf32>
    %c28_180 = arith.constant 28 : index
    %c0_181 = arith.constant 0 : index
    %319 = vector.load %arg15[%c28_180, %c0_181] : memref<36x128xf32, #tpu.memory_space<vmem>>, vector<4x128xf32>
    %320 = vector.broadcast %315 : vector<1x128xf32> to vector<4x128xf32>
    %321 = arith.mulf %320, %319 : vector<4x128xf32>
    %c26 = arith.constant 26 : index
    %c0_182 = arith.constant 0 : index
    %322 = vector.load %arg3[%c26, %c0_182] : memref<126x128xbf16, #tpu.memory_space<vmem>>, vector<1x128xbf16>
    %323 = arith.extf %322 : vector<1x128xbf16> to vector<1x128xf32>
    %c32_183 = arith.constant 32 : index
    %c0_184 = arith.constant 0 : index
    %324 = vector.load %arg14[%c32_183, %c0_184] : memref<36x128xf32, #tpu.memory_space<vmem>>, vector<4x128xf32>
    %325 = vector.broadcast %323 : vector<1x128xf32> to vector<4x128xf32>
    %326 = arith.mulf %325, %324 : vector<4x128xf32>
    %c32_185 = arith.constant 32 : index
    %c0_186 = arith.constant 0 : index
    %327 = vector.load %arg15[%c32_185, %c0_186] : memref<36x128xf32, #tpu.memory_space<vmem>>, vector<4x128xf32>
    %328 = vector.broadcast %323 : vector<1x128xf32> to vector<4x128xf32>
    %329 = arith.mulf %328, %327 : vector<4x128xf32>
    %330 = arith.addf %262, %270 : vector<4x128xf32>
    %331 = arith.addf %278, %286 : vector<4x128xf32>
    %332 = arith.addf %294, %302 : vector<4x128xf32>
    %333 = arith.addf %310, %318 : vector<4x128xf32>
    %334 = arith.addf %330, %331 : vector<4x128xf32>
    %335 = arith.addf %332, %333 : vector<4x128xf32>
    %336 = arith.addf %334, %335 : vector<4x128xf32>
    %337 = arith.addf %336, %326 : vector<4x128xf32>
    %338 = arith.addf %265, %273 : vector<4x128xf32>
    %339 = arith.addf %281, %289 : vector<4x128xf32>
    %340 = arith.addf %297, %305 : vector<4x128xf32>
    %341 = arith.addf %313, %321 : vector<4x128xf32>
    %342 = arith.addf %338, %339 : vector<4x128xf32>
    %343 = arith.addf %340, %341 : vector<4x128xf32>
    %344 = arith.addf %342, %343 : vector<4x128xf32>
    %345 = arith.addf %344, %329 : vector<4x128xf32>
    %346 = tpu.concatenate %161, %249, %337, %169, %257, %345 in 0 : vector<4x128xf32>, vector<4x128xf32>, vector<4x128xf32>, vector<4x128xf32>, vector<4x128xf32>, vector<4x128xf32> -> vector<24x128xf32>
    %347 = arith.mulf %346, %80 : vector<24x128xf32>
    %c0_187 = arith.constant 0 : index
    %c0_188 = arith.constant 0 : index
    %348 = vector.load %arg8[%c0_187, %c0_188] : memref<40x24xf32, #tpu.memory_space<vmem>>, vector<40x24xf32>
    %cst_189 = arith.constant dense<0.000000e+00> : vector<40x128xf32>
    %349 = tpu.matmul %348, %347, %cst_189 {dimension_numbers = #tpu.dot_dimension_numbers<[1], [0], [0], [1], [0, 0, 1, 1], [], []>} : vector<40x24xf32>, vector<24x128xf32>, vector<40x128xf32> -> vector<40x128xf32>
    %c136 = arith.constant 136 : index
    %c0_190 = arith.constant 0 : index
    %350 = vector.load %arg12[%c136, %c0_190] : memref<200x1xf32, #tpu.memory_space<vmem>>, vector<40x1xf32>
    %351 = vector.broadcast %350 : vector<40x1xf32> to vector<40x128xf32>
    %352 = arith.addf %349, %351 : vector<40x128xf32>
    %353 = vector.extract_strided_slice %352 {offsets = [0, 0], sizes = [16, 128], strides = [1, 1]} : vector<40x128xf32> to vector<16x128xf32>
    %354 = arith.negf %353 : vector<16x128xf32>
    %355 = math.exp %354 : vector<16x128xf32>
    %cst_191 = arith.constant 1.000000e+00 : f32
    %356 = vector.broadcast %cst_191 : f32 to vector<16x128xf32>
    %357 = arith.addf %356, %355 : vector<16x128xf32>
    %358 = arith.divf %356, %357 : vector<16x128xf32>
    %c27 = arith.constant 27 : index
    %c0_192 = arith.constant 0 : index
    %359 = vector.load %arg3[%c27, %c0_192] : memref<126x128xbf16, #tpu.memory_space<vmem>>, vector<1x128xbf16>
    %360 = arith.extf %359 : vector<1x128xbf16> to vector<1x128xf32>
    %c0_193 = arith.constant 0 : index
    %c0_194 = arith.constant 0 : index
    %361 = vector.load %arg14[%c0_193, %c0_194] : memref<36x128xf32, #tpu.memory_space<vmem>>, vector<4x128xf32>
    %362 = vector.broadcast %360 : vector<1x128xf32> to vector<4x128xf32>
    %363 = arith.mulf %362, %361 : vector<4x128xf32>
    %c0_195 = arith.constant 0 : index
    %c0_196 = arith.constant 0 : index
    %364 = vector.load %arg15[%c0_195, %c0_196] : memref<36x128xf32, #tpu.memory_space<vmem>>, vector<4x128xf32>
    %365 = vector.broadcast %360 : vector<1x128xf32> to vector<4x128xf32>
    %366 = arith.mulf %365, %364 : vector<4x128xf32>
    %c28_197 = arith.constant 28 : index
    %c0_198 = arith.constant 0 : index
    %367 = vector.load %arg3[%c28_197, %c0_198] : memref<126x128xbf16, #tpu.memory_space<vmem>>, vector<1x128xbf16>
    %368 = arith.extf %367 : vector<1x128xbf16> to vector<1x128xf32>
    %c4_199 = arith.constant 4 : index
    %c0_200 = arith.constant 0 : index
    %369 = vector.load %arg14[%c4_199, %c0_200] : memref<36x128xf32, #tpu.memory_space<vmem>>, vector<4x128xf32>
    %370 = vector.broadcast %368 : vector<1x128xf32> to vector<4x128xf32>
    %371 = arith.mulf %370, %369 : vector<4x128xf32>
    %c4_201 = arith.constant 4 : index
    %c0_202 = arith.constant 0 : index
    %372 = vector.load %arg15[%c4_201, %c0_202] : memref<36x128xf32, #tpu.memory_space<vmem>>, vector<4x128xf32>
    %373 = vector.broadcast %368 : vector<1x128xf32> to vector<4x128xf32>
    %374 = arith.mulf %373, %372 : vector<4x128xf32>
    %c29 = arith.constant 29 : index
    %c0_203 = arith.constant 0 : index
    %375 = vector.load %arg3[%c29, %c0_203] : memref<126x128xbf16, #tpu.memory_space<vmem>>, vector<1x128xbf16>
    %376 = arith.extf %375 : vector<1x128xbf16> to vector<1x128xf32>
    %c8_204 = arith.constant 8 : index
    %c0_205 = arith.constant 0 : index
    %377 = vector.load %arg14[%c8_204, %c0_205] : memref<36x128xf32, #tpu.memory_space<vmem>>, vector<4x128xf32>
    %378 = vector.broadcast %376 : vector<1x128xf32> to vector<4x128xf32>
    %379 = arith.mulf %378, %377 : vector<4x128xf32>
    %c8_206 = arith.constant 8 : index
    %c0_207 = arith.constant 0 : index
    %380 = vector.load %arg15[%c8_206, %c0_207] : memref<36x128xf32, #tpu.memory_space<vmem>>, vector<4x128xf32>
    %381 = vector.broadcast %376 : vector<1x128xf32> to vector<4x128xf32>
    %382 = arith.mulf %381, %380 : vector<4x128xf32>
    %c30 = arith.constant 30 : index
    %c0_208 = arith.constant 0 : index
    %383 = vector.load %arg3[%c30, %c0_208] : memref<126x128xbf16, #tpu.memory_space<vmem>>, vector<1x128xbf16>
    %384 = arith.extf %383 : vector<1x128xbf16> to vector<1x128xf32>
    %c12_209 = arith.constant 12 : index
    %c0_210 = arith.constant 0 : index
    %385 = vector.load %arg14[%c12_209, %c0_210] : memref<36x128xf32, #tpu.memory_space<vmem>>, vector<4x128xf32>
    %386 = vector.broadcast %384 : vector<1x128xf32> to vector<4x128xf32>
    %387 = arith.mulf %386, %385 : vector<4x128xf32>
    %c12_211 = arith.constant 12 : index
    %c0_212 = arith.constant 0 : index
    %388 = vector.load %arg15[%c12_211, %c0_212] : memref<36x128xf32, #tpu.memory_space<vmem>>, vector<4x128xf32>
    %389 = vector.broadcast %384 : vector<1x128xf32> to vector<4x128xf32>
    %390 = arith.mulf %389, %388 : vector<4x128xf32>
    %c31 = arith.constant 31 : index
    %c0_213 = arith.constant 0 : index
    %391 = vector.load %arg3[%c31, %c0_213] : memref<126x128xbf16, #tpu.memory_space<vmem>>, vector<1x128xbf16>
    %392 = arith.extf %391 : vector<1x128xbf16> to vector<1x128xf32>
    %c16_214 = arith.constant 16 : index
    %c0_215 = arith.constant 0 : index
    %393 = vector.load %arg14[%c16_214, %c0_215] : memref<36x128xf32, #tpu.memory_space<vmem>>, vector<4x128xf32>
    %394 = vector.broadcast %392 : vector<1x128xf32> to vector<4x128xf32>
    %395 = arith.mulf %394, %393 : vector<4x128xf32>
    %c16_216 = arith.constant 16 : index
    %c0_217 = arith.constant 0 : index
    %396 = vector.load %arg15[%c16_216, %c0_217] : memref<36x128xf32, #tpu.memory_space<vmem>>, vector<4x128xf32>
    %397 = vector.broadcast %392 : vector<1x128xf32> to vector<4x128xf32>
    %398 = arith.mulf %397, %396 : vector<4x128xf32>
    %c32_218 = arith.constant 32 : index
    %c0_219 = arith.constant 0 : index
    %399 = vector.load %arg3[%c32_218, %c0_219] : memref<126x128xbf16, #tpu.memory_space<vmem>>, vector<1x128xbf16>
    %400 = arith.extf %399 : vector<1x128xbf16> to vector<1x128xf32>
    %c20_220 = arith.constant 20 : index
    %c0_221 = arith.constant 0 : index
    %401 = vector.load %arg14[%c20_220, %c0_221] : memref<36x128xf32, #tpu.memory_space<vmem>>, vector<4x128xf32>
    %402 = vector.broadcast %400 : vector<1x128xf32> to vector<4x128xf32>
    %403 = arith.mulf %402, %401 : vector<4x128xf32>
    %c20_222 = arith.constant 20 : index
    %c0_223 = arith.constant 0 : index
    %404 = vector.load %arg15[%c20_222, %c0_223] : memref<36x128xf32, #tpu.memory_space<vmem>>, vector<4x128xf32>
    %405 = vector.broadcast %400 : vector<1x128xf32> to vector<4x128xf32>
    %406 = arith.mulf %405, %404 : vector<4x128xf32>
    %c33 = arith.constant 33 : index
    %c0_224 = arith.constant 0 : index
    %407 = vector.load %arg3[%c33, %c0_224] : memref<126x128xbf16, #tpu.memory_space<vmem>>, vector<1x128xbf16>
    %408 = arith.extf %407 : vector<1x128xbf16> to vector<1x128xf32>
    %c24_225 = arith.constant 24 : index
    %c0_226 = arith.constant 0 : index
    %409 = vector.load %arg14[%c24_225, %c0_226] : memref<36x128xf32, #tpu.memory_space<vmem>>, vector<4x128xf32>
    %410 = vector.broadcast %408 : vector<1x128xf32> to vector<4x128xf32>
    %411 = arith.mulf %410, %409 : vector<4x128xf32>
    %c24_227 = arith.constant 24 : index
    %c0_228 = arith.constant 0 : index
    %412 = vector.load %arg15[%c24_227, %c0_228] : memref<36x128xf32, #tpu.memory_space<vmem>>, vector<4x128xf32>
    %413 = vector.broadcast %408 : vector<1x128xf32> to vector<4x128xf32>
    %414 = arith.mulf %413, %412 : vector<4x128xf32>
    %c34 = arith.constant 34 : index
    %c0_229 = arith.constant 0 : index
    %415 = vector.load %arg3[%c34, %c0_229] : memref<126x128xbf16, #tpu.memory_space<vmem>>, vector<1x128xbf16>
    %416 = arith.extf %415 : vector<1x128xbf16> to vector<1x128xf32>
    %c28_230 = arith.constant 28 : index
    %c0_231 = arith.constant 0 : index
    %417 = vector.load %arg14[%c28_230, %c0_231] : memref<36x128xf32, #tpu.memory_space<vmem>>, vector<4x128xf32>
    %418 = vector.broadcast %416 : vector<1x128xf32> to vector<4x128xf32>
    %419 = arith.mulf %418, %417 : vector<4x128xf32>
    %c28_232 = arith.constant 28 : index
    %c0_233 = arith.constant 0 : index
    %420 = vector.load %arg15[%c28_232, %c0_233] : memref<36x128xf32, #tpu.memory_space<vmem>>, vector<4x128xf32>
    %421 = vector.broadcast %416 : vector<1x128xf32> to vector<4x128xf32>
    %422 = arith.mulf %421, %420 : vector<4x128xf32>
    %c35 = arith.constant 35 : index
    %c0_234 = arith.constant 0 : index
    %423 = vector.load %arg3[%c35, %c0_234] : memref<126x128xbf16, #tpu.memory_space<vmem>>, vector<1x128xbf16>
    %424 = arith.extf %423 : vector<1x128xbf16> to vector<1x128xf32>
    %c32_235 = arith.constant 32 : index
    %c0_236 = arith.constant 0 : index
    %425 = vector.load %arg14[%c32_235, %c0_236] : memref<36x128xf32, #tpu.memory_space<vmem>>, vector<4x128xf32>
    %426 = vector.broadcast %424 : vector<1x128xf32> to vector<4x128xf32>
    %427 = arith.mulf %426, %425 : vector<4x128xf32>
    %c32_237 = arith.constant 32 : index
    %c0_238 = arith.constant 0 : index
    %428 = vector.load %arg15[%c32_237, %c0_238] : memref<36x128xf32, #tpu.memory_space<vmem>>, vector<4x128xf32>
    %429 = vector.broadcast %424 : vector<1x128xf32> to vector<4x128xf32>
    %430 = arith.mulf %429, %428 : vector<4x128xf32>
    %431 = arith.addf %363, %371 : vector<4x128xf32>
    %432 = arith.addf %379, %387 : vector<4x128xf32>
    %433 = arith.addf %395, %403 : vector<4x128xf32>
    %434 = arith.addf %411, %419 : vector<4x128xf32>
    %435 = arith.addf %431, %432 : vector<4x128xf32>
    %436 = arith.addf %433, %434 : vector<4x128xf32>
    %437 = arith.addf %435, %436 : vector<4x128xf32>
    %438 = arith.addf %437, %427 : vector<4x128xf32>
    %439 = arith.addf %366, %374 : vector<4x128xf32>
    %440 = arith.addf %382, %390 : vector<4x128xf32>
    %441 = arith.addf %398, %406 : vector<4x128xf32>
    %442 = arith.addf %414, %422 : vector<4x128xf32>
    %443 = arith.addf %439, %440 : vector<4x128xf32>
    %444 = arith.addf %441, %442 : vector<4x128xf32>
    %445 = arith.addf %443, %444 : vector<4x128xf32>
    %446 = arith.addf %445, %430 : vector<4x128xf32>
    %c36 = arith.constant 36 : index
    %c0_239 = arith.constant 0 : index
    %447 = vector.load %arg3[%c36, %c0_239] : memref<126x128xbf16, #tpu.memory_space<vmem>>, vector<1x128xbf16>
    %448 = arith.extf %447 : vector<1x128xbf16> to vector<1x128xf32>
    %c0_240 = arith.constant 0 : index
    %c0_241 = arith.constant 0 : index
    %449 = vector.load %arg14[%c0_240, %c0_241] : memref<36x128xf32, #tpu.memory_space<vmem>>, vector<4x128xf32>
    %450 = vector.broadcast %448 : vector<1x128xf32> to vector<4x128xf32>
    %451 = arith.mulf %450, %449 : vector<4x128xf32>
    %c0_242 = arith.constant 0 : index
    %c0_243 = arith.constant 0 : index
    %452 = vector.load %arg15[%c0_242, %c0_243] : memref<36x128xf32, #tpu.memory_space<vmem>>, vector<4x128xf32>
    %453 = vector.broadcast %448 : vector<1x128xf32> to vector<4x128xf32>
    %454 = arith.mulf %453, %452 : vector<4x128xf32>
    %c37 = arith.constant 37 : index
    %c0_244 = arith.constant 0 : index
    %455 = vector.load %arg3[%c37, %c0_244] : memref<126x128xbf16, #tpu.memory_space<vmem>>, vector<1x128xbf16>
    %456 = arith.extf %455 : vector<1x128xbf16> to vector<1x128xf32>
    %c4_245 = arith.constant 4 : index
    %c0_246 = arith.constant 0 : index
    %457 = vector.load %arg14[%c4_245, %c0_246] : memref<36x128xf32, #tpu.memory_space<vmem>>, vector<4x128xf32>
    %458 = vector.broadcast %456 : vector<1x128xf32> to vector<4x128xf32>
    %459 = arith.mulf %458, %457 : vector<4x128xf32>
    %c4_247 = arith.constant 4 : index
    %c0_248 = arith.constant 0 : index
    %460 = vector.load %arg15[%c4_247, %c0_248] : memref<36x128xf32, #tpu.memory_space<vmem>>, vector<4x128xf32>
    %461 = vector.broadcast %456 : vector<1x128xf32> to vector<4x128xf32>
    %462 = arith.mulf %461, %460 : vector<4x128xf32>
    %c38 = arith.constant 38 : index
    %c0_249 = arith.constant 0 : index
    %463 = vector.load %arg3[%c38, %c0_249] : memref<126x128xbf16, #tpu.memory_space<vmem>>, vector<1x128xbf16>
    %464 = arith.extf %463 : vector<1x128xbf16> to vector<1x128xf32>
    %c8_250 = arith.constant 8 : index
    %c0_251 = arith.constant 0 : index
    %465 = vector.load %arg14[%c8_250, %c0_251] : memref<36x128xf32, #tpu.memory_space<vmem>>, vector<4x128xf32>
    %466 = vector.broadcast %464 : vector<1x128xf32> to vector<4x128xf32>
    %467 = arith.mulf %466, %465 : vector<4x128xf32>
    %c8_252 = arith.constant 8 : index
    %c0_253 = arith.constant 0 : index
    %468 = vector.load %arg15[%c8_252, %c0_253] : memref<36x128xf32, #tpu.memory_space<vmem>>, vector<4x128xf32>
    %469 = vector.broadcast %464 : vector<1x128xf32> to vector<4x128xf32>
    %470 = arith.mulf %469, %468 : vector<4x128xf32>
    %c39 = arith.constant 39 : index
    %c0_254 = arith.constant 0 : index
    %471 = vector.load %arg3[%c39, %c0_254] : memref<126x128xbf16, #tpu.memory_space<vmem>>, vector<1x128xbf16>
    %472 = arith.extf %471 : vector<1x128xbf16> to vector<1x128xf32>
    %c12_255 = arith.constant 12 : index
    %c0_256 = arith.constant 0 : index
    %473 = vector.load %arg14[%c12_255, %c0_256] : memref<36x128xf32, #tpu.memory_space<vmem>>, vector<4x128xf32>
    %474 = vector.broadcast %472 : vector<1x128xf32> to vector<4x128xf32>
    %475 = arith.mulf %474, %473 : vector<4x128xf32>
    %c12_257 = arith.constant 12 : index
    %c0_258 = arith.constant 0 : index
    %476 = vector.load %arg15[%c12_257, %c0_258] : memref<36x128xf32, #tpu.memory_space<vmem>>, vector<4x128xf32>
    %477 = vector.broadcast %472 : vector<1x128xf32> to vector<4x128xf32>
    %478 = arith.mulf %477, %476 : vector<4x128xf32>
    %c40 = arith.constant 40 : index
    %c0_259 = arith.constant 0 : index
    %479 = vector.load %arg3[%c40, %c0_259] : memref<126x128xbf16, #tpu.memory_space<vmem>>, vector<1x128xbf16>
    %480 = arith.extf %479 : vector<1x128xbf16> to vector<1x128xf32>
    %c16_260 = arith.constant 16 : index
    %c0_261 = arith.constant 0 : index
    %481 = vector.load %arg14[%c16_260, %c0_261] : memref<36x128xf32, #tpu.memory_space<vmem>>, vector<4x128xf32>
    %482 = vector.broadcast %480 : vector<1x128xf32> to vector<4x128xf32>
    %483 = arith.mulf %482, %481 : vector<4x128xf32>
    %c16_262 = arith.constant 16 : index
    %c0_263 = arith.constant 0 : index
    %484 = vector.load %arg15[%c16_262, %c0_263] : memref<36x128xf32, #tpu.memory_space<vmem>>, vector<4x128xf32>
    %485 = vector.broadcast %480 : vector<1x128xf32> to vector<4x128xf32>
    %486 = arith.mulf %485, %484 : vector<4x128xf32>
    %c41 = arith.constant 41 : index
    %c0_264 = arith.constant 0 : index
    %487 = vector.load %arg3[%c41, %c0_264] : memref<126x128xbf16, #tpu.memory_space<vmem>>, vector<1x128xbf16>
    %488 = arith.extf %487 : vector<1x128xbf16> to vector<1x128xf32>
    %c20_265 = arith.constant 20 : index
    %c0_266 = arith.constant 0 : index
    %489 = vector.load %arg14[%c20_265, %c0_266] : memref<36x128xf32, #tpu.memory_space<vmem>>, vector<4x128xf32>
    %490 = vector.broadcast %488 : vector<1x128xf32> to vector<4x128xf32>
    %491 = arith.mulf %490, %489 : vector<4x128xf32>
    %c20_267 = arith.constant 20 : index
    %c0_268 = arith.constant 0 : index
    %492 = vector.load %arg15[%c20_267, %c0_268] : memref<36x128xf32, #tpu.memory_space<vmem>>, vector<4x128xf32>
    %493 = vector.broadcast %488 : vector<1x128xf32> to vector<4x128xf32>
    %494 = arith.mulf %493, %492 : vector<4x128xf32>
    %c42 = arith.constant 42 : index
    %c0_269 = arith.constant 0 : index
    %495 = vector.load %arg3[%c42, %c0_269] : memref<126x128xbf16, #tpu.memory_space<vmem>>, vector<1x128xbf16>
    %496 = arith.extf %495 : vector<1x128xbf16> to vector<1x128xf32>
    %c24_270 = arith.constant 24 : index
    %c0_271 = arith.constant 0 : index
    %497 = vector.load %arg14[%c24_270, %c0_271] : memref<36x128xf32, #tpu.memory_space<vmem>>, vector<4x128xf32>
    %498 = vector.broadcast %496 : vector<1x128xf32> to vector<4x128xf32>
    %499 = arith.mulf %498, %497 : vector<4x128xf32>
    %c24_272 = arith.constant 24 : index
    %c0_273 = arith.constant 0 : index
    %500 = vector.load %arg15[%c24_272, %c0_273] : memref<36x128xf32, #tpu.memory_space<vmem>>, vector<4x128xf32>
    %501 = vector.broadcast %496 : vector<1x128xf32> to vector<4x128xf32>
    %502 = arith.mulf %501, %500 : vector<4x128xf32>
    %c43 = arith.constant 43 : index
    %c0_274 = arith.constant 0 : index
    %503 = vector.load %arg3[%c43, %c0_274] : memref<126x128xbf16, #tpu.memory_space<vmem>>, vector<1x128xbf16>
    %504 = arith.extf %503 : vector<1x128xbf16> to vector<1x128xf32>
    %c28_275 = arith.constant 28 : index
    %c0_276 = arith.constant 0 : index
    %505 = vector.load %arg14[%c28_275, %c0_276] : memref<36x128xf32, #tpu.memory_space<vmem>>, vector<4x128xf32>
    %506 = vector.broadcast %504 : vector<1x128xf32> to vector<4x128xf32>
    %507 = arith.mulf %506, %505 : vector<4x128xf32>
    %c28_277 = arith.constant 28 : index
    %c0_278 = arith.constant 0 : index
    %508 = vector.load %arg15[%c28_277, %c0_278] : memref<36x128xf32, #tpu.memory_space<vmem>>, vector<4x128xf32>
    %509 = vector.broadcast %504 : vector<1x128xf32> to vector<4x128xf32>
    %510 = arith.mulf %509, %508 : vector<4x128xf32>
    %c44 = arith.constant 44 : index
    %c0_279 = arith.constant 0 : index
    %511 = vector.load %arg3[%c44, %c0_279] : memref<126x128xbf16, #tpu.memory_space<vmem>>, vector<1x128xbf16>
    %512 = arith.extf %511 : vector<1x128xbf16> to vector<1x128xf32>
    %c32_280 = arith.constant 32 : index
    %c0_281 = arith.constant 0 : index
    %513 = vector.load %arg14[%c32_280, %c0_281] : memref<36x128xf32, #tpu.memory_space<vmem>>, vector<4x128xf32>
    %514 = vector.broadcast %512 : vector<1x128xf32> to vector<4x128xf32>
    %515 = arith.mulf %514, %513 : vector<4x128xf32>
    %c32_282 = arith.constant 32 : index
    %c0_283 = arith.constant 0 : index
    %516 = vector.load %arg15[%c32_282, %c0_283] : memref<36x128xf32, #tpu.memory_space<vmem>>, vector<4x128xf32>
    %517 = vector.broadcast %512 : vector<1x128xf32> to vector<4x128xf32>
    %518 = arith.mulf %517, %516 : vector<4x128xf32>
    %519 = arith.addf %451, %459 : vector<4x128xf32>
    %520 = arith.addf %467, %475 : vector<4x128xf32>
    %521 = arith.addf %483, %491 : vector<4x128xf32>
    %522 = arith.addf %499, %507 : vector<4x128xf32>
    %523 = arith.addf %519, %520 : vector<4x128xf32>
    %524 = arith.addf %521, %522 : vector<4x128xf32>
    %525 = arith.addf %523, %524 : vector<4x128xf32>
    %526 = arith.addf %525, %515 : vector<4x128xf32>
    %527 = arith.addf %454, %462 : vector<4x128xf32>
    %528 = arith.addf %470, %478 : vector<4x128xf32>
    %529 = arith.addf %486, %494 : vector<4x128xf32>
    %530 = arith.addf %502, %510 : vector<4x128xf32>
    %531 = arith.addf %527, %528 : vector<4x128xf32>
    %532 = arith.addf %529, %530 : vector<4x128xf32>
    %533 = arith.addf %531, %532 : vector<4x128xf32>
    %534 = arith.addf %533, %518 : vector<4x128xf32>
    %535 = tpu.concatenate %438, %526, %446, %534 in 0 : vector<4x128xf32>, vector<4x128xf32>, vector<4x128xf32>, vector<4x128xf32> -> vector<16x128xf32>
    %536 = arith.mulf %535, %81 : vector<16x128xf32>
    %c0_284 = arith.constant 0 : index
    %c0_285 = arith.constant 0 : index
    %537 = vector.load %arg9[%c0_284, %c0_285] : memref<32x16xf32, #tpu.memory_space<vmem>>, vector<32x16xf32>
    %cst_286 = arith.constant dense<0.000000e+00> : vector<32x128xf32>
    %538 = tpu.matmul %537, %536, %cst_286 {dimension_numbers = #tpu.dot_dimension_numbers<[1], [0], [0], [1], [0, 0, 1, 1], [], []>} : vector<32x16xf32>, vector<16x128xf32>, vector<32x128xf32> -> vector<32x128xf32>
    %c45 = arith.constant 45 : index
    %c0_287 = arith.constant 0 : index
    %539 = vector.load %arg3[%c45, %c0_287] : memref<126x128xbf16, #tpu.memory_space<vmem>>, vector<1x128xbf16>
    %540 = arith.extf %539 : vector<1x128xbf16> to vector<1x128xf32>
    %c0_288 = arith.constant 0 : index
    %c0_289 = arith.constant 0 : index
    %541 = vector.load %arg14[%c0_288, %c0_289] : memref<36x128xf32, #tpu.memory_space<vmem>>, vector<4x128xf32>
    %542 = vector.broadcast %540 : vector<1x128xf32> to vector<4x128xf32>
    %543 = arith.mulf %542, %541 : vector<4x128xf32>
    %c0_290 = arith.constant 0 : index
    %c0_291 = arith.constant 0 : index
    %544 = vector.load %arg15[%c0_290, %c0_291] : memref<36x128xf32, #tpu.memory_space<vmem>>, vector<4x128xf32>
    %545 = vector.broadcast %540 : vector<1x128xf32> to vector<4x128xf32>
    %546 = arith.mulf %545, %544 : vector<4x128xf32>
    %c46 = arith.constant 46 : index
    %c0_292 = arith.constant 0 : index
    %547 = vector.load %arg3[%c46, %c0_292] : memref<126x128xbf16, #tpu.memory_space<vmem>>, vector<1x128xbf16>
    %548 = arith.extf %547 : vector<1x128xbf16> to vector<1x128xf32>
    %c4_293 = arith.constant 4 : index
    %c0_294 = arith.constant 0 : index
    %549 = vector.load %arg14[%c4_293, %c0_294] : memref<36x128xf32, #tpu.memory_space<vmem>>, vector<4x128xf32>
    %550 = vector.broadcast %548 : vector<1x128xf32> to vector<4x128xf32>
    %551 = arith.mulf %550, %549 : vector<4x128xf32>
    %c4_295 = arith.constant 4 : index
    %c0_296 = arith.constant 0 : index
    %552 = vector.load %arg15[%c4_295, %c0_296] : memref<36x128xf32, #tpu.memory_space<vmem>>, vector<4x128xf32>
    %553 = vector.broadcast %548 : vector<1x128xf32> to vector<4x128xf32>
    %554 = arith.mulf %553, %552 : vector<4x128xf32>
    %c47 = arith.constant 47 : index
    %c0_297 = arith.constant 0 : index
    %555 = vector.load %arg3[%c47, %c0_297] : memref<126x128xbf16, #tpu.memory_space<vmem>>, vector<1x128xbf16>
    %556 = arith.extf %555 : vector<1x128xbf16> to vector<1x128xf32>
    %c8_298 = arith.constant 8 : index
    %c0_299 = arith.constant 0 : index
    %557 = vector.load %arg14[%c8_298, %c0_299] : memref<36x128xf32, #tpu.memory_space<vmem>>, vector<4x128xf32>
    %558 = vector.broadcast %556 : vector<1x128xf32> to vector<4x128xf32>
    %559 = arith.mulf %558, %557 : vector<4x128xf32>
    %c8_300 = arith.constant 8 : index
    %c0_301 = arith.constant 0 : index
    %560 = vector.load %arg15[%c8_300, %c0_301] : memref<36x128xf32, #tpu.memory_space<vmem>>, vector<4x128xf32>
    %561 = vector.broadcast %556 : vector<1x128xf32> to vector<4x128xf32>
    %562 = arith.mulf %561, %560 : vector<4x128xf32>
    %c48_302 = arith.constant 48 : index
    %c0_303 = arith.constant 0 : index
    %563 = vector.load %arg3[%c48_302, %c0_303] : memref<126x128xbf16, #tpu.memory_space<vmem>>, vector<1x128xbf16>
    %564 = arith.extf %563 : vector<1x128xbf16> to vector<1x128xf32>
    %c12_304 = arith.constant 12 : index
    %c0_305 = arith.constant 0 : index
    %565 = vector.load %arg14[%c12_304, %c0_305] : memref<36x128xf32, #tpu.memory_space<vmem>>, vector<4x128xf32>
    %566 = vector.broadcast %564 : vector<1x128xf32> to vector<4x128xf32>
    %567 = arith.mulf %566, %565 : vector<4x128xf32>
    %c12_306 = arith.constant 12 : index
    %c0_307 = arith.constant 0 : index
    %568 = vector.load %arg15[%c12_306, %c0_307] : memref<36x128xf32, #tpu.memory_space<vmem>>, vector<4x128xf32>
    %569 = vector.broadcast %564 : vector<1x128xf32> to vector<4x128xf32>
    %570 = arith.mulf %569, %568 : vector<4x128xf32>
    %c49 = arith.constant 49 : index
    %c0_308 = arith.constant 0 : index
    %571 = vector.load %arg3[%c49, %c0_308] : memref<126x128xbf16, #tpu.memory_space<vmem>>, vector<1x128xbf16>
    %572 = arith.extf %571 : vector<1x128xbf16> to vector<1x128xf32>
    %c16_309 = arith.constant 16 : index
    %c0_310 = arith.constant 0 : index
    %573 = vector.load %arg14[%c16_309, %c0_310] : memref<36x128xf32, #tpu.memory_space<vmem>>, vector<4x128xf32>
    %574 = vector.broadcast %572 : vector<1x128xf32> to vector<4x128xf32>
    %575 = arith.mulf %574, %573 : vector<4x128xf32>
    %c16_311 = arith.constant 16 : index
    %c0_312 = arith.constant 0 : index
    %576 = vector.load %arg15[%c16_311, %c0_312] : memref<36x128xf32, #tpu.memory_space<vmem>>, vector<4x128xf32>
    %577 = vector.broadcast %572 : vector<1x128xf32> to vector<4x128xf32>
    %578 = arith.mulf %577, %576 : vector<4x128xf32>
    %c50 = arith.constant 50 : index
    %c0_313 = arith.constant 0 : index
    %579 = vector.load %arg3[%c50, %c0_313] : memref<126x128xbf16, #tpu.memory_space<vmem>>, vector<1x128xbf16>
    %580 = arith.extf %579 : vector<1x128xbf16> to vector<1x128xf32>
    %c20_314 = arith.constant 20 : index
    %c0_315 = arith.constant 0 : index
    %581 = vector.load %arg14[%c20_314, %c0_315] : memref<36x128xf32, #tpu.memory_space<vmem>>, vector<4x128xf32>
    %582 = vector.broadcast %580 : vector<1x128xf32> to vector<4x128xf32>
    %583 = arith.mulf %582, %581 : vector<4x128xf32>
    %c20_316 = arith.constant 20 : index
    %c0_317 = arith.constant 0 : index
    %584 = vector.load %arg15[%c20_316, %c0_317] : memref<36x128xf32, #tpu.memory_space<vmem>>, vector<4x128xf32>
    %585 = vector.broadcast %580 : vector<1x128xf32> to vector<4x128xf32>
    %586 = arith.mulf %585, %584 : vector<4x128xf32>
    %c51 = arith.constant 51 : index
    %c0_318 = arith.constant 0 : index
    %587 = vector.load %arg3[%c51, %c0_318] : memref<126x128xbf16, #tpu.memory_space<vmem>>, vector<1x128xbf16>
    %588 = arith.extf %587 : vector<1x128xbf16> to vector<1x128xf32>
    %c24_319 = arith.constant 24 : index
    %c0_320 = arith.constant 0 : index
    %589 = vector.load %arg14[%c24_319, %c0_320] : memref<36x128xf32, #tpu.memory_space<vmem>>, vector<4x128xf32>
    %590 = vector.broadcast %588 : vector<1x128xf32> to vector<4x128xf32>
    %591 = arith.mulf %590, %589 : vector<4x128xf32>
    %c24_321 = arith.constant 24 : index
    %c0_322 = arith.constant 0 : index
    %592 = vector.load %arg15[%c24_321, %c0_322] : memref<36x128xf32, #tpu.memory_space<vmem>>, vector<4x128xf32>
    %593 = vector.broadcast %588 : vector<1x128xf32> to vector<4x128xf32>
    %594 = arith.mulf %593, %592 : vector<4x128xf32>
    %c52 = arith.constant 52 : index
    %c0_323 = arith.constant 0 : index
    %595 = vector.load %arg3[%c52, %c0_323] : memref<126x128xbf16, #tpu.memory_space<vmem>>, vector<1x128xbf16>
    %596 = arith.extf %595 : vector<1x128xbf16> to vector<1x128xf32>
    %c28_324 = arith.constant 28 : index
    %c0_325 = arith.constant 0 : index
    %597 = vector.load %arg14[%c28_324, %c0_325] : memref<36x128xf32, #tpu.memory_space<vmem>>, vector<4x128xf32>
    %598 = vector.broadcast %596 : vector<1x128xf32> to vector<4x128xf32>
    %599 = arith.mulf %598, %597 : vector<4x128xf32>
    %c28_326 = arith.constant 28 : index
    %c0_327 = arith.constant 0 : index
    %600 = vector.load %arg15[%c28_326, %c0_327] : memref<36x128xf32, #tpu.memory_space<vmem>>, vector<4x128xf32>
    %601 = vector.broadcast %596 : vector<1x128xf32> to vector<4x128xf32>
    %602 = arith.mulf %601, %600 : vector<4x128xf32>
    %c53 = arith.constant 53 : index
    %c0_328 = arith.constant 0 : index
    %603 = vector.load %arg3[%c53, %c0_328] : memref<126x128xbf16, #tpu.memory_space<vmem>>, vector<1x128xbf16>
    %604 = arith.extf %603 : vector<1x128xbf16> to vector<1x128xf32>
    %c32_329 = arith.constant 32 : index
    %c0_330 = arith.constant 0 : index
    %605 = vector.load %arg14[%c32_329, %c0_330] : memref<36x128xf32, #tpu.memory_space<vmem>>, vector<4x128xf32>
    %606 = vector.broadcast %604 : vector<1x128xf32> to vector<4x128xf32>
    %607 = arith.mulf %606, %605 : vector<4x128xf32>
    %c32_331 = arith.constant 32 : index
    %c0_332 = arith.constant 0 : index
    %608 = vector.load %arg15[%c32_331, %c0_332] : memref<36x128xf32, #tpu.memory_space<vmem>>, vector<4x128xf32>
    %609 = vector.broadcast %604 : vector<1x128xf32> to vector<4x128xf32>
    %610 = arith.mulf %609, %608 : vector<4x128xf32>
    %611 = arith.addf %543, %551 : vector<4x128xf32>
    %612 = arith.addf %559, %567 : vector<4x128xf32>
    %613 = arith.addf %575, %583 : vector<4x128xf32>
    %614 = arith.addf %591, %599 : vector<4x128xf32>
    %615 = arith.addf %611, %612 : vector<4x128xf32>
    %616 = arith.addf %613, %614 : vector<4x128xf32>
    %617 = arith.addf %615, %616 : vector<4x128xf32>
    %618 = arith.addf %617, %607 : vector<4x128xf32>
    %619 = arith.addf %546, %554 : vector<4x128xf32>
    %620 = arith.addf %562, %570 : vector<4x128xf32>
    %621 = arith.addf %578, %586 : vector<4x128xf32>
    %622 = arith.addf %594, %602 : vector<4x128xf32>
    %623 = arith.addf %619, %620 : vector<4x128xf32>
    %624 = arith.addf %621, %622 : vector<4x128xf32>
    %625 = arith.addf %623, %624 : vector<4x128xf32>
    %626 = arith.addf %625, %610 : vector<4x128xf32>
    %c54 = arith.constant 54 : index
    %c0_333 = arith.constant 0 : index
    %627 = vector.load %arg3[%c54, %c0_333] : memref<126x128xbf16, #tpu.memory_space<vmem>>, vector<1x128xbf16>
    %628 = arith.extf %627 : vector<1x128xbf16> to vector<1x128xf32>
    %c0_334 = arith.constant 0 : index
    %c0_335 = arith.constant 0 : index
    %629 = vector.load %arg14[%c0_334, %c0_335] : memref<36x128xf32, #tpu.memory_space<vmem>>, vector<4x128xf32>
    %630 = vector.broadcast %628 : vector<1x128xf32> to vector<4x128xf32>
    %631 = arith.mulf %630, %629 : vector<4x128xf32>
    %c0_336 = arith.constant 0 : index
    %c0_337 = arith.constant 0 : index
    %632 = vector.load %arg15[%c0_336, %c0_337] : memref<36x128xf32, #tpu.memory_space<vmem>>, vector<4x128xf32>
    %633 = vector.broadcast %628 : vector<1x128xf32> to vector<4x128xf32>
    %634 = arith.mulf %633, %632 : vector<4x128xf32>
    %c55 = arith.constant 55 : index
    %c0_338 = arith.constant 0 : index
    %635 = vector.load %arg3[%c55, %c0_338] : memref<126x128xbf16, #tpu.memory_space<vmem>>, vector<1x128xbf16>
    %636 = arith.extf %635 : vector<1x128xbf16> to vector<1x128xf32>
    %c4_339 = arith.constant 4 : index
    %c0_340 = arith.constant 0 : index
    %637 = vector.load %arg14[%c4_339, %c0_340] : memref<36x128xf32, #tpu.memory_space<vmem>>, vector<4x128xf32>
    %638 = vector.broadcast %636 : vector<1x128xf32> to vector<4x128xf32>
    %639 = arith.mulf %638, %637 : vector<4x128xf32>
    %c4_341 = arith.constant 4 : index
    %c0_342 = arith.constant 0 : index
    %640 = vector.load %arg15[%c4_341, %c0_342] : memref<36x128xf32, #tpu.memory_space<vmem>>, vector<4x128xf32>
    %641 = vector.broadcast %636 : vector<1x128xf32> to vector<4x128xf32>
    %642 = arith.mulf %641, %640 : vector<4x128xf32>
    %c56 = arith.constant 56 : index
    %c0_343 = arith.constant 0 : index
    %643 = vector.load %arg3[%c56, %c0_343] : memref<126x128xbf16, #tpu.memory_space<vmem>>, vector<1x128xbf16>
    %644 = arith.extf %643 : vector<1x128xbf16> to vector<1x128xf32>
    %c8_344 = arith.constant 8 : index
    %c0_345 = arith.constant 0 : index
    %645 = vector.load %arg14[%c8_344, %c0_345] : memref<36x128xf32, #tpu.memory_space<vmem>>, vector<4x128xf32>
    %646 = vector.broadcast %644 : vector<1x128xf32> to vector<4x128xf32>
    %647 = arith.mulf %646, %645 : vector<4x128xf32>
    %c8_346 = arith.constant 8 : index
    %c0_347 = arith.constant 0 : index
    %648 = vector.load %arg15[%c8_346, %c0_347] : memref<36x128xf32, #tpu.memory_space<vmem>>, vector<4x128xf32>
    %649 = vector.broadcast %644 : vector<1x128xf32> to vector<4x128xf32>
    %650 = arith.mulf %649, %648 : vector<4x128xf32>
    %c57 = arith.constant 57 : index
    %c0_348 = arith.constant 0 : index
    %651 = vector.load %arg3[%c57, %c0_348] : memref<126x128xbf16, #tpu.memory_space<vmem>>, vector<1x128xbf16>
    %652 = arith.extf %651 : vector<1x128xbf16> to vector<1x128xf32>
    %c12_349 = arith.constant 12 : index
    %c0_350 = arith.constant 0 : index
    %653 = vector.load %arg14[%c12_349, %c0_350] : memref<36x128xf32, #tpu.memory_space<vmem>>, vector<4x128xf32>
    %654 = vector.broadcast %652 : vector<1x128xf32> to vector<4x128xf32>
    %655 = arith.mulf %654, %653 : vector<4x128xf32>
    %c12_351 = arith.constant 12 : index
    %c0_352 = arith.constant 0 : index
    %656 = vector.load %arg15[%c12_351, %c0_352] : memref<36x128xf32, #tpu.memory_space<vmem>>, vector<4x128xf32>
    %657 = vector.broadcast %652 : vector<1x128xf32> to vector<4x128xf32>
    %658 = arith.mulf %657, %656 : vector<4x128xf32>
    %c58 = arith.constant 58 : index
    %c0_353 = arith.constant 0 : index
    %659 = vector.load %arg3[%c58, %c0_353] : memref<126x128xbf16, #tpu.memory_space<vmem>>, vector<1x128xbf16>
    %660 = arith.extf %659 : vector<1x128xbf16> to vector<1x128xf32>
    %c16_354 = arith.constant 16 : index
    %c0_355 = arith.constant 0 : index
    %661 = vector.load %arg14[%c16_354, %c0_355] : memref<36x128xf32, #tpu.memory_space<vmem>>, vector<4x128xf32>
    %662 = vector.broadcast %660 : vector<1x128xf32> to vector<4x128xf32>
    %663 = arith.mulf %662, %661 : vector<4x128xf32>
    %c16_356 = arith.constant 16 : index
    %c0_357 = arith.constant 0 : index
    %664 = vector.load %arg15[%c16_356, %c0_357] : memref<36x128xf32, #tpu.memory_space<vmem>>, vector<4x128xf32>
    %665 = vector.broadcast %660 : vector<1x128xf32> to vector<4x128xf32>
    %666 = arith.mulf %665, %664 : vector<4x128xf32>
    %c59 = arith.constant 59 : index
    %c0_358 = arith.constant 0 : index
    %667 = vector.load %arg3[%c59, %c0_358] : memref<126x128xbf16, #tpu.memory_space<vmem>>, vector<1x128xbf16>
    %668 = arith.extf %667 : vector<1x128xbf16> to vector<1x128xf32>
    %c20_359 = arith.constant 20 : index
    %c0_360 = arith.constant 0 : index
    %669 = vector.load %arg14[%c20_359, %c0_360] : memref<36x128xf32, #tpu.memory_space<vmem>>, vector<4x128xf32>
    %670 = vector.broadcast %668 : vector<1x128xf32> to vector<4x128xf32>
    %671 = arith.mulf %670, %669 : vector<4x128xf32>
    %c20_361 = arith.constant 20 : index
    %c0_362 = arith.constant 0 : index
    %672 = vector.load %arg15[%c20_361, %c0_362] : memref<36x128xf32, #tpu.memory_space<vmem>>, vector<4x128xf32>
    %673 = vector.broadcast %668 : vector<1x128xf32> to vector<4x128xf32>
    %674 = arith.mulf %673, %672 : vector<4x128xf32>
    %c60 = arith.constant 60 : index
    %c0_363 = arith.constant 0 : index
    %675 = vector.load %arg3[%c60, %c0_363] : memref<126x128xbf16, #tpu.memory_space<vmem>>, vector<1x128xbf16>
    %676 = arith.extf %675 : vector<1x128xbf16> to vector<1x128xf32>
    %c24_364 = arith.constant 24 : index
    %c0_365 = arith.constant 0 : index
    %677 = vector.load %arg14[%c24_364, %c0_365] : memref<36x128xf32, #tpu.memory_space<vmem>>, vector<4x128xf32>
    %678 = vector.broadcast %676 : vector<1x128xf32> to vector<4x128xf32>
    %679 = arith.mulf %678, %677 : vector<4x128xf32>
    %c24_366 = arith.constant 24 : index
    %c0_367 = arith.constant 0 : index
    %680 = vector.load %arg15[%c24_366, %c0_367] : memref<36x128xf32, #tpu.memory_space<vmem>>, vector<4x128xf32>
    %681 = vector.broadcast %676 : vector<1x128xf32> to vector<4x128xf32>
    %682 = arith.mulf %681, %680 : vector<4x128xf32>
    %c61 = arith.constant 61 : index
    %c0_368 = arith.constant 0 : index
    %683 = vector.load %arg3[%c61, %c0_368] : memref<126x128xbf16, #tpu.memory_space<vmem>>, vector<1x128xbf16>
    %684 = arith.extf %683 : vector<1x128xbf16> to vector<1x128xf32>
    %c28_369 = arith.constant 28 : index
    %c0_370 = arith.constant 0 : index
    %685 = vector.load %arg14[%c28_369, %c0_370] : memref<36x128xf32, #tpu.memory_space<vmem>>, vector<4x128xf32>
    %686 = vector.broadcast %684 : vector<1x128xf32> to vector<4x128xf32>
    %687 = arith.mulf %686, %685 : vector<4x128xf32>
    %c28_371 = arith.constant 28 : index
    %c0_372 = arith.constant 0 : index
    %688 = vector.load %arg15[%c28_371, %c0_372] : memref<36x128xf32, #tpu.memory_space<vmem>>, vector<4x128xf32>
    %689 = vector.broadcast %684 : vector<1x128xf32> to vector<4x128xf32>
    %690 = arith.mulf %689, %688 : vector<4x128xf32>
    %c62 = arith.constant 62 : index
    %c0_373 = arith.constant 0 : index
    %691 = vector.load %arg3[%c62, %c0_373] : memref<126x128xbf16, #tpu.memory_space<vmem>>, vector<1x128xbf16>
    %692 = arith.extf %691 : vector<1x128xbf16> to vector<1x128xf32>
    %c32_374 = arith.constant 32 : index
    %c0_375 = arith.constant 0 : index
    %693 = vector.load %arg14[%c32_374, %c0_375] : memref<36x128xf32, #tpu.memory_space<vmem>>, vector<4x128xf32>
    %694 = vector.broadcast %692 : vector<1x128xf32> to vector<4x128xf32>
    %695 = arith.mulf %694, %693 : vector<4x128xf32>
    %c32_376 = arith.constant 32 : index
    %c0_377 = arith.constant 0 : index
    %696 = vector.load %arg15[%c32_376, %c0_377] : memref<36x128xf32, #tpu.memory_space<vmem>>, vector<4x128xf32>
    %697 = vector.broadcast %692 : vector<1x128xf32> to vector<4x128xf32>
    %698 = arith.mulf %697, %696 : vector<4x128xf32>
    %699 = arith.addf %631, %639 : vector<4x128xf32>
    %700 = arith.addf %647, %655 : vector<4x128xf32>
    %701 = arith.addf %663, %671 : vector<4x128xf32>
    %702 = arith.addf %679, %687 : vector<4x128xf32>
    %703 = arith.addf %699, %700 : vector<4x128xf32>
    %704 = arith.addf %701, %702 : vector<4x128xf32>
    %705 = arith.addf %703, %704 : vector<4x128xf32>
    %706 = arith.addf %705, %695 : vector<4x128xf32>
    %707 = arith.addf %634, %642 : vector<4x128xf32>
    %708 = arith.addf %650, %658 : vector<4x128xf32>
    %709 = arith.addf %666, %674 : vector<4x128xf32>
    %710 = arith.addf %682, %690 : vector<4x128xf32>
    %711 = arith.addf %707, %708 : vector<4x128xf32>
    %712 = arith.addf %709, %710 : vector<4x128xf32>
    %713 = arith.addf %711, %712 : vector<4x128xf32>
    %714 = arith.addf %713, %698 : vector<4x128xf32>
    %715 = tpu.concatenate %618, %706, %626, %714 in 0 : vector<4x128xf32>, vector<4x128xf32>, vector<4x128xf32>, vector<4x128xf32> -> vector<16x128xf32>
    %716 = arith.mulf %715, %81 : vector<16x128xf32>
    %c0_378 = arith.constant 0 : index
    %c0_379 = arith.constant 0 : index
    %717 = vector.load %arg9[%c0_378, %c0_379] : memref<32x16xf32, #tpu.memory_space<vmem>>, vector<32x16xf32>
    %cst_380 = arith.constant dense<0.000000e+00> : vector<32x128xf32>
    %718 = tpu.matmul %717, %716, %cst_380 {dimension_numbers = #tpu.dot_dimension_numbers<[1], [0], [0], [1], [0, 0, 1, 1], [], []>} : vector<32x16xf32>, vector<16x128xf32>, vector<32x128xf32> -> vector<32x128xf32>
    %719 = vector.extract_strided_slice %538 {offsets = [0, 0], sizes = [16, 128], strides = [1, 1]} : vector<32x128xf32> to vector<16x128xf32>
    %720 = vector.extract_strided_slice %718 {offsets = [16, 0], sizes = [16, 128], strides = [1, 1]} : vector<32x128xf32> to vector<16x128xf32>
    %721 = arith.subf %719, %720 : vector<16x128xf32>
    %722 = vector.extract_strided_slice %718 {offsets = [0, 0], sizes = [16, 128], strides = [1, 1]} : vector<32x128xf32> to vector<16x128xf32>
    %723 = vector.extract_strided_slice %538 {offsets = [16, 0], sizes = [16, 128], strides = [1, 1]} : vector<32x128xf32> to vector<16x128xf32>
    %724 = arith.addf %722, %723 : vector<16x128xf32>
    %725 = vector.extract_strided_slice %352 {offsets = [16, 0], sizes = [8, 128], strides = [1, 1]} : vector<40x128xf32> to vector<8x128xf32>
    %726 = arith.negf %725 : vector<8x128xf32>
    %727 = math.exp %726 : vector<8x128xf32>
    %cst_381 = arith.constant 1.000000e+00 : f32
    %728 = vector.broadcast %cst_381 : f32 to vector<8x128xf32>
    %729 = arith.addf %728, %727 : vector<8x128xf32>
    %730 = arith.divf %728, %729 : vector<8x128xf32>
    %731 = arith.mulf %725, %730 : vector<8x128xf32>
    %732 = vector.extract_strided_slice %352 {offsets = [24, 0], sizes = [16, 128], strides = [1, 1]} : vector<40x128xf32> to vector<16x128xf32>
    %733 = arith.mulf %732, %358 : vector<16x128xf32>
    %734 = tpu.concatenate %731, %733 in 0 : vector<8x128xf32>, vector<16x128xf32> -> vector<24x128xf32>
    %735 = arith.mulf %721, %358 : vector<16x128xf32>
    %736 = arith.mulf %724, %358 : vector<16x128xf32>
    %c0_382 = arith.constant 0 : index
    %c0_383 = arith.constant 0 : index
    %737 = vector.load %arg10[%c0_382, %c0_383] : memref<24x24xf32, #tpu.memory_space<vmem>>, vector<24x24xf32>
    %cst_384 = arith.constant dense<0.000000e+00> : vector<24x128xf32>
    %738 = tpu.matmul %737, %734, %cst_384 {dimension_numbers = #tpu.dot_dimension_numbers<[1], [0], [0], [1], [0, 0, 1, 1], [], []>} : vector<24x24xf32>, vector<24x128xf32>, vector<24x128xf32> -> vector<24x128xf32>
    %c176 = arith.constant 176 : index
    %c0_385 = arith.constant 0 : index
    %739 = vector.load %arg12[%c176, %c0_385] : memref<200x1xf32, #tpu.memory_space<vmem>>, vector<24x1xf32>
    %740 = vector.broadcast %739 : vector<24x1xf32> to vector<24x128xf32>
    %741 = arith.addf %738, %740 : vector<24x128xf32>
    %c0_386 = arith.constant 0 : index
    %c0_387 = arith.constant 0 : index
    %742 = vector.load %arg11[%c0_386, %c0_387] : memref<32x16xf32, #tpu.memory_space<vmem>>, vector<32x16xf32>
    %cst_388 = arith.constant dense<0.000000e+00> : vector<32x128xf32>
    %743 = tpu.matmul %742, %735, %cst_388 {dimension_numbers = #tpu.dot_dimension_numbers<[1], [0], [0], [1], [0, 0, 1, 1], [], []>} : vector<32x16xf32>, vector<16x128xf32>, vector<32x128xf32> -> vector<32x128xf32>
    %c0_389 = arith.constant 0 : index
    %c0_390 = arith.constant 0 : index
    %744 = vector.load %arg11[%c0_389, %c0_390] : memref<32x16xf32, #tpu.memory_space<vmem>>, vector<32x16xf32>
    %cst_391 = arith.constant dense<0.000000e+00> : vector<32x128xf32>
    %745 = tpu.matmul %744, %736, %cst_391 {dimension_numbers = #tpu.dot_dimension_numbers<[1], [0], [0], [1], [0, 0, 1, 1], [], []>} : vector<32x16xf32>, vector<16x128xf32>, vector<32x128xf32> -> vector<32x128xf32>
    %746 = vector.extract_strided_slice %743 {offsets = [0, 0], sizes = [16, 128], strides = [1, 1]} : vector<32x128xf32> to vector<16x128xf32>
    %747 = vector.extract_strided_slice %745 {offsets = [16, 0], sizes = [16, 128], strides = [1, 1]} : vector<32x128xf32> to vector<16x128xf32>
    %748 = arith.subf %746, %747 : vector<16x128xf32>
    %749 = vector.extract_strided_slice %745 {offsets = [0, 0], sizes = [16, 128], strides = [1, 1]} : vector<32x128xf32> to vector<16x128xf32>
    %750 = vector.extract_strided_slice %743 {offsets = [16, 0], sizes = [16, 128], strides = [1, 1]} : vector<32x128xf32> to vector<16x128xf32>
    %751 = arith.addf %749, %750 : vector<16x128xf32>
    %c8_392 = arith.constant 8 : index
    %c0_393 = arith.constant 0 : index
    %752 = vector.load %arg4[%c8_392, %c0_393] : memref<9x128xf32, #tpu.memory_space<vmem>>, vector<1x128xf32>
    %cst_394 = arith.constant 2.000000e-01 : f32
    %753 = vector.broadcast %cst_394 : f32 to vector<1x128xf32>
    %754 = arith.mulf %752, %753 : vector<1x128xf32>
    %755 = arith.mulf %754, %754 : vector<1x128xf32>
    %756 = arith.mulf %755, %755 : vector<1x128xf32>
    %757 = arith.mulf %756, %754 : vector<1x128xf32>
    %758 = arith.mulf %757, %754 : vector<1x128xf32>
    %759 = arith.mulf %758, %754 : vector<1x128xf32>
    %cst_395 = arith.constant 1.000000e+00 : f32
    %760 = vector.broadcast %cst_395 : f32 to vector<1x128xf32>
    %761 = arith.cmpf olt, %754, %760 : vector<1x128xf32>
    %cst_396 = arith.constant 2.100000e+01 : f32
    %762 = vector.broadcast %cst_396 : f32 to vector<1x128xf32>
    %763 = arith.mulf %762, %757 : vector<1x128xf32>
    %cst_397 = arith.constant 1.000000e+00 : f32
    %764 = vector.broadcast %cst_397 : f32 to vector<1x128xf32>
    %765 = arith.subf %764, %763 : vector<1x128xf32>
    %cst_398 = arith.constant 3.500000e+01 : f32
    %766 = vector.broadcast %cst_398 : f32 to vector<1x128xf32>
    %767 = arith.mulf %766, %758 : vector<1x128xf32>
    %768 = arith.addf %765, %767 : vector<1x128xf32>
    %cst_399 = arith.constant 1.500000e+01 : f32
    %769 = vector.broadcast %cst_399 : f32 to vector<1x128xf32>
    %770 = arith.mulf %769, %759 : vector<1x128xf32>
    %771 = arith.subf %768, %770 : vector<1x128xf32>
    %cst_400 = arith.constant 0.000000e+00 : f32
    %772 = vector.broadcast %cst_400 : f32 to vector<1x128xf32>
    %773 = arith.select %761, %771, %772 : vector<1x128xi1>, vector<1x128xf32>
    %774 = vector.extract_strided_slice %741 {offsets = [0, 0], sizes = [4, 128], strides = [1, 1]} : vector<24x128xf32> to vector<4x128xf32>
    %775 = vector.broadcast %773 : vector<1x128xf32> to vector<4x128xf32>
    %776 = arith.mulf %774, %775 : vector<4x128xf32>
    %777 = vector.extract_strided_slice %741 {offsets = [8, 0], sizes = [4, 128], strides = [1, 1]} : vector<24x128xf32> to vector<4x128xf32>
    %778 = vector.broadcast %773 : vector<1x128xf32> to vector<4x128xf32>
    %779 = arith.mulf %777, %778 : vector<4x128xf32>
    %780 = vector.extract_strided_slice %741 {offsets = [16, 0], sizes = [4, 128], strides = [1, 1]} : vector<24x128xf32> to vector<4x128xf32>
    %781 = vector.broadcast %773 : vector<1x128xf32> to vector<4x128xf32>
    %782 = arith.mulf %780, %781 : vector<4x128xf32>
    %783 = vector.extract_strided_slice %748 {offsets = [0, 0], sizes = [4, 128], strides = [1, 1]} : vector<16x128xf32> to vector<4x128xf32>
    %784 = vector.broadcast %773 : vector<1x128xf32> to vector<4x128xf32>
    %785 = arith.mulf %783, %784 : vector<4x128xf32>
    %786 = vector.extract_strided_slice %748 {offsets = [8, 0], sizes = [4, 128], strides = [1, 1]} : vector<16x128xf32> to vector<4x128xf32>
    %787 = vector.broadcast %773 : vector<1x128xf32> to vector<4x128xf32>
    %788 = arith.mulf %786, %787 : vector<4x128xf32>
    %789 = vector.extract_strided_slice %751 {offsets = [0, 0], sizes = [4, 128], strides = [1, 1]} : vector<16x128xf32> to vector<4x128xf32>
    %790 = vector.broadcast %773 : vector<1x128xf32> to vector<4x128xf32>
    %791 = arith.mulf %789, %790 : vector<4x128xf32>
    %792 = vector.extract_strided_slice %751 {offsets = [8, 0], sizes = [4, 128], strides = [1, 1]} : vector<16x128xf32> to vector<4x128xf32>
    %793 = vector.broadcast %773 : vector<1x128xf32> to vector<4x128xf32>
    %794 = arith.mulf %792, %793 : vector<4x128xf32>
    %cst_401 = arith.constant 0.000000e+00 : f32
    %795 = vector.broadcast %cst_401 : f32 to vector<4x128xf32>
    %c63 = arith.constant 63 : index
    %c0_402 = arith.constant 0 : index
    %796 = vector.load %arg3[%c63, %c0_402] : memref<126x128xbf16, #tpu.memory_space<vmem>>, vector<1x128xbf16>
    %797 = arith.extf %796 : vector<1x128xbf16> to vector<1x128xf32>
    %798 = vector.broadcast %797 : vector<1x128xf32> to vector<4x128xf32>
    %799 = arith.mulf %798, %776 : vector<4x128xf32>
    %c64_403 = arith.constant 64 : index
    %c0_404 = arith.constant 0 : index
    %800 = vector.load %arg3[%c64_403, %c0_404] : memref<126x128xbf16, #tpu.memory_space<vmem>>, vector<1x128xbf16>
    %801 = arith.extf %800 : vector<1x128xbf16> to vector<1x128xf32>
    %802 = vector.broadcast %801 : vector<1x128xf32> to vector<4x128xf32>
    %803 = arith.mulf %802, %779 : vector<4x128xf32>
    %c65 = arith.constant 65 : index
    %c0_405 = arith.constant 0 : index
    %804 = vector.load %arg3[%c65, %c0_405] : memref<126x128xbf16, #tpu.memory_space<vmem>>, vector<1x128xbf16>
    %805 = arith.extf %804 : vector<1x128xbf16> to vector<1x128xf32>
    %806 = vector.broadcast %805 : vector<1x128xf32> to vector<4x128xf32>
    %807 = arith.mulf %806, %782 : vector<4x128xf32>
    %c66 = arith.constant 66 : index
    %c0_406 = arith.constant 0 : index
    %808 = vector.load %arg3[%c66, %c0_406] : memref<126x128xbf16, #tpu.memory_space<vmem>>, vector<1x128xbf16>
    %809 = arith.extf %808 : vector<1x128xbf16> to vector<1x128xf32>
    %810 = vector.broadcast %809 : vector<1x128xf32> to vector<4x128xf32>
    %811 = arith.mulf %810, %785 : vector<4x128xf32>
    %c67 = arith.constant 67 : index
    %c0_407 = arith.constant 0 : index
    %812 = vector.load %arg3[%c67, %c0_407] : memref<126x128xbf16, #tpu.memory_space<vmem>>, vector<1x128xbf16>
    %813 = arith.extf %812 : vector<1x128xbf16> to vector<1x128xf32>
    %814 = vector.broadcast %813 : vector<1x128xf32> to vector<4x128xf32>
    %815 = arith.mulf %814, %788 : vector<4x128xf32>
    %c68 = arith.constant 68 : index
    %c0_408 = arith.constant 0 : index
    %816 = vector.load %arg3[%c68, %c0_408] : memref<126x128xbf16, #tpu.memory_space<vmem>>, vector<1x128xbf16>
    %817 = arith.extf %816 : vector<1x128xbf16> to vector<1x128xf32>
    %818 = vector.broadcast %817 : vector<1x128xf32> to vector<4x128xf32>
    %819 = arith.mulf %818, %791 : vector<4x128xf32>
    %c69 = arith.constant 69 : index
    %c0_409 = arith.constant 0 : index
    %820 = vector.load %arg3[%c69, %c0_409] : memref<126x128xbf16, #tpu.memory_space<vmem>>, vector<1x128xbf16>
    %821 = arith.extf %820 : vector<1x128xbf16> to vector<1x128xf32>
    %822 = vector.broadcast %821 : vector<1x128xf32> to vector<4x128xf32>
    %823 = arith.mulf %822, %794 : vector<4x128xf32>
    %824 = arith.addf %799, %803 : vector<4x128xf32>
    %825 = arith.addf %807, %811 : vector<4x128xf32>
    %826 = arith.addf %815, %819 : vector<4x128xf32>
    %827 = arith.addf %824, %825 : vector<4x128xf32>
    %828 = arith.addf %826, %823 : vector<4x128xf32>
    %829 = arith.addf %827, %828 : vector<4x128xf32>
    %c70 = arith.constant 70 : index
    %c0_410 = arith.constant 0 : index
    %830 = vector.load %arg3[%c70, %c0_410] : memref<126x128xbf16, #tpu.memory_space<vmem>>, vector<1x128xbf16>
    %831 = arith.extf %830 : vector<1x128xbf16> to vector<1x128xf32>
    %832 = vector.broadcast %831 : vector<1x128xf32> to vector<4x128xf32>
    %833 = arith.mulf %832, %776 : vector<4x128xf32>
    %c71 = arith.constant 71 : index
    %c0_411 = arith.constant 0 : index
    %834 = vector.load %arg3[%c71, %c0_411] : memref<126x128xbf16, #tpu.memory_space<vmem>>, vector<1x128xbf16>
    %835 = arith.extf %834 : vector<1x128xbf16> to vector<1x128xf32>
    %836 = vector.broadcast %835 : vector<1x128xf32> to vector<4x128xf32>
    %837 = arith.mulf %836, %779 : vector<4x128xf32>
    %c72 = arith.constant 72 : index
    %c0_412 = arith.constant 0 : index
    %838 = vector.load %arg3[%c72, %c0_412] : memref<126x128xbf16, #tpu.memory_space<vmem>>, vector<1x128xbf16>
    %839 = arith.extf %838 : vector<1x128xbf16> to vector<1x128xf32>
    %840 = vector.broadcast %839 : vector<1x128xf32> to vector<4x128xf32>
    %841 = arith.mulf %840, %782 : vector<4x128xf32>
    %c73 = arith.constant 73 : index
    %c0_413 = arith.constant 0 : index
    %842 = vector.load %arg3[%c73, %c0_413] : memref<126x128xbf16, #tpu.memory_space<vmem>>, vector<1x128xbf16>
    %843 = arith.extf %842 : vector<1x128xbf16> to vector<1x128xf32>
    %844 = vector.broadcast %843 : vector<1x128xf32> to vector<4x128xf32>
    %845 = arith.mulf %844, %785 : vector<4x128xf32>
    %c74 = arith.constant 74 : index
    %c0_414 = arith.constant 0 : index
    %846 = vector.load %arg3[%c74, %c0_414] : memref<126x128xbf16, #tpu.memory_space<vmem>>, vector<1x128xbf16>
    %847 = arith.extf %846 : vector<1x128xbf16> to vector<1x128xf32>
    %848 = vector.broadcast %847 : vector<1x128xf32> to vector<4x128xf32>
    %849 = arith.mulf %848, %788 : vector<4x128xf32>
    %c75 = arith.constant 75 : index
    %c0_415 = arith.constant 0 : index
    %850 = vector.load %arg3[%c75, %c0_415] : memref<126x128xbf16, #tpu.memory_space<vmem>>, vector<1x128xbf16>
    %851 = arith.extf %850 : vector<1x128xbf16> to vector<1x128xf32>
    %852 = vector.broadcast %851 : vector<1x128xf32> to vector<4x128xf32>
    %853 = arith.mulf %852, %791 : vector<4x128xf32>
    %c76 = arith.constant 76 : index
    %c0_416 = arith.constant 0 : index
    %854 = vector.load %arg3[%c76, %c0_416] : memref<126x128xbf16, #tpu.memory_space<vmem>>, vector<1x128xbf16>
    %855 = arith.extf %854 : vector<1x128xbf16> to vector<1x128xf32>
    %856 = vector.broadcast %855 : vector<1x128xf32> to vector<4x128xf32>
    %857 = arith.mulf %856, %794 : vector<4x128xf32>
    %858 = arith.addf %833, %837 : vector<4x128xf32>
    %859 = arith.addf %841, %845 : vector<4x128xf32>
    %860 = arith.addf %849, %853 : vector<4x128xf32>
    %861 = arith.addf %858, %859 : vector<4x128xf32>
    %862 = arith.addf %860, %857 : vector<4x128xf32>
    %863 = arith.addf %861, %862 : vector<4x128xf32>
    %864 = tpu.concatenate %829, %863 in 0 : vector<4x128xf32>, vector<4x128xf32> -> vector<8x128xf32>
    %c0_417 = arith.constant 0 : index
    %c0_418 = arith.constant 0 : index
    %865 = vector.load %arg13[%c0_417, %c0_418] : memref<40x128xf32, #tpu.memory_space<vmem>>, vector<8x128xf32>
    tpu.vector_store %arg13[%c0_417, %c0_418], %864 {strides = array<i32>} : memref<40x128xf32, #tpu.memory_space<vmem>>, vector<8x128xf32>,
    %c77 = arith.constant 77 : index
    %c0_419 = arith.constant 0 : index
    %866 = vector.load %arg3[%c77, %c0_419] : memref<126x128xbf16, #tpu.memory_space<vmem>>, vector<1x128xbf16>
    %867 = arith.extf %866 : vector<1x128xbf16> to vector<1x128xf32>
    %868 = vector.broadcast %867 : vector<1x128xf32> to vector<4x128xf32>
    %869 = arith.mulf %868, %776 : vector<4x128xf32>
    %c78 = arith.constant 78 : index
    %c0_420 = arith.constant 0 : index
    %870 = vector.load %arg3[%c78, %c0_420] : memref<126x128xbf16, #tpu.memory_space<vmem>>, vector<1x128xbf16>
    %871 = arith.extf %870 : vector<1x128xbf16> to vector<1x128xf32>
    %872 = vector.broadcast %871 : vector<1x128xf32> to vector<4x128xf32>
    %873 = arith.mulf %872, %779 : vector<4x128xf32>
    %c79 = arith.constant 79 : index
    %c0_421 = arith.constant 0 : index
    %874 = vector.load %arg3[%c79, %c0_421] : memref<126x128xbf16, #tpu.memory_space<vmem>>, vector<1x128xbf16>
    %875 = arith.extf %874 : vector<1x128xbf16> to vector<1x128xf32>
    %876 = vector.broadcast %875 : vector<1x128xf32> to vector<4x128xf32>
    %877 = arith.mulf %876, %782 : vector<4x128xf32>
    %c80_422 = arith.constant 80 : index
    %c0_423 = arith.constant 0 : index
    %878 = vector.load %arg3[%c80_422, %c0_423] : memref<126x128xbf16, #tpu.memory_space<vmem>>, vector<1x128xbf16>
    %879 = arith.extf %878 : vector<1x128xbf16> to vector<1x128xf32>
    %880 = vector.broadcast %879 : vector<1x128xf32> to vector<4x128xf32>
    %881 = arith.mulf %880, %785 : vector<4x128xf32>
    %c81 = arith.constant 81 : index
    %c0_424 = arith.constant 0 : index
    %882 = vector.load %arg3[%c81, %c0_424] : memref<126x128xbf16, #tpu.memory_space<vmem>>, vector<1x128xbf16>
    %883 = arith.extf %882 : vector<1x128xbf16> to vector<1x128xf32>
    %884 = vector.broadcast %883 : vector<1x128xf32> to vector<4x128xf32>
    %885 = arith.mulf %884, %788 : vector<4x128xf32>
    %c82 = arith.constant 82 : index
    %c0_425 = arith.constant 0 : index
    %886 = vector.load %arg3[%c82, %c0_425] : memref<126x128xbf16, #tpu.memory_space<vmem>>, vector<1x128xbf16>
    %887 = arith.extf %886 : vector<1x128xbf16> to vector<1x128xf32>
    %888 = vector.broadcast %887 : vector<1x128xf32> to vector<4x128xf32>
    %889 = arith.mulf %888, %791 : vector<4x128xf32>
    %c83 = arith.constant 83 : index
    %c0_426 = arith.constant 0 : index
    %890 = vector.load %arg3[%c83, %c0_426] : memref<126x128xbf16, #tpu.memory_space<vmem>>, vector<1x128xbf16>
    %891 = arith.extf %890 : vector<1x128xbf16> to vector<1x128xf32>
    %892 = vector.broadcast %891 : vector<1x128xf32> to vector<4x128xf32>
    %893 = arith.mulf %892, %794 : vector<4x128xf32>
    %894 = arith.addf %869, %873 : vector<4x128xf32>
    %895 = arith.addf %877, %881 : vector<4x128xf32>
    %896 = arith.addf %885, %889 : vector<4x128xf32>
    %897 = arith.addf %894, %895 : vector<4x128xf32>
    %898 = arith.addf %896, %893 : vector<4x128xf32>
    %899 = arith.addf %897, %898 : vector<4x128xf32>
    %c84 = arith.constant 84 : index
    %c0_427 = arith.constant 0 : index
    %900 = vector.load %arg3[%c84, %c0_427] : memref<126x128xbf16, #tpu.memory_space<vmem>>, vector<1x128xbf16>
    %901 = arith.extf %900 : vector<1x128xbf16> to vector<1x128xf32>
    %902 = vector.broadcast %901 : vector<1x128xf32> to vector<4x128xf32>
    %903 = arith.mulf %902, %776 : vector<4x128xf32>
    %c85 = arith.constant 85 : index
    %c0_428 = arith.constant 0 : index
    %904 = vector.load %arg3[%c85, %c0_428] : memref<126x128xbf16, #tpu.memory_space<vmem>>, vector<1x128xbf16>
    %905 = arith.extf %904 : vector<1x128xbf16> to vector<1x128xf32>
    %906 = vector.broadcast %905 : vector<1x128xf32> to vector<4x128xf32>
    %907 = arith.mulf %906, %779 : vector<4x128xf32>
    %c86 = arith.constant 86 : index
    %c0_429 = arith.constant 0 : index
    %908 = vector.load %arg3[%c86, %c0_429] : memref<126x128xbf16, #tpu.memory_space<vmem>>, vector<1x128xbf16>
    %909 = arith.extf %908 : vector<1x128xbf16> to vector<1x128xf32>
    %910 = vector.broadcast %909 : vector<1x128xf32> to vector<4x128xf32>
    %911 = arith.mulf %910, %782 : vector<4x128xf32>
    %c87 = arith.constant 87 : index
    %c0_430 = arith.constant 0 : index
    %912 = vector.load %arg3[%c87, %c0_430] : memref<126x128xbf16, #tpu.memory_space<vmem>>, vector<1x128xbf16>
    %913 = arith.extf %912 : vector<1x128xbf16> to vector<1x128xf32>
    %914 = vector.broadcast %913 : vector<1x128xf32> to vector<4x128xf32>
    %915 = arith.mulf %914, %785 : vector<4x128xf32>
    %c88 = arith.constant 88 : index
    %c0_431 = arith.constant 0 : index
    %916 = vector.load %arg3[%c88, %c0_431] : memref<126x128xbf16, #tpu.memory_space<vmem>>, vector<1x128xbf16>
    %917 = arith.extf %916 : vector<1x128xbf16> to vector<1x128xf32>
    %918 = vector.broadcast %917 : vector<1x128xf32> to vector<4x128xf32>
    %919 = arith.mulf %918, %788 : vector<4x128xf32>
    %c89 = arith.constant 89 : index
    %c0_432 = arith.constant 0 : index
    %920 = vector.load %arg3[%c89, %c0_432] : memref<126x128xbf16, #tpu.memory_space<vmem>>, vector<1x128xbf16>
    %921 = arith.extf %920 : vector<1x128xbf16> to vector<1x128xf32>
    %922 = vector.broadcast %921 : vector<1x128xf32> to vector<4x128xf32>
    %923 = arith.mulf %922, %791 : vector<4x128xf32>
    %c90 = arith.constant 90 : index
    %c0_433 = arith.constant 0 : index
    %924 = vector.load %arg3[%c90, %c0_433] : memref<126x128xbf16, #tpu.memory_space<vmem>>, vector<1x128xbf16>
    %925 = arith.extf %924 : vector<1x128xbf16> to vector<1x128xf32>
    %926 = vector.broadcast %925 : vector<1x128xf32> to vector<4x128xf32>
    %927 = arith.mulf %926, %794 : vector<4x128xf32>
    %928 = arith.addf %903, %907 : vector<4x128xf32>
    %929 = arith.addf %911, %915 : vector<4x128xf32>
    %930 = arith.addf %919, %923 : vector<4x128xf32>
    %931 = arith.addf %928, %929 : vector<4x128xf32>
    %932 = arith.addf %930, %927 : vector<4x128xf32>
    %933 = arith.addf %931, %932 : vector<4x128xf32>
    %934 = tpu.concatenate %899, %933 in 0 : vector<4x128xf32>, vector<4x128xf32> -> vector<8x128xf32>
    %c8_434 = arith.constant 8 : index
    %c0_435 = arith.constant 0 : index
    %935 = vector.load %arg13[%c8_434, %c0_435] : memref<40x128xf32, #tpu.memory_space<vmem>>, vector<8x128xf32>
    tpu.vector_store %arg13[%c8_434, %c0_435], %934 {strides = array<i32>} : memref<40x128xf32, #tpu.memory_space<vmem>>, vector<8x128xf32>,
    %c91 = arith.constant 91 : index
    %c0_436 = arith.constant 0 : index
    %936 = vector.load %arg3[%c91, %c0_436] : memref<126x128xbf16, #tpu.memory_space<vmem>>, vector<1x128xbf16>
    %937 = arith.extf %936 : vector<1x128xbf16> to vector<1x128xf32>
    %938 = vector.broadcast %937 : vector<1x128xf32> to vector<4x128xf32>
    %939 = arith.mulf %938, %776 : vector<4x128xf32>
    %c92 = arith.constant 92 : index
    %c0_437 = arith.constant 0 : index
    %940 = vector.load %arg3[%c92, %c0_437] : memref<126x128xbf16, #tpu.memory_space<vmem>>, vector<1x128xbf16>
    %941 = arith.extf %940 : vector<1x128xbf16> to vector<1x128xf32>
    %942 = vector.broadcast %941 : vector<1x128xf32> to vector<4x128xf32>
    %943 = arith.mulf %942, %779 : vector<4x128xf32>
    %c93 = arith.constant 93 : index
    %c0_438 = arith.constant 0 : index
    %944 = vector.load %arg3[%c93, %c0_438] : memref<126x128xbf16, #tpu.memory_space<vmem>>, vector<1x128xbf16>
    %945 = arith.extf %944 : vector<1x128xbf16> to vector<1x128xf32>
    %946 = vector.broadcast %945 : vector<1x128xf32> to vector<4x128xf32>
    %947 = arith.mulf %946, %782 : vector<4x128xf32>
    %c94 = arith.constant 94 : index
    %c0_439 = arith.constant 0 : index
    %948 = vector.load %arg3[%c94, %c0_439] : memref<126x128xbf16, #tpu.memory_space<vmem>>, vector<1x128xbf16>
    %949 = arith.extf %948 : vector<1x128xbf16> to vector<1x128xf32>
    %950 = vector.broadcast %949 : vector<1x128xf32> to vector<4x128xf32>
    %951 = arith.mulf %950, %785 : vector<4x128xf32>
    %c95 = arith.constant 95 : index
    %c0_440 = arith.constant 0 : index
    %952 = vector.load %arg3[%c95, %c0_440] : memref<126x128xbf16, #tpu.memory_space<vmem>>, vector<1x128xbf16>
    %953 = arith.extf %952 : vector<1x128xbf16> to vector<1x128xf32>
    %954 = vector.broadcast %953 : vector<1x128xf32> to vector<4x128xf32>
    %955 = arith.mulf %954, %788 : vector<4x128xf32>
    %c96_441 = arith.constant 96 : index
    %c0_442 = arith.constant 0 : index
    %956 = vector.load %arg3[%c96_441, %c0_442] : memref<126x128xbf16, #tpu.memory_space<vmem>>, vector<1x128xbf16>
    %957 = arith.extf %956 : vector<1x128xbf16> to vector<1x128xf32>
    %958 = vector.broadcast %957 : vector<1x128xf32> to vector<4x128xf32>
    %959 = arith.mulf %958, %791 : vector<4x128xf32>
    %c97 = arith.constant 97 : index
    %c0_443 = arith.constant 0 : index
    %960 = vector.load %arg3[%c97, %c0_443] : memref<126x128xbf16, #tpu.memory_space<vmem>>, vector<1x128xbf16>
    %961 = arith.extf %960 : vector<1x128xbf16> to vector<1x128xf32>
    %962 = vector.broadcast %961 : vector<1x128xf32> to vector<4x128xf32>
    %963 = arith.mulf %962, %794 : vector<4x128xf32>
    %964 = arith.addf %939, %943 : vector<4x128xf32>
    %965 = arith.addf %947, %951 : vector<4x128xf32>
    %966 = arith.addf %955, %959 : vector<4x128xf32>
    %967 = arith.addf %964, %965 : vector<4x128xf32>
    %968 = arith.addf %966, %963 : vector<4x128xf32>
    %969 = arith.addf %967, %968 : vector<4x128xf32>
    %c98 = arith.constant 98 : index
    %c0_444 = arith.constant 0 : index
    %970 = vector.load %arg3[%c98, %c0_444] : memref<126x128xbf16, #tpu.memory_space<vmem>>, vector<1x128xbf16>
    %971 = arith.extf %970 : vector<1x128xbf16> to vector<1x128xf32>
    %972 = vector.broadcast %971 : vector<1x128xf32> to vector<4x128xf32>
    %973 = arith.mulf %972, %776 : vector<4x128xf32>
    %c99 = arith.constant 99 : index
    %c0_445 = arith.constant 0 : index
    %974 = vector.load %arg3[%c99, %c0_445] : memref<126x128xbf16, #tpu.memory_space<vmem>>, vector<1x128xbf16>
    %975 = arith.extf %974 : vector<1x128xbf16> to vector<1x128xf32>
    %976 = vector.broadcast %975 : vector<1x128xf32> to vector<4x128xf32>
    %977 = arith.mulf %976, %779 : vector<4x128xf32>
    %c100 = arith.constant 100 : index
    %c0_446 = arith.constant 0 : index
    %978 = vector.load %arg3[%c100, %c0_446] : memref<126x128xbf16, #tpu.memory_space<vmem>>, vector<1x128xbf16>
    %979 = arith.extf %978 : vector<1x128xbf16> to vector<1x128xf32>
    %980 = vector.broadcast %979 : vector<1x128xf32> to vector<4x128xf32>
    %981 = arith.mulf %980, %782 : vector<4x128xf32>
    %c101 = arith.constant 101 : index
    %c0_447 = arith.constant 0 : index
    %982 = vector.load %arg3[%c101, %c0_447] : memref<126x128xbf16, #tpu.memory_space<vmem>>, vector<1x128xbf16>
    %983 = arith.extf %982 : vector<1x128xbf16> to vector<1x128xf32>
    %984 = vector.broadcast %983 : vector<1x128xf32> to vector<4x128xf32>
    %985 = arith.mulf %984, %785 : vector<4x128xf32>
    %c102 = arith.constant 102 : index
    %c0_448 = arith.constant 0 : index
    %986 = vector.load %arg3[%c102, %c0_448] : memref<126x128xbf16, #tpu.memory_space<vmem>>, vector<1x128xbf16>
    %987 = arith.extf %986 : vector<1x128xbf16> to vector<1x128xf32>
    %988 = vector.broadcast %987 : vector<1x128xf32> to vector<4x128xf32>
    %989 = arith.mulf %988, %788 : vector<4x128xf32>
    %c103 = arith.constant 103 : index
    %c0_449 = arith.constant 0 : index
    %990 = vector.load %arg3[%c103, %c0_449] : memref<126x128xbf16, #tpu.memory_space<vmem>>, vector<1x128xbf16>
    %991 = arith.extf %990 : vector<1x128xbf16> to vector<1x128xf32>
    %992 = vector.broadcast %991 : vector<1x128xf32> to vector<4x128xf32>
    %993 = arith.mulf %992, %791 : vector<4x128xf32>
    %c104 = arith.constant 104 : index
    %c0_450 = arith.constant 0 : index
    %994 = vector.load %arg3[%c104, %c0_450] : memref<126x128xbf16, #tpu.memory_space<vmem>>, vector<1x128xbf16>
    %995 = arith.extf %994 : vector<1x128xbf16> to vector<1x128xf32>
    %996 = vector.broadcast %995 : vector<1x128xf32> to vector<4x128xf32>
    %997 = arith.mulf %996, %794 : vector<4x128xf32>
    %998 = arith.addf %973, %977 : vector<4x128xf32>
    %999 = arith.addf %981, %985 : vector<4x128xf32>
    %1000 = arith.addf %989, %993 : vector<4x128xf32>
    %1001 = arith.addf %998, %999 : vector<4x128xf32>
    %1002 = arith.addf %1000, %997 : vector<4x128xf32>
    %1003 = arith.addf %1001, %1002 : vector<4x128xf32>
    %1004 = tpu.concatenate %969, %1003 in 0 : vector<4x128xf32>, vector<4x128xf32> -> vector<8x128xf32>
    %c16_451 = arith.constant 16 : index
    %c0_452 = arith.constant 0 : index
    %1005 = vector.load %arg13[%c16_451, %c0_452] : memref<40x128xf32, #tpu.memory_space<vmem>>, vector<8x128xf32>
    tpu.vector_store %arg13[%c16_451, %c0_452], %1004 {strides = array<i32>} : memref<40x128xf32, #tpu.memory_space<vmem>>, vector<8x128xf32>,
    %c105 = arith.constant 105 : index
    %c0_453 = arith.constant 0 : index
    %1006 = vector.load %arg3[%c105, %c0_453] : memref<126x128xbf16, #tpu.memory_space<vmem>>, vector<1x128xbf16>
    %1007 = arith.extf %1006 : vector<1x128xbf16> to vector<1x128xf32>
    %1008 = vector.broadcast %1007 : vector<1x128xf32> to vector<4x128xf32>
    %1009 = arith.mulf %1008, %776 : vector<4x128xf32>
    %c106 = arith.constant 106 : index
    %c0_454 = arith.constant 0 : index
    %1010 = vector.load %arg3[%c106, %c0_454] : memref<126x128xbf16, #tpu.memory_space<vmem>>, vector<1x128xbf16>
    %1011 = arith.extf %1010 : vector<1x128xbf16> to vector<1x128xf32>
    %1012 = vector.broadcast %1011 : vector<1x128xf32> to vector<4x128xf32>
    %1013 = arith.mulf %1012, %779 : vector<4x128xf32>
    %c107 = arith.constant 107 : index
    %c0_455 = arith.constant 0 : index
    %1014 = vector.load %arg3[%c107, %c0_455] : memref<126x128xbf16, #tpu.memory_space<vmem>>, vector<1x128xbf16>
    %1015 = arith.extf %1014 : vector<1x128xbf16> to vector<1x128xf32>
    %1016 = vector.broadcast %1015 : vector<1x128xf32> to vector<4x128xf32>
    %1017 = arith.mulf %1016, %782 : vector<4x128xf32>
    %c108 = arith.constant 108 : index
    %c0_456 = arith.constant 0 : index
    %1018 = vector.load %arg3[%c108, %c0_456] : memref<126x128xbf16, #tpu.memory_space<vmem>>, vector<1x128xbf16>
    %1019 = arith.extf %1018 : vector<1x128xbf16> to vector<1x128xf32>
    %1020 = vector.broadcast %1019 : vector<1x128xf32> to vector<4x128xf32>
    %1021 = arith.mulf %1020, %785 : vector<4x128xf32>
    %c109 = arith.constant 109 : index
    %c0_457 = arith.constant 0 : index
    %1022 = vector.load %arg3[%c109, %c0_457] : memref<126x128xbf16, #tpu.memory_space<vmem>>, vector<1x128xbf16>
    %1023 = arith.extf %1022 : vector<1x128xbf16> to vector<1x128xf32>
    %1024 = vector.broadcast %1023 : vector<1x128xf32> to vector<4x128xf32>
    %1025 = arith.mulf %1024, %788 : vector<4x128xf32>
    %c110 = arith.constant 110 : index
    %c0_458 = arith.constant 0 : index
    %1026 = vector.load %arg3[%c110, %c0_458] : memref<126x128xbf16, #tpu.memory_space<vmem>>, vector<1x128xbf16>
    %1027 = arith.extf %1026 : vector<1x128xbf16> to vector<1x128xf32>
    %1028 = vector.broadcast %1027 : vector<1x128xf32> to vector<4x128xf32>
    %1029 = arith.mulf %1028, %791 : vector<4x128xf32>
    %c111 = arith.constant 111 : index
    %c0_459 = arith.constant 0 : index
    %1030 = vector.load %arg3[%c111, %c0_459] : memref<126x128xbf16, #tpu.memory_space<vmem>>, vector<1x128xbf16>
    %1031 = arith.extf %1030 : vector<1x128xbf16> to vector<1x128xf32>
    %1032 = vector.broadcast %1031 : vector<1x128xf32> to vector<4x128xf32>
    %1033 = arith.mulf %1032, %794 : vector<4x128xf32>
    %1034 = arith.addf %1009, %1013 : vector<4x128xf32>
    %1035 = arith.addf %1017, %1021 : vector<4x128xf32>
    %1036 = arith.addf %1025, %1029 : vector<4x128xf32>
    %1037 = arith.addf %1034, %1035 : vector<4x128xf32>
    %1038 = arith.addf %1036, %1033 : vector<4x128xf32>
    %1039 = arith.addf %1037, %1038 : vector<4x128xf32>
    %c112 = arith.constant 112 : index
    %c0_460 = arith.constant 0 : index
    %1040 = vector.load %arg3[%c112, %c0_460] : memref<126x128xbf16, #tpu.memory_space<vmem>>, vector<1x128xbf16>
    %1041 = arith.extf %1040 : vector<1x128xbf16> to vector<1x128xf32>
    %1042 = vector.broadcast %1041 : vector<1x128xf32> to vector<4x128xf32>
    %1043 = arith.mulf %1042, %776 : vector<4x128xf32>
    %c113 = arith.constant 113 : index
    %c0_461 = arith.constant 0 : index
    %1044 = vector.load %arg3[%c113, %c0_461] : memref<126x128xbf16, #tpu.memory_space<vmem>>, vector<1x128xbf16>
    %1045 = arith.extf %1044 : vector<1x128xbf16> to vector<1x128xf32>
    %1046 = vector.broadcast %1045 : vector<1x128xf32> to vector<4x128xf32>
    %1047 = arith.mulf %1046, %779 : vector<4x128xf32>
    %c114 = arith.constant 114 : index
    %c0_462 = arith.constant 0 : index
    %1048 = vector.load %arg3[%c114, %c0_462] : memref<126x128xbf16, #tpu.memory_space<vmem>>, vector<1x128xbf16>
    %1049 = arith.extf %1048 : vector<1x128xbf16> to vector<1x128xf32>
    %1050 = vector.broadcast %1049 : vector<1x128xf32> to vector<4x128xf32>
    %1051 = arith.mulf %1050, %782 : vector<4x128xf32>
    %c115 = arith.constant 115 : index
    %c0_463 = arith.constant 0 : index
    %1052 = vector.load %arg3[%c115, %c0_463] : memref<126x128xbf16, #tpu.memory_space<vmem>>, vector<1x128xbf16>
    %1053 = arith.extf %1052 : vector<1x128xbf16> to vector<1x128xf32>
    %1054 = vector.broadcast %1053 : vector<1x128xf32> to vector<4x128xf32>
    %1055 = arith.mulf %1054, %785 : vector<4x128xf32>
    %c116 = arith.constant 116 : index
    %c0_464 = arith.constant 0 : index
    %1056 = vector.load %arg3[%c116, %c0_464] : memref<126x128xbf16, #tpu.memory_space<vmem>>, vector<1x128xbf16>
    %1057 = arith.extf %1056 : vector<1x128xbf16> to vector<1x128xf32>
    %1058 = vector.broadcast %1057 : vector<1x128xf32> to vector<4x128xf32>
    %1059 = arith.mulf %1058, %788 : vector<4x128xf32>
    %c117 = arith.constant 117 : index
    %c0_465 = arith.constant 0 : index
    %1060 = vector.load %arg3[%c117, %c0_465] : memref<126x128xbf16, #tpu.memory_space<vmem>>, vector<1x128xbf16>
    %1061 = arith.extf %1060 : vector<1x128xbf16> to vector<1x128xf32>
    %1062 = vector.broadcast %1061 : vector<1x128xf32> to vector<4x128xf32>
    %1063 = arith.mulf %1062, %791 : vector<4x128xf32>
    %c118 = arith.constant 118 : index
    %c0_466 = arith.constant 0 : index
    %1064 = vector.load %arg3[%c118, %c0_466] : memref<126x128xbf16, #tpu.memory_space<vmem>>, vector<1x128xbf16>
    %1065 = arith.extf %1064 : vector<1x128xbf16> to vector<1x128xf32>
    %1066 = vector.broadcast %1065 : vector<1x128xf32> to vector<4x128xf32>
    %1067 = arith.mulf %1066, %794 : vector<4x128xf32>
    %1068 = arith.addf %1043, %1047 : vector<4x128xf32>
    %1069 = arith.addf %1051, %1055 : vector<4x128xf32>
    %1070 = arith.addf %1059, %1063 : vector<4x128xf32>
    %1071 = arith.addf %1068, %1069 : vector<4x128xf32>
    %1072 = arith.addf %1070, %1067 : vector<4x128xf32>
    %1073 = arith.addf %1071, %1072 : vector<4x128xf32>
    %1074 = tpu.concatenate %1039, %1073 in 0 : vector<4x128xf32>, vector<4x128xf32> -> vector<8x128xf32>
    %c24_467 = arith.constant 24 : index
    %c0_468 = arith.constant 0 : index
    %1075 = vector.load %arg13[%c24_467, %c0_468] : memref<40x128xf32, #tpu.memory_space<vmem>>, vector<8x128xf32>
    tpu.vector_store %arg13[%c24_467, %c0_468], %1074 {strides = array<i32>} : memref<40x128xf32, #tpu.memory_space<vmem>>, vector<8x128xf32>,
    %c119 = arith.constant 119 : index
    %c0_469 = arith.constant 0 : index
    %1076 = vector.load %arg3[%c119, %c0_469] : memref<126x128xbf16, #tpu.memory_space<vmem>>, vector<1x128xbf16>
    %1077 = arith.extf %1076 : vector<1x128xbf16> to vector<1x128xf32>
    %1078 = vector.broadcast %1077 : vector<1x128xf32> to vector<4x128xf32>
    %1079 = arith.mulf %1078, %776 : vector<4x128xf32>
    %c120 = arith.constant 120 : index
    %c0_470 = arith.constant 0 : index
    %1080 = vector.load %arg3[%c120, %c0_470] : memref<126x128xbf16, #tpu.memory_space<vmem>>, vector<1x128xbf16>
    %1081 = arith.extf %1080 : vector<1x128xbf16> to vector<1x128xf32>
    %1082 = vector.broadcast %1081 : vector<1x128xf32> to vector<4x128xf32>
    %1083 = arith.mulf %1082, %779 : vector<4x128xf32>
    %c121 = arith.constant 121 : index
    %c0_471 = arith.constant 0 : index
    %1084 = vector.load %arg3[%c121, %c0_471] : memref<126x128xbf16, #tpu.memory_space<vmem>>, vector<1x128xbf16>
    %1085 = arith.extf %1084 : vector<1x128xbf16> to vector<1x128xf32>
    %1086 = vector.broadcast %1085 : vector<1x128xf32> to vector<4x128xf32>
    %1087 = arith.mulf %1086, %782 : vector<4x128xf32>
    %c122 = arith.constant 122 : index
    %c0_472 = arith.constant 0 : index
    %1088 = vector.load %arg3[%c122, %c0_472] : memref<126x128xbf16, #tpu.memory_space<vmem>>, vector<1x128xbf16>
    %1089 = arith.extf %1088 : vector<1x128xbf16> to vector<1x128xf32>
    %1090 = vector.broadcast %1089 : vector<1x128xf32> to vector<4x128xf32>
    %1091 = arith.mulf %1090, %785 : vector<4x128xf32>
    %c123 = arith.constant 123 : index
    %c0_473 = arith.constant 0 : index
    %1092 = vector.load %arg3[%c123, %c0_473] : memref<126x128xbf16, #tpu.memory_space<vmem>>, vector<1x128xbf16>
    %1093 = arith.extf %1092 : vector<1x128xbf16> to vector<1x128xf32>
    %1094 = vector.broadcast %1093 : vector<1x128xf32> to vector<4x128xf32>
    %1095 = arith.mulf %1094, %788 : vector<4x128xf32>
    %c124 = arith.constant 124 : index
    %c0_474 = arith.constant 0 : index
    %1096 = vector.load %arg3[%c124, %c0_474] : memref<126x128xbf16, #tpu.memory_space<vmem>>, vector<1x128xbf16>
    %1097 = arith.extf %1096 : vector<1x128xbf16> to vector<1x128xf32>
    %1098 = vector.broadcast %1097 : vector<1x128xf32> to vector<4x128xf32>
    %1099 = arith.mulf %1098, %791 : vector<4x128xf32>
    %c125 = arith.constant 125 : index
    %c0_475 = arith.constant 0 : index
    %1100 = vector.load %arg3[%c125, %c0_475] : memref<126x128xbf16, #tpu.memory_space<vmem>>, vector<1x128xbf16>
    %1101 = arith.extf %1100 : vector<1x128xbf16> to vector<1x128xf32>
    %1102 = vector.broadcast %1101 : vector<1x128xf32> to vector<4x128xf32>
    %1103 = arith.mulf %1102, %794 : vector<4x128xf32>
    %1104 = arith.addf %1079, %1083 : vector<4x128xf32>
    %1105 = arith.addf %1087, %1091 : vector<4x128xf32>
    %1106 = arith.addf %1095, %1099 : vector<4x128xf32>
    %1107 = arith.addf %1104, %1105 : vector<4x128xf32>
    %1108 = arith.addf %1106, %1103 : vector<4x128xf32>
    %1109 = arith.addf %1107, %1108 : vector<4x128xf32>
    %1110 = tpu.concatenate %1109, %795 in 0 : vector<4x128xf32>, vector<4x128xf32> -> vector<8x128xf32>
    %c32_476 = arith.constant 32 : index
    %c0_477 = arith.constant 0 : index
    %1111 = vector.load %arg13[%c32_476, %c0_477] : memref<40x128xf32, #tpu.memory_space<vmem>>, vector<8x128xf32>
    tpu.vector_store %arg13[%c32_476, %c0_477], %1110 {strides = array<i32>} : memref<40x128xf32, #tpu.memory_space<vmem>>, vector<8x128xf32>,
    return
  }
  func.func @transform_0(%arg0: i32) -> (i32, i32) {
    %c0_i32 = arith.constant 0 : i32
    %c0_i32_0 = arith.constant 0 : i32
    return %c0_i32, %arg0 : i32, i32
  }
  func.func @transform_1(%arg0: i32) -> (i32, i32) {
    %c0_i32 = arith.constant 0 : i32
    %c0_i32_0 = arith.constant 0 : i32
    return %c0_i32, %arg0 : i32, i32
  }
  func.func @transform_2(%arg0: i32) -> (i32, i32) {
    %c0_i32 = arith.constant 0 : i32
    %c0_i32_0 = arith.constant 0 : i32
    return %c0_i32, %arg0 : i32, i32
  }
  func.func @transform_3(%arg0: i32) -> (i32, i32) {
    %c0_i32 = arith.constant 0 : i32
    %c0_i32_0 = arith.constant 0 : i32
    return %c0_i32, %arg0 : i32, i32
  }
  func.func @transform_4(%arg0: i32) -> (i32, i32) {
    %c0_i32 = arith.constant 0 : i32
    %c0_i32_0 = arith.constant 0 : i32
    %c0_i32_1 = arith.constant 0 : i32
    return %c0_i32, %c0_i32_0 : i32, i32
  }
  func.func @transform_5(%arg0: i32) -> (i32, i32) {
    %c0_i32 = arith.constant 0 : i32
    %c0_i32_0 = arith.constant 0 : i32
    %c0_i32_1 = arith.constant 0 : i32
    return %c0_i32, %c0_i32_0 : i32, i32
  }
  func.func @transform_6(%arg0: i32) -> (i32, i32) {
    %c0_i32 = arith.constant 0 : i32
    %c0_i32_0 = arith.constant 0 : i32
    %c0_i32_1 = arith.constant 0 : i32
    return %c0_i32, %c0_i32_0 : i32, i32
  }
  func.func @transform_7(%arg0: i32) -> (i32, i32) {
    %c0_i32 = arith.constant 0 : i32
    %c0_i32_0 = arith.constant 0 : i32
    %c0_i32_1 = arith.constant 0 : i32
    return %c0_i32, %c0_i32_0 : i32, i32
  }
  func.func @transform_8(%arg0: i32) -> (i32, i32) {
    %c0_i32 = arith.constant 0 : i32
    %c0_i32_0 = arith.constant 0 : i32
    %c0_i32_1 = arith.constant 0 : i32
    return %c0_i32, %c0_i32_0 : i32, i32
  }
  func.func @transform_9(%arg0: i32) -> (i32, i32) {
    %c0_i32 = arith.constant 0 : i32
    %c0_i32_0 = arith.constant 0 : i32
    %c0_i32_1 = arith.constant 0 : i32
    return %c0_i32, %c0_i32_0 : i32, i32
  }
  func.func @transform_10(%arg0: i32) -> (i32, i32) {
    %c0_i32 = arith.constant 0 : i32
    %c0_i32_0 = arith.constant 0 : i32
    %c0_i32_1 = arith.constant 0 : i32
    return %c0_i32, %c0_i32_0 : i32, i32
  }
  func.func @transform_11(%arg0: i32) -> (i32, i32) {
    %c0_i32 = arith.constant 0 : i32
    %c0_i32_0 = arith.constant 0 : i32
    %c0_i32_1 = arith.constant 0 : i32
    return %c0_i32, %c0_i32_0 : i32, i32
  }
  func.func @transform_12(%arg0: i32) -> (i32, i32) {
    %c0_i32 = arith.constant 0 : i32
    %c0_i32_0 = arith.constant 0 : i32
    return %c0_i32, %arg0 : i32, i32
  }
}

</mosaic_0001>

<bundles_post_ra>
// kernel: tpu_custom_call.1
= control target key start
LH: loop header
LB: loop body
LE: loop exit
PB: predicated region body
PF: predicated region fallthrough
CT: control target
= control target key end

     0   :  { %vm87_vm0 = vcmask 64512   ;;  %v1719_v3 = vmov 0   ;;  %s2780_s0 = inlined_call_operand.vmem [shape: bf16[36,128], index: 0, kind: input, shape index: {}]   ;;  %s2781_s1 = inlined_call_operand.vmem [shape: bf16[36,128], index: 1, kind: input, shape index: {}]   ;;  %s2782_s2 = inlined_call_operand.vmem [shape: bf16[126,128], index: 2, kind: input, shape index: {}]   ;;  %s2783_s3 = inlined_call_operand.vmem [shape: f32[9,128], index: 3, kind: input, shape index: {}]   ;;  %s2784_s4 = inlined_call_operand.vmem [shape: f32[16,8], index: 4, kind: input, shape index: {}]   ;;  %s2785_s5 = inlined_call_operand.vmem [shape: f32[16,16], index: 5, kind: input, shape index: {}]   ;;  %s2786_s6 = inlined_call_operand.vmem [shape: f32[40,16], index: 6, kind: input, shape index: {}]   ;;  %s2787_s7 = inlined_call_operand.vmem [shape: f32[40,24], index: 7, kind: input, shape index: {}]   ;;  %s2788_s8 = inlined_call_operand.vmem [shape: f32[32,16], index: 8, kind: input, shape index: {}]   ;;  %s2789_s9 = inlined_call_operand.vmem [shape: f32[24,24], index: 9, kind: input, shape index: {}]   ;;  %s2790_s10 = inlined_call_operand.vmem [shape: f32[32,16], index: 10, kind: input, shape index: {}]   ;;  %s2791_s11 = inlined_call_operand.vmem [shape: f32[200,1], index: 11, kind: input, shape index: {}]   ;;  %s2792_s12 = inlined_call_operand.hbm [shape: f32[40,128], index: 12, kind: output, shape index: {}]  }
   0x1   :  { %v72_v0 = vld [vmem:[%s2783_s3] sm:$0xff]  ;;  %v76_v1 = vld [vmem:[%s2791_s11 + $0x8] sm:$0xff]  ;;  %1658 = vset.pattern.permute.xlu0 %v1719_v3  ;;  %1659 = vset.pattern.permute.xlu1 %v1719_v3 }
   0x2   :  { %v73_v2 = vld [vmem:[%s2784_s4] sm:$0xff]  ;;  %109 = vmatpush.msra.mxu1 %v72_v0  ;;  %84 = vperm.xlu0 %1658, %v76_v1  }
   0x3   :  { %1589 = vmatmul.msk.f32.vlgmr.msra.gmra.mxu1 %vm87_vm0, %v73_v2  ;;  %1660 = vset.pattern.permute.xlu2 %v1719_v3 }
   0x4   :  { %17 = vsyncpa [#allocation5], 0  ;;  %v75_v4 = vld [vmem:[%s2791_s11] sm:$0xff]  ;;  %v74_v5 = vld [vmem:[%s2784_s4 + $0x8] sm:$0xff]  ;;  %vm121_vm1 = vcmask 130048   ;;  %v1720_v19 = vmov 0.0625  }
   0x5   :  { %v250_v6 = vld [vmem:[%s2791_s11 + $0x38] sm:$0xff]  ;;  %v290_v7 = vld [vmem:[%s2791_s11 + $0x40] sm:$0xff]  ;;  %v423_v8 = vld [vmem:[%s2791_s11 + $0x70] sm:$0xff]  ;;  %s1577_s13 = sshll.u32 %s2792_s12, 4  ;;  %s1722_s14 = smov 128   ;;  %s1578_s13 = int_to_ptr.hbm [resolvable:$true] %s1577_s13 }
   0x6   :  { %v425_v9 = vld [vmem:[%s2791_s11 + $0x80] sm:$0xff]  ;;  %v694_v10 = vld [vmem:[%s2791_s11 + $0x88] sm:$0xff]  ;;  %v118_v20 = vld [vmem:[%s2791_s11 + $0x18] sm:$0xff]  ;;  %s1723_s15 = smov 8  }
   0x7   :  { %v697_v11 = vld [vmem:[%s2791_s11 + $0xa0] sm:$0xff]  ;;  %190 = vperm.xlu1 %1659, %v118_v20   ;;  %v117_v21 = vld [vmem:[%s2791_s11 + $0x10] sm:$0xff]  ;;  %v293_v23 = vld [vmem:[%s2791_s11 + $0x58] sm:$0xff] }
   0x8   :  { %v1147_v12 = vld [vmem:[%s2791_s11 + $0xc0] sm:$0xff]  ;;  %v249_v22 = vld [vmem:[%s2791_s11 + $0x30] sm:$0xff]  ;;  %v120_v24 = vld [vmem:[%s2791_s11 + $0x28] sm:$0xff] }
   0x9   :  { %202 = vperm.xlu2 %1660, %v120_v24   ;;  %v119_v25 = vld [vmem:[%s2791_s11 + $0x20] sm:$0xff]  ;;  %v422_v26 = vld [vmem:[%s2791_s11 + $0x68] sm:$0xff]  ;;  %v424_v28 = vld [vmem:[%s2791_s11 + $0x78] sm:$0xff] }
   0xa   :  { %79 = vperm.xlu0 %1658, %v75_v4   ;;  %v291_v27 = vld [vmem:[%s2791_s11 + $0x48] sm:$0xff]  ;;  %v292_v30 = vld [vmem:[%s2791_s11 + $0x50] sm:$0xff]  ;;  %v696_v32 = vld [vmem:[%s2791_s11 + $0x98] sm:$0xff] }
   0xb   :  { %1590 = vmatmul.msk.f32.gmra.mxu1 %vm87_vm0, %v74_v5  ;;  %v421_v37 = vld [vmem:[%s2791_s11 + $0x60] sm:$0xff]  ;;  %v1145_v38 = vld [vmem:[%s2791_s11 + $0xb0] sm:$0xff]  ;;  %v698_v40 = vld [vmem:[%s2791_s11 + $0xa8] sm:$0xff] }
   0xc   :  { %v695_v39 = vld [vmem:[%s2791_s11 + $0x90] sm:$0xff]  ;;  %v1146_v41 = vld [vmem:[%s2791_s11 + $0xb8] sm:$0xff] }
   0xf   :  { %185 = vperm.xlu1 %1659, %v117_v21  }
  0x11   :  { %197 = vperm.xlu2 %1660, %v119_v25  }
  0x12   :  { %258 = vperm.xlu0 %1658, %v250_v6  }
  0x17   :  { %253 = vperm.xlu1 %1659, %v249_v22  }
  0x19   :  { %359 = vperm.xlu2 %1660, %v291_v27   ;;  %v247_v27 = vld [vmem:[%s2785_s5] sm:$0xff] }
  0x1a   :  { %354 = vperm.xlu0 %1658, %v290_v7  }
  0x1f   :  { %371 = vperm.xlu1 %1659, %v293_v23  }
  0x21   :  { %366 = vperm.xlu2 %1660, %v292_v30  }
  0x22   :  { %438 = vperm.xlu0 %1658, %v423_v8  }
  0x27   :  { %433 = vperm.xlu1 %1659, %v422_v26  }
  0x29   :  { %428 = vperm.xlu2 %1660, %v421_v37  }
  0x2a   :  { %448 = vperm.xlu0 %1658, %v425_v9  }
  0x2f   :  { %443 = vperm.xlu1 %1659, %v424_v28   ;;  %v248_v28 = vld [vmem:[%s2785_s5 + $0x8] sm:$0xff] }
  0x31   :  { %706 = vperm.xlu2 %1660, %v695_v39  }
  0x32   :  { %701 = vperm.xlu0 %1658, %v694_v10  }
  0x37   :  { %711 = vperm.xlu1 %1659, %v696_v32  }
  0x39   :  { %721 = vperm.xlu2 %1660, %v698_v40  }
  0x3a   :  { %716 = vperm.xlu0 %1658, %v697_v11  }
  0x3f   :  { %1150 = vperm.xlu1 %1659, %v1145_v38  }
  0x41   :  { %1155 = vperm.xlu2 %1660, %v1146_v41  }
  0x42   :  { %1160 = vperm.xlu0 %1658, %v1147_v12  }
  0x63   :  { %v203_v49 = vpop.permute.xlu2 %202 }
  0x6b   :  { %v198_v59 = vpop.permute.xlu2 %197 }
  0x74   :  { %v85_v13 = vpop.permute.xlu0 %84 }
  0x79   :  { %v191_v47 = vpop.permute.xlu1 %190 }
  0x7c   :  { %v80_v17 = vpop.permute.xlu0 %79 }
  0x80   :  { %v111_v14 = vpop.f32.mrf.mxu1 }
  0x81   :  { %v112_v18 = vadd.f32 %v111_v14, %v80_v17  ;;  %v186_v56 = vpop.permute.xlu1 %185 }
  0x88   :  { %v114_v15 = vpop.f32.mrf.mxu1 }
  0x89   :  { %v115_v16 = vadd.f32 %v114_v15, %v85_v13 }
  0x8b   :  { %139 = vmatpush.msrb.mxu1 %v115_v16 }
  0x8d   :  { %140 = vmatpush.msrb.mxu1 %v112_v18 }
  0x8e   :  { %1591 = vmatmul.msk.f32.vlgmr.msrb.gmra.mxu1 %vm121_vm1, %v1720_v19 }
 0x10b   :  { %v142_v29 = vpop.f32.mrf.mxu1 }
 0x10c   :  { %v145_v31 = vperm.slane %v142_v29, 0  ;;  %v259_v29 = vpop.permute.xlu0 %258 }
 0x10e   :  { %v146_v33 = vsub.f32 %v112_v18, %v145_v31  ;;  %v147_v34 = vsub.f32 %v115_v16, %v145_v31 }
 0x110   :  { %v149_v35 = vmul.f32 %v147_v34, %v147_v34  ;;  %v148_v36 = vmul.f32 %v146_v33, %v146_v33 }
 0x112   :  { %164 = vmatpush.msra.mxu2 %v149_v35 }
 0x114   :  { %165 = vmatpush.msra.mxu2 %v148_v36 }
 0x115   :  { %1592 = vmatmul.msk.f32.vlgmr.msra.gmra.mxu2 %vm121_vm1, %v1720_v19 }
 0x198   :  { %v167_v42 = vpop.f32.mrf.mxu2 }
 0x199   :  { %v168_v43 = vadd.f32 1e-05, %v167_v42 }
 0x19b   :  { %1661 = vrsqrt.f32 %v168_v43  ;;  %vm176_vm3 = vweird.f32 %v168_v43 }
 0x1a1   :  { %v1662_v44 = vpop.eup %1661 }
 0x1a2   :  { %v171_v45 = vmul.f32 %v1662_v44, %v168_v43  ;;  %vm177_vm2 = vweird.f32 %v1662_v44 }
 0x1a3   :  { %vm178_vm4 = vmor %vm176_vm3, %vm177_vm2 }
 0x1a4   :  { %v172_v46 = vmul.f32 %v1662_v44, %v171_v45 }
 0x1a6   :  { %v173_v48 = vmul.f32 0.5, %v172_v46 }
 0x1a8   :  { %v174_v50 = vsub.f32 1.5, %v173_v48 }
 0x1aa   :  { %v175_v51 = vmul.f32 %v1662_v44, %v174_v50 }
 0x1ac   :  { %v179_v52 = vsel %vm178_vm4, %v1662_v44, %v175_v51 }
 0x1ad   :  { %v180_v53 = vperm.slane %v179_v52, 0 }
 0x1af   :  { %v182_v54 = vmul.f32 %v180_v53, %v147_v34  ;;  %v181_v55 = vmul.f32 %v180_v53, %v146_v33  ;;  %v254_v33 = vpop.permute.xlu1 %253 }
 0x1b1   :  { %v194_v57 = vmul.f32 %v191_v47, %v182_v54  ;;  %v193_v58 = vmul.f32 %v186_v56, %v181_v55  ;;  %v360_v47 = vpop.permute.xlu2 %359  ;;  %v355_v54 = vpop.permute.xlu0 %354 }
 0x1b3   :  { %v206_v60 = vadd.f32 %v203_v49, %v194_v57  ;;  %v205_v61 = vadd.f32 %v198_v59, %v193_v58 }
 0x1b5   :  { %v1594_v62 = vmul.f32 -1.442695, %v206_v60  ;;  %v1593_v63 = vmul.f32 -1.442695, %v205_v61 }
 0x1b7   :  { %1663 = vpow2.f32 %v1594_v62  ;;  %v372_v56 = vpop.permute.xlu1 %371 }
 0x1b8   :  { %1665 = vpow2.f32 %v1593_v63 }
 0x1b9   :  { %v367_v57 = vpop.permute.xlu2 %366 }
 0x1bd   :  { %v1664_v0 = vpop.eup %1663 }
 0x1be   :  { %v1666_v1 = vpop.eup %1665  ;;  %v214_v2 = vadd.f32 1.0, %v1664_v0 }
 0x1bf   :  { %v213_v3 = vadd.f32 1.0, %v1666_v1 }
 0x1c0   :  { %1667 = vrcp.f32 %v214_v2  ;;  %v241_v9 = vand.u32 2147483648, %v214_v2  ;;  %v239_v12 = vand.u32 2147483647, %v214_v2  ;;  %vm235_vm7 = vweird.f32 %v214_v2 }
 0x1c1   :  { %1669 = vrcp.f32 %v213_v3  ;;  %v226_v13 = vand.u32 2147483648, %v213_v3  ;;  %v224_v15 = vand.u32 2147483647, %v213_v3  ;;  %vm220_vm9 = vweird.f32 %v213_v3 }
 0x1c2   :  { %v242_v17 = vor.u32 1.1754944e-38, %v241_v9  ;;  %vm240_vm10 = vcmp.eq.f32.partialorder %v239_v12, 8.507059e+37 }
 0x1c3   :  { %v227_v21 = vor.u32 1.1754944e-38, %v226_v13  ;;  %vm225_vm12 = vcmp.eq.f32.partialorder %v224_v15, 8.507059e+37 }
 0x1c6   :  { %v1668_v4 = vpop.eup %1667 }
 0x1c7   :  { %v1670_v5 = vpop.eup %1669  ;;  %v231_v6 = vmul.f32 %v1668_v4, %v214_v2  ;;  %vm236_vm5 = vweird.f32 %v1668_v4 }
 0x1c8   :  { %v216_v7 = vmul.f32 %v1670_v5, %v213_v3  ;;  %vm221_vm6 = vweird.f32 %v1670_v5  ;;  %vm237_vm8 = vmor %vm235_vm7, %vm236_vm5 }
 0x1c9   :  { %v232_v8 = vsub.f32 1.0, %v231_v6  ;;  %vm222_vm11 = vmor %vm220_vm9, %vm221_vm6  ;;  %vm682_vm9 = vcmask 1043456  }
 0x1ca   :  { %v217_v10 = vsub.f32 1.0, %v216_v7 }
 0x1cb   :  { %v233_v11 = vmul.f32 %v1668_v4, %v232_v8 }
 0x1cc   :  { %v218_v14 = vmul.f32 %v1670_v5, %v217_v10 }
 0x1cd   :  { %v234_v16 = vadd.f32 %v1668_v4, %v233_v11 }
 0x1ce   :  { %v219_v18 = vadd.f32 %v1670_v5, %v218_v14 }
 0x1cf   :  { %v238_v20 = vsel %vm237_vm8, %v1668_v4, %v234_v16 }
 0x1d0   :  { %v243_v22 = vsel %vm240_vm10, %v242_v17, %v238_v20  ;;  %v223_v23 = vsel %vm222_vm11, %v1670_v5, %v219_v18  ;;  %vm724_vm10 = vcmask 195584  }
 0x1d1   :  { %v246_v24 = vmul.f32 %v243_v22, %v206_v60  ;;  %v228_v25 = vsel %vm225_vm12, %v227_v21, %v223_v23 }
 0x1d2   :  { %v245_v26 = vmul.f32 %v228_v25, %v205_v61  ;;  %v416_v25 = vld [vmem:[%s2786_s6] sm:$0xff] }
 0x1d3   :  { %281 = vmatpush.msra.mxu1 %v246_v24  ;;  %1651 = vmatpush.msra.mxu3 %v246_v24 }
 0x1d5   :  { %282 = vmatpush.msra.mxu1 %v245_v26  ;;  %1652 = vmatpush.msra.mxu3 %v245_v26  ;;  %v1634_v26 = vld [vmem:[%s2780_s0] sm:$0xff]  }
 0x1d6   :  { %1595 = vmatmul.msk.f32.vlgmr.msra.gmra.mxu1 %vm121_vm1, %v247_v27  ;;  %1596 = vmatmul.msk.f32.vlgmr.msra.gmra.mxu3 %vm121_vm1, %v248_v28  ;;  %v1649_v27 = vld [vmem:[%s2780_s0 + $0x8] sm:$0xff]   ;;  %v54_v28 = vld [vmem:[%s2780_s0 + $0x10] sm:$0x3] }
 0x253   :  { %v284_v30 = vpop.f32.mrf.mxu1 }
 0x254   :  { %v285_v34 = vadd.f32 %v284_v30, %v254_v33  ;;  %v1636_v30 = vunpack.c.h.bf16 %v1634_v26  ;;  %v55_v33 = vunpack.c.l.bf16 %v54_v28 }
 0x256   :  { %47 = vst [vmem:[#allocation2 + $0x8] sm:$0xff] %v1636_v30 }
 0x257   :  { %56 = vst [vmem:[#allocation2 + $0x20] sm:$0xf] %v55_v33 }
 0x259   :  { %v287_v31 = vpop.f32.mrf.mxu3 }
 0x25a   :  { %v288_v32 = vadd.f32 %v287_v31, %v259_v29  ;;  %v1635_v29 = vunpack.c.l.bf16 %v1634_v26  ;;  %v1639_v31 = vunpack.c.l.bf16 %v1649_v27 }
 0x25c   :  { %308 = vmatpush.msrb.mxu1 %v288_v32  ;;  %46 = vst [vmem:[#allocation2] sm:$0xff] %v1635_v29 }
 0x25d   :  { %52 = vst [vmem:[#allocation2 + $0x10] sm:$0xff] %v1639_v31 }
 0x25e   :  { %309 = vmatpush.msrb.mxu1 %v285_v34 }
 0x25f   :  { %1597 = vmatmul.msk.f32.vlgmr.msrb.gmra.mxu1 %vm121_vm1, %v1720_v19 }
 0x2dc   :  { %v311_v35 = vpop.f32.mrf.mxu1 }
 0x2dd   :  { %v314_v36 = vperm.slane %v311_v35, 0  ;;  %v418_v35 = vld [vmem:[%s2786_s6 + $0x10] sm:$0xff] }
 0x2df   :  { %v315_v37 = vsub.f32 %v285_v34, %v314_v36  ;;  %v316_v38 = vsub.f32 %v288_v32, %v314_v36  ;;  %v1640_v32 = vunpack.c.h.bf16 %v1649_v27  ;;  %v417_v34 = vld [vmem:[%s2786_s6 + $0x8] sm:$0xff]  ;;  %v419_v36 = vld [vmem:[%s2786_s6 + $0x18] sm:$0xff] }
 0x2e1   :  { %v318_v39 = vmul.f32 %v316_v38, %v316_v38  ;;  %v317_v40 = vmul.f32 %v315_v37, %v315_v37  ;;  %53 = vst [vmem:[#allocation2 + $0x18] sm:$0xff] %v1640_v32 }
 0x2e3   :  { %333 = vmatpush.msrb.mxu2 %v318_v39  ;;  %v572_v39 = vld [vmem:[%s2782_s2 + $0x4] sm:$0x2] }
 0x2e5   :  { %334 = vmatpush.msrb.mxu2 %v317_v40  ;;  %v1927_v40 = vld [vmem:[%s2782_s2 + $0x4] sm:$0x4] }
 0x2e6   :  { %1598 = vmatmul.msk.f32.vlgmr.msrb.gmra.mxu2 %vm121_vm1, %v1720_v19 }
 0x369   :  { %v336_v41 = vpop.f32.mrf.mxu2 }
 0x36a   :  { %v337_v42 = vadd.f32 1e-05, %v336_v41 }
 0x36c   :  { %1671 = vrsqrt.f32 %v337_v42  ;;  %vm345_vm14 = vweird.f32 %v337_v42 }
 0x372   :  { %v1672_v43 = vpop.eup %1671 }
 0x373   :  { %v340_v44 = vmul.f32 %v1672_v43, %v337_v42  ;;  %vm346_vm13 = vweird.f32 %v1672_v43  ;;  %v1932_v42 = vld [vmem:[%s2782_s2 + $0x4] sm:$0x8] }
 0x374   :  { %vm347_vm15 = vmor %vm345_vm14, %vm346_vm13 }
 0x375   :  { %v341_v45 = vmul.f32 %v1672_v43, %v340_v44  ;;  %v498_v44 = vld [vmem:[%s2782_s2] sm:$0x1] }
 0x377   :  { %v342_v46 = vmul.f32 0.5, %v341_v45  ;;  %v510_v45 = vld [vmem:[%s2782_s2] sm:$0x2] }
 0x379   :  { %v343_v48 = vsub.f32 1.5, %v342_v46  ;;  %v522_v46 = vld [vmem:[%s2782_s2] sm:$0x4] }
 0x37b   :  { %v344_v49 = vmul.f32 %v1672_v43, %v343_v48  ;;  %v581_v48 = vunpack.c.l.bf16 %v1927_v40 }
 0x37d   :  { %v348_v50 = vsel %vm347_vm15, %v1672_v43, %v344_v49  ;;  %v1937_v43 = vld [vmem:[%s2782_s2 + $0x8] sm:$0x1]  ;;  %v589_v49 = vunpack.c.l.bf16 %v1932_v42  ;;  %v2010_v29 = vperm.slane %v581_v48, 4 }
 0x37e   :  { %v349_v51 = vperm.slane %v348_v50, 0  ;;  %v597_v50 = vunpack.c.l.bf16 %v1937_v43  ;;  %v69_v43 = vld [vmem:[%s2781_s1 + $0x10] sm:$0x3] }
 0x37f   :  { %v2028_v40 = vperm.slane %v589_v49, 7 }
 0x380   :  { %v351_v52 = vmul.f32 %v349_v51, %v316_v38  ;;  %v350_v53 = vmul.f32 %v349_v51, %v315_v37  ;;  %v420_v37 = vld [vmem:[%s2786_s6 + $0x20] sm:$0xff]  ;;  %v499_v51 = vunpack.c.l.bf16 %v498_v44  ;;  %v2032_v42 = vperm.slane %v597_v50, 1 }
 0x381   :  { %v546_v38 = vld [vmem:[%s2782_s2 + $0x4] sm:$0x1] }
 0x382   :  { %v363_v55 = vmul.f32 %v360_v47, %v351_v52  ;;  %v362_v19 = vmul.f32 %v355_v54, %v350_v53  ;;  %v547_v41 = vunpack.c.l.bf16 %v546_v38  ;;  %v573_v47 = vunpack.c.l.bf16 %v572_v39  ;;  %v534_v54 = vld [vmem:[%s2782_s2] sm:$0x8] }
 0x383   :  { %v511_v52 = vunpack.c.l.bf16 %v510_v45  ;;  %v523_v53 = vunpack.c.l.bf16 %v522_v46  ;;  %v2024_v38 = vperm.slane %v589_v49, 6 }
 0x384   :  { %v375_v58 = vadd.f32 %v372_v56, %v363_v55  ;;  %v374_v59 = vadd.f32 %v367_v57, %v362_v19  ;;  %v1954_v55 = vperm.slane %v547_v41, 1  ;;  %v1642_v19 = vld [vmem:[%s2781_s1] sm:$0xff]   ;;  %v1650_v56 = vld [vmem:[%s2781_s1 + $0x8] sm:$0xff]   ;;  %v2012_v30 = vperm.slane %v547_v41, 0 }
 0x385   :  { %v1962_v57 = vld [vmem:[#allocation2] sm:$0xf]  ;;  %v2030_v41 = vperm.slane %v597_v50, 0 }
 0x386   :  { %v1600_v60 = vmul.f32 -1.442695, %v375_v58  ;;  %v1599_v61 = vmul.f32 -1.442695, %v374_v59 }
 0x388   :  { %1673 = vpow2.f32 %v1600_v60  ;;  %v1644_v60 = vunpack.c.h.bf16 %v1642_v19 }
 0x389   :  { %1675 = vpow2.f32 %v1599_v61  ;;  %v1647_v61 = vunpack.c.l.bf16 %v1650_v56 }
 0x38a   :  { %62 = vst [vmem:[#allocation3 + $0x8] sm:$0xff] %v1644_v60  ;;  %v70_v60 = vunpack.c.l.bf16 %v69_v43 }
 0x38b   :  { %67 = vst [vmem:[#allocation3 + $0x10] sm:$0xff] %v1647_v61 }
 0x38c   :  { %71 = vst [vmem:[#allocation3 + $0x20] sm:$0xf] %v70_v60 }
 0x38e   :  { %v1674_v62 = vpop.eup %1673 }
 0x38f   :  { %v1676_v63 = vpop.eup %1675  ;;  %v383_v0 = vadd.f32 1.0, %v1674_v62  ;;  %v1964_v62 = vperm.slane %v499_v51, 0 }
 0x390   :  { %v382_v1 = vadd.f32 1.0, %v1676_v63  ;;  %v1966_v63 = vld [vmem:[#allocation2 + $0x4] sm:$0xf] }
 0x391   :  { %1677 = vrcp.f32 %v383_v0  ;;  %v410_v7 = vand.u32 2147483648, %v383_v0  ;;  %v408_v10 = vand.u32 2147483647, %v383_v0  ;;  %vm404_vm3 = vweird.f32 %v383_v0 }
 0x392   :  { %1679 = vrcp.f32 %v382_v1  ;;  %v395_v11 = vand.u32 2147483648, %v382_v1  ;;  %v393_v13 = vand.u32 2147483647, %v382_v1  ;;  %vm389_vm5 = vweird.f32 %v382_v1  ;;  %v2058_v61 = vld [vmem:[#allocation3 + $0x10] sm:$0xf] }
 0x393   :  { %v411_v15 = vor.u32 1.1754944e-38, %v410_v7  ;;  %vm409_vm6 = vcmp.eq.f32.partialorder %v408_v10, 8.507059e+37  ;;  %v570_v7 = vmul.f32 %v1954_v55, %v1962_v57 }
 0x394   :  { %v396_v18 = vor.u32 1.1754944e-38, %v395_v11  ;;  %vm394_vm8 = vcmp.eq.f32.partialorder %v393_v13, 8.507059e+37  ;;  %v1992_v13 = vld [vmem:[#allocation2 + $0x10] sm:$0xf] }
 0x397   :  { %v1678_v2 = vpop.eup %1677 }
 0x398   :  { %v1680_v3 = vpop.eup %1679  ;;  %v400_v4 = vmul.f32 %v1678_v2, %v383_v0  ;;  %vm405_vm0 = vweird.f32 %v1678_v2  ;;  %v1968_v0 = vperm.slane %v499_v51, 1 }
 0x399   :  { %v385_v5 = vmul.f32 %v1680_v3, %v382_v1  ;;  %vm390_vm2 = vweird.f32 %v1680_v3  ;;  %vm406_vm4 = vmor %vm404_vm3, %vm405_vm0  ;;  %v1970_v1 = vperm.slane %v511_v52, 2 }
 0x39a   :  { %v401_v6 = vsub.f32 1.0, %v400_v4  ;;  %vm391_vm7 = vmor %vm389_vm5, %vm390_vm2  ;;  %v1976_v4 = vld [vmem:[#allocation2 + $0xc] sm:$0xf]  ;;  %v507_v10 = vmul.f32 %v1968_v0, %v1966_v63 }
 0x39b   :  { %v386_v8 = vsub.f32 1.0, %v385_v5  ;;  %v1978_v5 = vperm.slane %v523_v53, 4 }
 0x39c   :  { %v402_v9 = vmul.f32 %v1678_v2, %v401_v6  ;;  %v1980_v6 = vperm.slane %v523_v53, 5 }
 0x39d   :  { %v387_v12 = vmul.f32 %v1680_v3, %v386_v8  ;;  %v1648_v8 = vunpack.c.h.bf16 %v1650_v56  ;;  %v620_v56 = vld [vmem:[%s2782_s2 + $0x8] sm:$0x2] }
 0x39e   :  { %v403_v14 = vadd.f32 %v1678_v2, %v402_v9  ;;  %v502_v9 = vmul.f32 %v1964_v62, %v1962_v57 }
 0x39f   :  { %v388_v16 = vadd.f32 %v1680_v3, %v387_v12  ;;  %68 = vst [vmem:[#allocation3 + $0x18] sm:$0xff] %v1648_v8 }
 0x3a0   :  { %v407_v17 = vsel %vm406_vm4, %v1678_v2, %v403_v14  ;;  %v1972_v2 = vperm.slane %v511_v52, 3  ;;  %v1994_v14 = vld [vmem:[#allocation2 + $0x14] sm:$0xf] }
 0x3a1   :  { %v412_v20 = vsel %vm409_vm6, %v411_v15, %v407_v17  ;;  %v392_v21 = vsel %vm391_vm7, %v1680_v3, %v388_v16  ;;  %v1974_v3 = vld [vmem:[#allocation2 + $0x8] sm:$0xf]  ;;  %v526_v15 = vmul.f32 %v1978_v5, %v1992_v13  ;;  %v531_v16 = vmul.f32 %v1980_v6, %v1994_v14  ;;  %v2000_v17 = vld [vmem:[#allocation2 + $0x18] sm:$0xf] }
 0x3a2   :  { %v415_v22 = vmul.f32 %v412_v20, %v375_v58  ;;  %v397_v23 = vsel %vm394_vm8, %v396_v18, %v392_v21  ;;  %v535_v58 = vunpack.c.l.bf16 %v534_v54  ;;  %v514_v11 = vmul.f32 %v1970_v1, %v1974_v3  ;;  %v2002_v21 = vld [vmem:[#allocation2 + $0x1c] sm:$0xf]  ;;  %v2051_v54 = vld [vmem:[#allocation3 + $0x8] sm:$0xf] }
 0x3a3   :  { %v414_v24 = vmul.f32 %v397_v23, %v374_v59  ;;  %v1643_v59 = vunpack.c.l.bf16 %v1642_v19  ;;  %v519_v12 = vmul.f32 %v1972_v2, %v1976_v4  ;;  %v555_v28 = vadd.f32 %v531_v16, %v526_v15  ;;  %v2053_v19 = vld [vmem:[#allocation3 + $0xc] sm:$0xf]  ;;  %v628_v16 = vld [vmem:[%s2782_s2 + $0x8] sm:$0x4] }
 0x3a4   :  { %480 = vmatpush.msra.mxu0 %v415_v22  ;;  %v537_v18 = vperm.slane %v535_v58, 6  ;;  %v542_v20 = vperm.slane %v535_v58, 7  ;;  %v553_v22 = vadd.f32 %v507_v10, %v502_v9  ;;  %v591_v46 = vmul.f32 %v2024_v38, %v1994_v14 }
 0x3a5   :  { %61 = vst [vmem:[#allocation3] sm:$0xff] %v1643_v59  ;;  %v554_v23 = vadd.f32 %v519_v12, %v514_v11  ;;  %v594_v50 = vmul.f32 %v2028_v40, %v2000_v17  ;;  %v599_v51 = vmul.f32 %v2030_v41, %v2002_v21 }
 0x3a6   :  { %481 = vmatpush.msra.mxu0 %v414_v24  ;;  %v2004_v24 = vperm.slane %v573_v47, 2  ;;  %v538_v26 = vmul.f32 %v537_v18, %v2000_v17  ;;  %v543_v27 = vmul.f32 %v542_v20, %v2002_v21  ;;  %v2066_v12 = vld [vmem:[#allocation3 + $0x18] sm:$0xf]  ;;  %v2068_v15 = vld [vmem:[#allocation3 + $0x1c] sm:$0xf] }
 0x3a7   :  { %1601 = vmatmul.msk.f32.vlgmr.msra.gmra.mxu0 %vm121_vm1, %v416_v25  ;;  %v2006_v25 = vperm.slane %v573_v47, 3  ;;  %v557_v31 = vadd.f32 %v554_v23, %v553_v22  ;;  %v607_v8 = vadd.f32 %v599_v51, %v594_v50  ;;  %v516_v23 = vmul.f32 %v2051_v54, %v1970_v1 }
 0x3a8   :  { %v575_v32 = vmul.f32 %v2004_v24, %v1966_v63 }
 0x3a9   :  { %v578_v33 = vmul.f32 %v2006_v25, %v1974_v3 }
 0x3aa   :  { %v604_v47 = vadd.f32 %v575_v32, %v570_v7  ;;  %v2060_v7 = vld [vmem:[#allocation3 + $0x14] sm:$0xf]  ;;  %v545_v32 = vmul.f32 %v2068_v15, %v542_v20  ;;  %v652_v20 = vld [vmem:[%s2782_s2 + $0xc] sm:$0x2] }
 0x3ac   :  { %v2043_v49 = vld [vmem:[#allocation3 + $0x4] sm:$0xf] }
 0x3ad   :  { %v509_v11 = vmul.f32 %v2043_v49, %v1968_v0  ;;  %v636_v0 = vld [vmem:[%s2782_s2 + $0x8] sm:$0x8] }
 0x3af   :  { %1602 = vmatmul.msk.f32.gmra.mxu0 %vm121_vm1, %v417_v34  ;;  %v2018_v34 = vld [vmem:[#allocation2 + $0x20] sm:$0xf] }
 0x3b0   :  { %v550_v39 = vmul.f32 %v2012_v30, %v2018_v34  ;;  %v602_v52 = vmul.f32 %v2032_v42, %v2018_v34 }
 0x3b7   :  { %1603 = vmatmul.msk.f32.gmra.mxu0 %vm121_vm1, %v418_v35  ;;  %v556_v35 = vadd.f32 %v543_v27, %v538_v26  ;;  %v521_v26 = vmul.f32 %v2053_v19, %v1972_v2 }
 0x3b9   :  { %v558_v44 = vadd.f32 %v556_v35, %v555_v28  ;;  %v533_v28 = vmul.f32 %v2060_v7, %v1980_v6  ;;  %v562_v1 = vadd.f32 %v521_v26, %v516_v23  ;;  %v621_v35 = vunpack.c.l.bf16 %v620_v56 }
 0x3bb   :  { %v559_v58 = vadd.f32 %v558_v44, %v557_v31  ;;  %v540_v31 = vmul.f32 %v2066_v12, %v537_v18  ;;  %v644_v18 = vld [vmem:[%s2782_s2 + $0xc] sm:$0x1] }
 0x3bc   :  { %v645_v26 = vunpack.c.l.bf16 %v644_v18  ;;  %v595_v18 = vmul.f32 %v2028_v40, %v2066_v12 }
 0x3bd   :  { %v560_v22 = vadd.f32 %v559_v58, %v550_v39  ;;  %v564_v43 = vadd.f32 %v545_v32, %v540_v31 }
 0x3be   :  { %v646_v31 = vperm.slane %v645_v26, 0  ;;  %v649_v32 = vperm.slane %v645_v26, 1 }
 0x3bf   :  { %1604 = vmatmul.msk.f32.gmra.mxu0 %vm121_vm1, %v419_v36  ;;  %v583_v36 = vmul.f32 %v2010_v29, %v1976_v4 }
 0x3c0   :  { %v651_v26 = vmul.f32 %v649_v32, %v2068_v15 }
 0x3c1   :  { %v605_v53 = vadd.f32 %v583_v36, %v578_v33  ;;  %v629_v36 = vunpack.c.l.bf16 %v628_v16 }
 0x3c3   :  { %v608_v9 = vadd.f32 %v605_v53, %v604_v47  ;;  %v630_v47 = vperm.slane %v629_v36, 4  ;;  %v633_v53 = vperm.slane %v629_v36, 5 }
 0x3c5   :  { %v635_v40 = vmul.f32 %v633_v53, %v2053_v19 }
 0x3c7   :  { %1605 = vmatmul.msk.f32.gmra.mxu0 %vm121_vm1, %v420_v37  ;;  %v2022_v37 = vperm.slane %v581_v48, 5  ;;  %v2041_v48 = vld [vmem:[#allocation3] sm:$0xf] }
 0x3c8   :  { %v504_v10 = vmul.f32 %v2041_v48, %v1964_v62  ;;  %v528_v62 = vmul.f32 %v2058_v61, %v1978_v5  ;;  %v637_v5 = vunpack.c.l.bf16 %v636_v0 }
 0x3c9   :  { %v586_v45 = vmul.f32 %v2022_v37, %v1992_v13 }
 0x3ca   :  { %v561_v33 = vadd.f32 %v509_v11, %v504_v10  ;;  %v563_v39 = vadd.f32 %v533_v28, %v528_v62  ;;  %v638_v6 = vperm.slane %v637_v5, 6  ;;  %v641_v60 = vperm.slane %v637_v5, 7 }
 0x3cb   :  { %v606_v59 = vadd.f32 %v591_v46, %v586_v45  ;;  %v622_v45 = vperm.slane %v621_v35, 2  ;;  %v625_v46 = vperm.slane %v621_v35, 3  ;;  %v634_v10 = vmul.f32 %v633_v53, %v1976_v4 }
 0x3cc   :  { %v565_v44 = vadd.f32 %v562_v1, %v561_v33  ;;  %v566_v51 = vadd.f32 %v564_v43, %v563_v39  ;;  %v639_v11 = vmul.f32 %v638_v6, %v1992_v13  ;;  %v642_v23 = vmul.f32 %v641_v60, %v1994_v14 }
 0x3cd   :  { %v609_v27 = vadd.f32 %v607_v8, %v606_v59  ;;  %v623_v56 = vmul.f32 %v622_v45, %v1962_v57  ;;  %v626_v58 = vmul.f32 %v625_v46, %v1966_v63  ;;  %v631_v59 = vmul.f32 %v630_v47, %v1974_v3 }
 0x3ce   :  { %v653_v62 = vunpack.c.l.bf16 %v652_v20  ;;  %v571_v1 = vmul.f32 %v1954_v55, %v2041_v48  ;;  %v659_v36 = vadd.f32 %v642_v23, %v639_v11  ;;  %v647_v39 = vmul.f32 %v646_v31, %v2000_v17 }
 0x3cf   :  { %v610_v2 = vadd.f32 %v609_v27, %v608_v9  ;;  %v567_v9 = vadd.f32 %v566_v51, %v565_v44  ;;  %v657_v27 = vadd.f32 %v626_v58, %v623_v56  ;;  %v658_v28 = vadd.f32 %v634_v10, %v631_v59 }
 0x3d0   :  { %v654_v33 = vperm.slane %v653_v62, 2  ;;  %v2114_v5 = vperm.slane %v653_v62, 3  ;;  %v579_v44 = vmul.f32 %v2006_v25, %v2051_v54  ;;  %v584_v55 = vmul.f32 %v2010_v29, %v2053_v19 }
 0x3d1   :  { %v611_v50 = vadd.f32 %v610_v2, %v602_v52  ;;  %v2095_v52 = vld [vmem:[#allocation3 + $0x20] sm:$0xf]  ;;  %v661_v2 = vadd.f32 %v658_v28, %v657_v27  ;;  %v600_v20 = vmul.f32 %v2030_v41, %v2068_v15  ;;  %v624_v29 = vmul.f32 %v622_v45, %v2041_v48  ;;  %v813_v45 = vld [vmem:[%s2782_s2 + $0xc] sm:$0x4]  ;;  %v837_v27 = vld [vmem:[%s2782_s2 + $0x10] sm:$0x2] }
 0x3d2   :  { %v552_v16 = vmul.f32 %v2095_v52, %v2012_v30  ;;  %v576_v30 = vmul.f32 %v2004_v24, %v2043_v49  ;;  %v655_v43 = vmul.f32 %v654_v33, %v2018_v34  ;;  %v592_v24 = vmul.f32 %v2024_v38, %v2060_v7 }
 0x3d3   :  { %v674_v8 = vrot.slane %v611_v50, 4  ;;  %v587_v50 = vmul.f32 %v2022_v37, %v2058_v61  ;;  %v603_v56 = vmul.f32 %v2032_v42, %v2095_v52  ;;  %v613_v58 = vadd.f32 %v584_v55, %v579_v44 }
 0x3d4   :  { %v2107_v35 = vadd.f32 %v567_v9, %v552_v16  ;;  %v612_v25 = vadd.f32 %v576_v30, %v571_v1  ;;  %v615_v37 = vadd.f32 %v600_v20, %v595_v18  ;;  %v627_v9 = vmul.f32 %v625_v46, %v2043_v49  ;;  %v821_v46 = vld [vmem:[%s2782_s2 + $0xc] sm:$0x8] }
 0x3d5   :  { %v2103_v0 = vsel %vm682_vm9, %v560_v22, %v674_v8  ;;  %v650_v22 = vmul.f32 %v649_v32, %v2002_v21  ;;  %v614_v59 = vadd.f32 %v592_v24, %v587_v50  ;;  %v632_v38 = vmul.f32 %v630_v47, %v2051_v54  ;;  %v829_v47 = vld [vmem:[%s2782_s2 + $0x10] sm:$0x1] }
 0x3d6   :  { %v616_v10 = vadd.f32 %v613_v58, %v612_v25  ;;  %v640_v11 = vmul.f32 %v638_v6, %v2058_v61  ;;  %v643_v41 = vmul.f32 %v641_v60, %v2060_v7  ;;  %v648_v23 = vmul.f32 %v646_v31, %v2066_v12 }
 0x3d7   :  { %v660_v51 = vadd.f32 %v650_v22, %v647_v39  ;;  %v617_v42 = vadd.f32 %v615_v37, %v614_v59  ;;  %v677_v53 = vrot.slane %v2107_v35, 4  ;;  %v665_v6 = vadd.f32 %v627_v9, %v624_v29  ;;  %v869_v37 = vld [vmem:[%s2782_s2 + $0x10] sm:$0x8] }
 0x3d8   :  { %v666_v60 = vadd.f32 %v635_v40, %v632_v38  ;;  %v667_v62 = vadd.f32 %v643_v41, %v640_v11  ;;  %v656_v32 = vmul.f32 %v654_v33, %v2095_v52  ;;  %v668_v1 = vadd.f32 %v651_v26, %v648_v23  ;;  %v429_v23 = vpop.permute.xlu2 %428 }
 0x3d9   :  { %v662_v8 = vadd.f32 %v660_v51, %v659_v36  ;;  %v618_v31 = vadd.f32 %v617_v42, %v616_v10  ;;  %v822_v30 = vunpack.c.l.bf16 %v821_v46  ;;  %v830_v39 = vunpack.c.l.bf16 %v829_v47 }
 0x3da   :  { %v669_v36 = vadd.f32 %v666_v60, %v665_v6  ;;  %v670_v44 = vadd.f32 %v668_v1, %v667_v62  ;;  %v811_v35 = vmul.f32 %v2114_v5, %v1962_v57  ;;  %v838_v55 = vunpack.c.l.bf16 %v837_v27  ;;  %v877_v60 = vld [vmem:[%s2782_s2 + $0x14] sm:$0x1]  ;;  %v885_v1 = vld [vmem:[%s2782_s2 + $0x14] sm:$0x2] }
 0x3db   :  { %v663_v16 = vadd.f32 %v662_v8, %v661_v2  ;;  %v814_v2 = vunpack.c.l.bf16 %v813_v45  ;;  %v619_v22 = vadd.f32 %v618_v31, %v603_v56  ;;  %v2158_v51 = vperm.slane %v822_v30, 6  ;;  %v861_v56 = vld [vmem:[%s2782_s2 + $0x10] sm:$0x4] }
 0x3dc   :  { %v671_v33 = vadd.f32 %v670_v44, %v669_v36  ;;  %v2162_v18 = vperm.slane %v830_v39, 0  ;;  %v2164_v20 = vperm.slane %v830_v39, 1  ;;  %v2166_v25 = vperm.slane %v838_v55, 2  ;;  %v893_v44 = vld [vmem:[%s2782_s2 + $0x14] sm:$0x4] }
 0x3dd   :  { %v664_v28 = vadd.f32 %v663_v16, %v655_v43  ;;  %v2154_v50 = vperm.slane %v814_v2, 4  ;;  %v2156_v24 = vperm.slane %v814_v2, 5  ;;  %v2160_v43 = vperm.slane %v822_v30, 7 }
 0x3de   :  { %v824_v29 = vmul.f32 %v2158_v51, %v1976_v4  ;;  %v672_v9 = vadd.f32 %v671_v33, %v656_v32  ;;  %v832_v38 = vmul.f32 %v2162_v18, %v1994_v14  ;;  %v835_v10 = vmul.f32 %v2164_v20, %v2000_v17 }
 0x3df   :  { %v816_v58 = vmul.f32 %v2154_v50, %v1966_v63  ;;  %v819_v59 = vmul.f32 %v2156_v24, %v1974_v3  ;;  %v827_v8 = vmul.f32 %v2160_v43, %v1992_v13  ;;  %v840_v40 = vmul.f32 %v2166_v25, %v2002_v21 }
 0x3e0   :  { %v842_v11 = vperm.slane %v838_v55, 3  ;;  %v862_v42 = vunpack.c.l.bf16 %v861_v56  ;;  %v680_v45 = vrot.slane %v672_v9, 4  ;;  %v870_v6 = vunpack.c.l.bf16 %v869_v37 }
 0x3e1   :  { %v845_v41 = vadd.f32 %v816_v58, %v811_v35  ;;  %v846_v16 = vadd.f32 %v824_v29, %v819_v59  ;;  %v847_v46 = vadd.f32 %v832_v38, %v827_v8  ;;  %v848_v47 = vadd.f32 %v840_v40, %v835_v10 }
 0x3e2   :  { %v684_v27 = vsel %vm682_vm9, %v664_v28, %v677_v53  ;;  %v863_v32 = vperm.slane %v862_v42, 4  ;;  %v843_v36 = vmul.f32 %v842_v11, %v2018_v34  ;;  %v866_v30 = vperm.slane %v862_v42, 5 }
 0x3e3   :  { %v849_v31 = vadd.f32 %v846_v16, %v845_v41  ;;  %v850_v2 = vadd.f32 %v848_v47, %v847_v46  ;;  %v871_v39 = vperm.slane %v870_v6, 6  ;;  %v2200_v35 = vsel %vm682_vm9, %v619_v22, %v680_v45 }
 0x3e4   :  { %v864_v53 = vmul.f32 %v863_v32, %v1962_v57  ;;  %v874_v28 = vperm.slane %v870_v6, 7  ;;  %v878_v55 = vunpack.c.l.bf16 %v877_v60  ;;  %v867_v56 = vmul.f32 %v866_v30, %v1966_v63 }
 0x3e5   :  { %v851_v33 = vadd.f32 %v850_v2, %v849_v31  ;;  %v872_v58 = vmul.f32 %v871_v39, %v1974_v3  ;;  %v886_v59 = vunpack.c.l.bf16 %v885_v1  ;;  %v894_v9 = vunpack.c.l.bf16 %v893_v44 }
 0x3e6   :  { %v875_v29 = vmul.f32 %v874_v28, %v1976_v4  ;;  %v879_v8 = vperm.slane %v878_v55, 0  ;;  %v882_v37 = vperm.slane %v878_v55, 1  ;;  %v898_v40 = vadd.f32 %v867_v56, %v864_v53 }
 0x3e7   :  { %v887_v22 = vperm.slane %v886_v59, 2  ;;  %v890_v10 = vperm.slane %v886_v59, 3  ;;  %v895_v42 = vperm.slane %v894_v9, 4  ;;  %v852_v46 = vadd.f32 %v851_v33, %v843_v36 }
 0x3e8   :  { %v880_v41 = vmul.f32 %v879_v8, %v1992_v13  ;;  %v883_v16 = vmul.f32 %v882_v37, %v1994_v14  ;;  %v2213_v60 = vperm.slane %v894_v9, 5  ;;  %v812_v44 = vmul.f32 %v2114_v5, %v2041_v48 }
 0x3e9   :  { %v888_v47 = vmul.f32 %v887_v22, %v2000_v17  ;;  %v891_v6 = vmul.f32 %v890_v10, %v2002_v21  ;;  %v817_v53 = vmul.f32 %v2154_v50, %v2043_v49  ;;  %v820_v36 = vmul.f32 %v2156_v24, %v2051_v54 }
 0x3ea   :  { %v900_v31 = vadd.f32 %v883_v16, %v880_v41  ;;  %v825_v33 = vmul.f32 %v2158_v51, %v2053_v19  ;;  %v828_v56 = vmul.f32 %v2160_v43, %v2058_v61  ;;  %v836_v5 = vmul.f32 %v2164_v20, %v2066_v12 }
 0x3eb   :  { %v901_v2 = vadd.f32 %v891_v6, %v888_v47  ;;  %v841_v50 = vmul.f32 %v2166_v25, %v2068_v15  ;;  %v853_v24 = vadd.f32 %v817_v53, %v812_v44  ;;  %v865_v51 = vmul.f32 %v863_v32, %v2041_v48 }
 0x3ec   :  { %v868_v43 = vmul.f32 %v866_v30, %v2043_v49  ;;  %v876_v20 = vmul.f32 %v874_v28, %v2053_v19  ;;  %v884_v25 = vmul.f32 %v882_v37, %v2060_v7  ;;  %v889_v32 = vmul.f32 %v887_v22, %v2066_v12  ;;  %v972_v30 = vld [vmem:[%s2782_s2 + $0x14] sm:$0x8]  ;;  %v988_v22 = vld [vmem:[%s2782_s2 + $0x18] sm:$0x2] }
 0x3ed   :  { %v903_v59 = vadd.f32 %v901_v2, %v900_v31  ;;  %v856_v41 = vadd.f32 %v841_v50, %v836_v5  ;;  %v892_v6 = vmul.f32 %v890_v10, %v2068_v15  ;;  %v996_v10 = vld [vmem:[%s2782_s2 + $0x18] sm:$0x4]  ;;  %v971_v53 = vmul.f32 %v2213_v60, %v2041_v48 }
 0x3ee   :  { %v906_v28 = vadd.f32 %v868_v43, %v865_v51 }
 0x3ef   :  { %v909_v2 = vadd.f32 %v892_v6, %v889_v32 }
 0x424   :  { %v483_v26 = vpop.f32.mrf.mxu0 }
 0x425   :  { %v484_v62 = vadd.f32 %v483_v26, %v429_v23  ;;  %v899_v23 = vadd.f32 %v875_v29, %v872_v58  ;;  %v434_v26 = vpop.permute.xlu1 %433  ;;  %v833_v58 = vmul.f32 %v2162_v18, %v2060_v7  ;;  %v844_v29 = vmul.f32 %v842_v11, %v2095_v52  ;;  %v439_v11 = vpop.permute.xlu0 %438 }
 0x426   :  { %v873_v18 = vmul.f32 %v871_v39, %v2051_v54 }
 0x427   :  { %v2207_v38 = vmul.f32 %v2103_v0, %v484_v62  ;;  %v896_v62 = vmul.f32 %v895_v42, %v2018_v34  ;;  %v902_v1 = vadd.f32 %v899_v23, %v898_v40  ;;  %v855_v9 = vadd.f32 %v833_v58, %v828_v56 }
 0x428   :  { %v881_v23 = vmul.f32 %v879_v8, %v2058_v61  ;;  %v907_v31 = vadd.f32 %v876_v20, %v873_v18  ;;  %v980_v8 = vld [vmem:[%s2782_s2 + $0x18] sm:$0x1] }
 0x429   :  { %v904_v40 = vadd.f32 %v903_v59, %v902_v1  ;;  %v858_v47 = vadd.f32 %v856_v41, %v855_v9  ;;  %v981_v5 = vunpack.c.l.bf16 %v980_v8  ;;  %v1044_v8 = vld [vmem:[%s2782_s2 + $0x1c] sm:$0x4] }
 0x42a   :  { %v908_v1 = vadd.f32 %v884_v25, %v881_v23  ;;  %v910_v44 = vadd.f32 %v907_v31, %v906_v28  ;;  %v1036_v31 = vld [vmem:[%s2782_s2 + $0x1c] sm:$0x2] }
 0x42b   :  { %v2265_v51 = vperm.slane %v981_v5, 0 }
 0x42c   :  { %v486_v45 = vpop.f32.mrf.mxu0  ;;  %v911_v59 = vadd.f32 %v909_v2, %v908_v1  ;;  %v2311_v1 = vld [vmem:[%s2782_s2 + $0x1c] sm:$0x8] }
 0x42d   :  { %v487_v0 = vadd.f32 %v486_v45, %v434_v26  ;;  %v905_v45 = vadd.f32 %v904_v40, %v896_v62  ;;  %v2267_v40 = vperm.slane %v981_v5, 1  ;;  %v444_v20 = vpop.permute.xlu1 %443 }
 0x42e   :  { %v912_v9 = vadd.f32 %v911_v59, %v910_v44 }
 0x42f   :  { %v687_v55 = vmul.f32 %v684_v27, %v487_v0  ;;  %v854_v27 = vadd.f32 %v825_v33, %v820_v36  ;;  %v897_v0 = vmul.f32 %v895_v42, %v2095_v52  ;;  %v915_v37 = vrot.slane %v905_v45, 4  ;;  %v1020_v33 = vld [vmem:[%s2782_s2 + $0x18] sm:$0x8] }
 0x430   :  { %v973_v36 = vunpack.c.l.bf16 %v972_v30  ;;  %v1021_v41 = vunpack.c.l.bf16 %v1020_v33  ;;  %v1028_v30 = vld [vmem:[%s2782_s2 + $0x1c] sm:$0x1]  ;;  %v1045_v33 = vunpack.c.l.bf16 %v1044_v8 }
 0x431   :  { %v857_v16 = vadd.f32 %v854_v27, %v853_v24  ;;  %v920_v56 = vsel %vm682_vm9, %v852_v46, %v915_v37  ;;  %v997_v27 = vunpack.c.l.bf16 %v996_v10  ;;  %v689_v46 = vld [vmem:[%s2787_s7] sm:$0xff]  ;;  %v913_v25 = vadd.f32 %v912_v9, %v897_v0 }
 0x432   :  { %v2261_v50 = vperm.slane %v973_v36, 6  ;;  %v2263_v24 = vperm.slane %v973_v36, 7  ;;  %v1025_v44 = vperm.slane %v1021_v41, 7  ;;  %v1037_v36 = vunpack.c.l.bf16 %v1036_v31 }
 0x433   :  { %v859_v62 = vadd.f32 %v858_v47, %v857_v16  ;;  %v2293_v6 = vperm.slane %v997_v27, 5 }
 0x434   :  { %v489_v26 = vpop.f32.mrf.mxu0  ;;  %v979_v43 = vmul.f32 %v2263_v24, %v2051_v54 }
 0x435   :  { %v490_v39 = vadd.f32 %v489_v26, %v439_v11  ;;  %v860_v58 = vadd.f32 %v859_v62, %v844_v29  ;;  %v976_v29 = vmul.f32 %v2261_v50, %v2043_v49  ;;  %v987_v11 = vmul.f32 %v2267_v40, %v2058_v61 }
 0x436   :  { %v2284_v26 = vperm.slane %v997_v27, 4  ;;  %v690_v27 = vld [vmem:[%s2787_s7 + $0x8] sm:$0xff] }
 0x437   :  { %v688_v42 = vmul.f32 %v2200_v35, %v490_v39  ;;  %v989_v35 = vunpack.c.l.bf16 %v988_v22  ;;  %v918_v39 = vrot.slane %v913_v25, 4  ;;  %v1012_v28 = vadd.f32 %v976_v29, %v971_v53 }
 0x438   :  { %v1000_v0 = vmul.f32 %v2284_v26, %v2068_v15  ;;  %v1003_v22 = vmul.f32 %v2293_v6, %v2095_v52  ;;  %v1029_v53 = vunpack.c.l.bf16 %v1028_v30  ;;  %v1038_v29 = vperm.slane %v1037_v36, 2 }
 0x439   :  { %753 = vmatpush.msra.mxu1 %v688_v42  ;;  %v2276_v18 = vperm.slane %v989_v35, 2  ;;  %v2278_v16 = vperm.slane %v989_v35, 3  ;;  %v921_v2 = vsel %vm682_vm9, %v860_v58, %v918_v39  ;;  %v1022_v42 = vperm.slane %v1021_v41, 6 }
 0x43a   :  { %v1053_v35 = vunpack.c.l.bf16 %v2311_v1  ;;  %v1027_v58 = vmul.f32 %v1025_v44, %v2043_v49  ;;  %v1030_v9 = vperm.slane %v1029_v53, 0  ;;  %v1049_v25 = vperm.slane %v1045_v33, 5  ;;  %v2489_v1 = vld [vmem:[%s2782_s2 + $0x24] sm:$0x8] }
 0x43b   :  { %754 = vmatpush.msra.mxu1 %v687_v55  ;;  %v984_v55 = vmul.f32 %v2265_v51, %v2053_v19  ;;  %v992_v47 = vmul.f32 %v2276_v18, %v2060_v7  ;;  %v995_v32 = vmul.f32 %v2278_v16, %v2066_v12 }
 0x43c   :  { %v492_v23 = vpop.f32.mrf.mxu0  ;;  %v1051_v39 = vmul.f32 %v1049_v25, %v2068_v15  ;;  %v983_v15 = vmul.f32 %v2265_v51, %v1976_v4 }
 0x43d   :  { %v2286_v45 = vadd.f32 %v492_v23, %v444_v20  ;;  %755 = vmatpush.msra.mxu1 %v2207_v38  ;;  %v1013_v38 = vadd.f32 %v984_v55, %v979_v43  ;;  %v1014_v62 = vadd.f32 %v992_v47, %v987_v11  ;;  %v1015_v10 = vadd.f32 %v1000_v0, %v995_v32  ;;  %v449_v43 = vpop.permute.xlu0 %448 }
 0x43e   :  { %1606 = vmatmul.msk.f32.vlgmr.msra.gmra.mxu1 %vm724_vm10, %v689_v46  ;;  %v1033_v46 = vperm.slane %v1029_v53, 1  ;;  %v1041_v20 = vperm.slane %v1037_v36, 3  ;;  %v1046_v23 = vperm.slane %v1045_v33, 4  ;;  %v970_v55 = vmul.f32 %v2213_v60, %v1962_v57 }
 0x43f   :  { %v922_v37 = vmul.f32 %v920_v56, %v2286_v45  ;;  %v1016_v59 = vadd.f32 %v1013_v38, %v1012_v28  ;;  %v1017_v5 = vadd.f32 %v1015_v10, %v1014_v62  ;;  %v1024_v56 = vmul.f32 %v1022_v42, %v2041_v48 }
 0x440   :  { %v1032_v11 = vmul.f32 %v1030_v9, %v2051_v54  ;;  %v1035_v47 = vmul.f32 %v1033_v46, %v2053_v19  ;;  %v1040_v32 = vmul.f32 %v1038_v29, %v2058_v61  ;;  %v1043_v49 = vmul.f32 %v1041_v20, %v2060_v7 }
 0x441   :  { %v1048_v30 = vmul.f32 %v1046_v23, %v2066_v12  ;;  %v1054_v0 = vperm.slane %v1053_v35, 6  ;;  %v1018_v60 = vadd.f32 %v1017_v5, %v1016_v59  ;;  %v1065_v38 = vadd.f32 %v1027_v58, %v1024_v56 }
 0x442   :  { %v1066_v31 = vadd.f32 %v1035_v47, %v1032_v11  ;;  %v1067_v19 = vadd.f32 %v1043_v49, %v1040_v32  ;;  %v975_v61 = vmul.f32 %v2261_v50, %v1966_v63  ;;  %v978_v12 = vmul.f32 %v2263_v24, %v1974_v3  ;;  %v927_v49 = vld [vmem:[%s2788_s8 + $0x18] sm:$0xff] }
 0x443   :  { %v1056_v54 = vmul.f32 %v1054_v0, %v2095_v52  ;;  %v1068_v8 = vadd.f32 %v1051_v39, %v1048_v30  ;;  %v986_v62 = vmul.f32 %v2267_v40, %v1992_v13  ;;  %v924_v52 = vld [vmem:[%s2788_s8] sm:$0xff]  ;;  %v991_v10 = vmul.f32 %v2276_v18, %v1994_v14  ;;  %v691_v40 = vld [vmem:[%s2787_s7 + $0x10] sm:$0xff] }
 0x444   :  { %v495_v41 = vpop.f32.mrf.mxu0  ;;  %v1069_v7 = vadd.f32 %v1066_v31, %v1065_v38  ;;  %v994_v50 = vmul.f32 %v2278_v16, %v2000_v17  ;;  %v999_v24 = vmul.f32 %v2284_v26, %v2002_v21  ;;  %v1004_v53 = vadd.f32 %v975_v61, %v970_v55 }
 0x445   :  { %v496_v48 = vadd.f32 %v495_v41, %v449_v43  ;;  %v1005_v51 = vadd.f32 %v983_v15, %v978_v12  ;;  %v1023_v36 = vmul.f32 %v1022_v42, %v1962_v57  ;;  %v1006_v59 = vadd.f32 %v991_v10, %v986_v62 }
 0x446   :  { %1607 = vmatmul.msk.f32.gmra.mxu1 %vm724_vm10, %v690_v27  ;;  %v1007_v5 = vadd.f32 %v999_v24, %v994_v50  ;;  %v1026_v18 = vmul.f32 %v1025_v44, %v1966_v63  ;;  %v1019_v16 = vadd.f32 %v1018_v60, %v1003_v22  ;;  %v1031_v56 = vmul.f32 %v1030_v9, %v1974_v3 }
 0x447   :  { %v923_v28 = vmul.f32 %v921_v2, %v496_v48  ;;  %v1070_v2 = vadd.f32 %v1068_v8, %v1067_v19  ;;  %v1034_v26 = vmul.f32 %v1033_v46, %v1976_v4  ;;  %v1008_v57 = vadd.f32 %v1005_v51, %v1004_v53  ;;  %v925_v4 = vld [vmem:[%s2788_s8 + $0x8] sm:$0xff]  ;;  %v712_v8 = vpop.permute.xlu1 %711 }
 0x448   :  { %v1042_v42 = vmul.f32 %v1041_v20, %v1994_v14  ;;  %v1047_v58 = vmul.f32 %v1046_v23, %v2000_v17  ;;  %v1009_v43 = vadd.f32 %v1007_v5, %v1006_v59  ;;  %v1050_v63 = vmul.f32 %v1049_v25, %v2002_v21  ;;  %v692_v20 = vld [vmem:[%s2787_s7 + $0x18] sm:$0xff] }
 0x449   :  { %954 = vmatpush.msra.mxu2 %v923_v28  ;;  %v1071_v33 = vadd.f32 %v1070_v2, %v1069_v7  ;;  %v1057_v44 = vadd.f32 %v1026_v18, %v1023_v36  ;;  %v1058_v41 = vadd.f32 %v1034_v26, %v1031_v56  ;;  %v1002_v14 = vmul.f32 %v2293_v6, %v2018_v34  ;;  %v926_v6 = vld [vmem:[%s2788_s8 + $0x10] sm:$0xff]  ;;  %v707_v28 = vpop.permute.xlu2 %706 }
 0x44a   :  { %v1060_v3 = vadd.f32 %v1050_v63, %v1047_v58  ;;  %v1010_v46 = vadd.f32 %v1009_v43, %v1008_v57  ;;  %v1358_v57 = vld [vmem:[%s2782_s2 + $0x24] sm:$0x4] }
 0x44b   :  { %955 = vmatpush.msra.mxu2 %v922_v37  ;;  %v1039_v37 = vmul.f32 %v1038_v29, %v1992_v13  ;;  %v1072_v27 = vadd.f32 %v1071_v33, %v1056_v54  ;;  %v1061_v9 = vadd.f32 %v1058_v41, %v1057_v44  ;;  %v1055_v29 = vmul.f32 %v1054_v0, %v2018_v34 }
 0x44c   :  { %1613 = vmatmul.msk.f32.vlgmr.msra.gmra.mxu2 %vm121_vm1, %v924_v52  ;;  %v1011_v25 = vadd.f32 %v1010_v46, %v1002_v14 }
 0x44d   :  { %v1077_v22 = vrot.slane %v1072_v27, 4  ;;  %v1059_v55 = vadd.f32 %v1042_v42, %v1039_v37 }
 0x44e   :  { %1608 = vmatmul.msk.f32.gmra.mxu1 %vm724_vm10, %v691_v40 }
 0x44f   :  { %v1080_v13 = vsel %vm682_vm9, %v1019_v16, %v1077_v22  ;;  %v1062_v21 = vadd.f32 %v1060_v3, %v1059_v55 }
 0x450   :  { %v1082_v17 = vmul.f32 %v1080_v13, %v496_v48  ;;  %v693_v48 = vld [vmem:[%s2787_s7 + $0x20] sm:$0xff] }
 0x451   :  { %v1063_v23 = vadd.f32 %v1062_v21, %v1061_v9  ;;  %v722_v44 = vpop.permute.xlu2 %721 }
 0x452   :  { %1097 = vmatpush.msrb.mxu3 %v1082_v17 }
 0x453   :  { %v1064_v11 = vadd.f32 %v1063_v23, %v1055_v29 }
 0x454   :  { %1614 = vmatmul.msk.f32.gmra.mxu2 %vm121_vm1, %v925_v4 }
 0x455   :  { %v1074_v47 = vrot.slane %v1064_v11, 4 }
 0x456   :  { %1609 = vmatmul.msk.f32.gmra.mxu1 %vm724_vm10, %v692_v20 }
 0x457   :  { %v1079_v34 = vsel %vm682_vm9, %v1011_v25, %v1074_v47 }
 0x458   :  { %v1081_v32 = vmul.f32 %v1079_v34, %v2286_v45  ;;  %v702_v45 = vpop.permute.xlu0 %701 }
 0x45a   :  { %1098 = vmatpush.msrb.mxu3 %v1081_v32 }
 0x45b   :  { %1617 = vmatmul.msk.f32.vlgmr.msrb.gmra.mxu3 %vm121_vm1, %v924_v52 }
 0x45c   :  { %1615 = vmatmul.msk.f32.gmra.mxu2 %vm121_vm1, %v926_v6 }
 0x45e   :  { %1610 = vmatmul.msk.f32.gmra.mxu1 %vm724_vm10, %v693_v48 }
 0x460   :  { %v717_v13 = vpop.permute.xlu0 %716 }
 0x463   :  { %1618 = vmatmul.msk.f32.gmra.mxu3 %vm121_vm1, %v925_v4 }
 0x464   :  { %1616 = vmatmul.msk.f32.gmra.mxu2 %vm121_vm1, %v927_v49 }
 0x46b   :  { %1619 = vmatmul.msk.f32.gmra.mxu3 %vm121_vm1, %v926_v6 }
 0x473   :  { %1620 = vmatmul.msk.f32.gmra.mxu3 %vm121_vm1, %v927_v49 }
 0x4bb   :  { %v757_v30 = vpop.f32.mrf.mxu1 }
 0x4bc   :  { %v758_v39 = vadd.f32 %v757_v30, %v702_v45 }
 0x4be   :  { %v1611_v0 = vmul.f32 -1.442695, %v758_v39  ;;  %v1142_v39 = vld [vmem:[%s2789_s9] sm:$0xff] }
 0x4c0   :  { %1681 = vpow2.f32 %v1611_v0 }
 0x4c3   :  { %v760_v60 = vpop.f32.mrf.mxu1 }
 0x4c4   :  { %v761_v38 = vadd.f32 %v760_v60, %v707_v28 }
 0x4c6   :  { %v1682_v31 = vpop.eup %1681  ;;  %v1612_v54 = vmul.f32 -1.442695, %v761_v38 }
 0x4c7   :  { %v778_v19 = vadd.f32 1.0, %v1682_v31  ;;  %v1198_v31 = vld [vmem:[%s2790_s10] sm:$0xff] }
 0x4c8   :  { %1683 = vpow2.f32 %v1612_v54 }
 0x4c9   :  { %1685 = vrcp.f32 %v778_v19  ;;  %v789_v16 = vand.u32 2147483647, %v778_v19  ;;  %v791_v56 = vand.u32 2147483648, %v778_v19  ;;  %vm785_vm12 = vweird.f32 %v778_v19 }
 0x4cb   :  { %v763_v61 = vpop.f32.mrf.mxu1  ;;  %vm790_vm0 = vcmp.eq.f32.partialorder %v789_v16, 8.507059e+37  ;;  %v792_v41 = vor.u32 1.1754944e-38, %v791_v56 }
 0x4cc   :  { %v2394_v7 = vadd.f32 %v763_v61, %v712_v8  ;;  %v1199_v8 = vld [vmem:[%s2790_s10 + $0x8] sm:$0xff] }
 0x4ce   :  { %v1684_v12 = vpop.eup %1683  ;;  %v1621_v15 = vmul.f32 -1.442695, %v2394_v7 }
 0x4cf   :  { %v1686_v62 = vpop.eup %1685  ;;  %v779_v52 = vadd.f32 1.0, %v1684_v12  ;;  %v2397_v2 = vpop.f32.mrf.mxu2 }
 0x4d0   :  { %v781_v10 = vmul.f32 %v1686_v62, %v778_v19  ;;  %1687 = vpow2.f32 %v1621_v15  ;;  %vm786_vm11 = vweird.f32 %v1686_v62  ;;  %v1143_v19 = vld [vmem:[%s2789_s9 + $0x8] sm:$0xff] }
 0x4d1   :  { %1689 = vrcp.f32 %v779_v52  ;;  %v806_v26 = vand.u32 2147483648, %v779_v52  ;;  %v804_v27 = vand.u32 2147483647, %v779_v52  ;;  %vm2401_vm14 = vmor %vm785_vm12, %vm786_vm11  ;;  %vm800_vm15 = vweird.f32 %v779_v52 }
 0x4d2   :  { %v782_v50 = vsub.f32 1.0, %v781_v10  ;;  %v1200_v10 = vld [vmem:[%s2790_s10 + $0x10] sm:$0xff] }
 0x4d3   :  { %v766_v24 = vpop.f32.mrf.mxu1  ;;  %v807_v22 = vor.u32 1.1754944e-38, %v806_v26  ;;  %vm805_vm3 = vcmp.eq.f32.partialorder %v804_v27, 8.507059e+37  ;;  %v1325_v27 = vld [vmem:[%s2782_s2 + $0x20] sm:$0x8] }
 0x4d4   :  { %v783_v51 = vmul.f32 %v1686_v62, %v782_v50  ;;  %v767_v21 = vadd.f32 %v766_v24, %v717_v13  ;;  %v1276_v50 = vld [vmem:[%s2783_s3 + $0x8] sm:$0x1]  ;;  %v1541_v13 = vld [vmem:[%s2782_s2 + $0x38] sm:$0x8] }
 0x4d5   :  { %v1277_v24 = vmul.f32 0.2, %v1276_v50  ;;  %v2513_v50 = vld [vmem:[%s2782_s2 + $0x3c] sm:$0x1] }
 0x4d6   :  { %v1688_v53 = vpop.eup %1687  ;;  %v784_v5 = vadd.f32 %v1686_v62, %v783_v51 }
 0x4d7   :  { %v1690_v36 = vpop.eup %1689  ;;  %v1119_v40 = vadd.f32 1.0, %v1688_v53  ;;  %v2399_v33 = vpop.f32.mrf.mxu2  ;;  %v1278_v53 = vmul.f32 %v1277_v24, %v1277_v24  ;;  %vm1283_vm8 = vcmp.lt.f32.partialorder %v1277_v24, 1.0 }
 0x4d8   :  { %v796_v59 = vmul.f32 %v1690_v36, %v779_v52  ;;  %vm801_vm13 = vweird.f32 %v1690_v36  ;;  %v788_v58 = vsel %vm2401_vm14, %v1686_v62, %v784_v5 }
 0x4d9   :  { %1691 = vrcp.f32 %v1119_v40  ;;  %vm802_vm2 = vmor %vm800_vm15, %vm801_vm13  ;;  %v793_v14 = vsel %vm790_vm0, %v792_v41, %v788_v58  ;;  %v1131_v23 = vand.u32 2147483648, %v1119_v40  ;;  %v1129_v11 = vand.u32 2147483647, %v1119_v40 }
 0x4da   :  { %v797_v18 = vsub.f32 1.0, %v796_v59  ;;  %v1136_v47 = vmul.f32 %v793_v14, %v767_v21  ;;  %vm1125_vm5 = vweird.f32 %v1119_v40  ;;  %v1279_v51 = vmul.f32 %v1278_v53, %v1278_v53  ;;  %v1307_v53 = vld [vmem:[%s2782_s2 + $0x20] sm:$0x2] }
 0x4db   :  { %v769_v42 = vpop.f32.mrf.mxu1  ;;  %v1132_v34 = vor.u32 1.1754944e-38, %v1131_v23  ;;  %vm1130_vm7 = vcmp.eq.f32.partialorder %v1129_v11, 8.507059e+37  ;;  %v1326_v58 = vunpack.c.l.bf16 %v1325_v27  ;;  %v1299_v23 = vperm.slane %v1053_v35, 7  ;;  %v2494_v35 = vld [vmem:[%s2782_s2 + $0x2c] sm:$0x4] }
 0x4dc   :  { %v798_v37 = vmul.f32 %v1690_v36, %v797_v18  ;;  %v770_v9 = vadd.f32 %v769_v42, %v722_v44  ;;  %v1386_v42 = vld [vmem:[%s2782_s2 + $0x28] sm:$0x4]  ;;  %v1480_v44 = vld [vmem:[%s2782_s2 + $0x34] sm:$0x1]  ;;  %v1542_v11 = vunpack.c.l.bf16 %v1541_v13 }
 0x4de   :  { %v799_v43 = vadd.f32 %v1690_v36, %v798_v37  ;;  %v1100_v29 = vpop.f32.mrf.mxu3 }
 0x4df   :  { %v1692_v63 = vpop.eup %1691  ;;  %v963_v55 = vpop.f32.mrf.mxu2 }
 0x4e0   :  { %v1121_v3 = vmul.f32 %v1692_v63, %v1119_v40  ;;  %v803_v4 = vsel %vm802_vm2, %v1690_v36, %v799_v43  ;;  %vm1126_vm4 = vweird.f32 %v1692_v63  ;;  %v1114_v0 = vadd.f32 %v1100_v29, %v963_v55  ;;  %v1419_v43 = vld [vmem:[%s2782_s2 + $0x2c] sm:$0x2] }
 0x4e1   :  { %v808_v17 = vsel %vm805_vm3, %v807_v22, %v803_v4  ;;  %vm1127_vm6 = vmor %vm1125_vm5, %vm1126_vm4  ;;  %v1280_v36 = vmul.f32 %v1279_v51, %v1277_v24  ;;  %v1359_v55 = vunpack.c.l.bf16 %v1358_v57  ;;  %v2470_v4 = vld [vmem:[%s2782_s2 + $0x38] sm:$0x1]  ;;  %v1481_v29 = vunpack.c.l.bf16 %v1480_v44  ;;  %v1331_v51 = vld [vmem:[%s2782_s2 + $0x24] sm:$0x1] }
 0x4e2   :  { %v1122_v46 = vsub.f32 1.0, %v1121_v3  ;;  %v1137_v20 = vmul.f32 %v808_v17, %v770_v9  ;;  %v1140_v38 = vmul.f32 %v1114_v0, %v793_v14  ;;  %v1387_v3 = vunpack.c.l.bf16 %v1386_v42 }
 0x4e3   :  { %v1281_v40 = vmul.f32 %v1280_v36, %v1277_v24  ;;  %v1420_v9 = vunpack.c.l.bf16 %v1419_v43  ;;  %v1509_v21 = vunpack.c.l.bf16 %v2470_v4 }
 0x4e4   :  { %v1123_v25 = vmul.f32 %v1692_v63, %v1122_v46  ;;  %1185 = vmatpush.msrb.mxu2 %v1137_v20 }
 0x4e5   :  { %v1282_v59 = vmul.f32 %v1281_v40, %v1277_v24  ;;  %v1286_v18 = vmul.f32 35.0, %v1281_v40 }
 0x4e6   :  { %v1124_v6 = vadd.f32 %v1692_v63, %v1123_v25  ;;  %1186 = vmatpush.msrb.mxu2 %v1136_v47  ;;  %v1103_v30 = vpop.f32.mrf.mxu3  ;;  %v1327_v25 = vperm.slane %v1326_v58, 6 }
 0x4e7   :  { %v966_v32 = vpop.f32.mrf.mxu2  ;;  %v1288_v56 = vmul.f32 15.0, %v1282_v59 }
 0x4e8   :  { %v1128_v48 = vsel %vm1127_vm6, %v1692_v63, %v1124_v6  ;;  %v1115_v28 = vadd.f32 %v1103_v30, %v966_v32  ;;  %v1447_v63 = vld [vmem:[%s2782_s2 + $0x30] sm:$0x2]  ;;  %v1360_v6 = vperm.slane %v1359_v55, 5  ;;  %v1543_v30 = vperm.slane %v1542_v11, 7 }
 0x4e9   :  { %v1133_v49 = vsel %vm1130_vm7, %v1132_v34, %v1128_v48  ;;  %v1448_v46 = vunpack.c.l.bf16 %v1447_v63  ;;  %v1388_v34 = vperm.slane %v1387_v3, 4  ;;  %v1421_v48 = vperm.slane %v1420_v9, 3  ;;  %v2548_v63 = vld [vmem:[%s2782_s2 + $0x30] sm:$0x4] }
 0x4ea   :  { %v1135_v45 = vmul.f32 %v1133_v49, %v2394_v7  ;;  %v1141_v60 = vmul.f32 %v1115_v28, %v808_v17  ;;  %v1144_v7 = vld [vmem:[%s2789_s9 + $0x10] sm:$0xff]  ;;  %v1482_v49 = vperm.slane %v1481_v29, 1 }
 0x4eb   :  { %v1449_v32 = vperm.slane %v1448_v46, 2 }
 0x4ec   :  { %1187 = vmatpush.msrb.mxu2 %v1135_v45  ;;  %1257 = vmatpush.msrb.mxu0 %v1141_v60  ;;  %v1510_v45 = vperm.slane %v1509_v21, 0  ;;  %v1363_v60 = vunpack.c.l.bf16 %v2489_v1 }
 0x4ed   :  { %1622 = vmatmul.msk.f32.vlgmr.msrb.gmra.mxu2 %vm724_vm10, %v1142_v39  ;;  %v2484_v39 = vld [vmem:[%s2782_s2 + $0x20] sm:$0x1] }
 0x4ee   :  { %1258 = vmatpush.msrb.mxu0 %v1140_v38  ;;  %v1106_v54 = vpop.f32.mrf.mxu3  ;;  %v1302_v28 = vunpack.c.l.bf16 %v2484_v39  ;;  %v1424_v38 = vunpack.c.l.bf16 %v2494_v35 }
 0x4ef   :  { %1629 = vmatmul.msk.f32.vlgmr.msrb.gmra.mxu0 %vm121_vm1, %v1198_v31  ;;  %v1112_v12 = vsub.f32 %v2397_v2, %v1106_v54  ;;  %v1201_v2 = vld [vmem:[%s2790_s10 + $0x18] sm:$0xff] }
 0x4f1   :  { %v1138_v52 = vmul.f32 %v1112_v12, %v793_v14  ;;  %v1151_v14 = vpop.permute.xlu1 %1150  ;;  %v1156_v12 = vpop.permute.xlu2 %1155 }
 0x4f5   :  { %1623 = vmatmul.msk.f32.gmra.mxu2 %vm724_vm10, %v1143_v19 }
 0x4f6   :  { %v1109_v61 = vpop.f32.mrf.mxu3 }
 0x4f7   :  { %1630 = vmatmul.msk.f32.gmra.mxu0 %vm121_vm1, %v1199_v8  ;;  %v1113_v15 = vsub.f32 %v2399_v33, %v1109_v61  ;;  %v1284_v33 = vmul.f32 21.0, %v1280_v36  ;;  %v1368_v36 = vld [vmem:[%s2782_s2 + $0x28] sm:$0x1] }
 0x4f9   :  { %v1139_v62 = vmul.f32 %v1113_v15, %v808_v17  ;;  %v1285_v5 = vsub.f32 1.0, %v1284_v33 }
 0x4fb   :  { %1228 = vmatpush.msra.mxu3 %v1139_v62  ;;  %v1287_v16 = vadd.f32 %v1286_v18, %v1285_v5  ;;  %v1303_v62 = vperm.slane %v1302_v28, 0  ;;  %v1308_v5 = vunpack.c.l.bf16 %v1307_v53  ;;  %v1332_v18 = vunpack.c.l.bf16 %v1331_v51 }
 0x4fd   :  { %1624 = vmatmul.msk.f32.gmra.mxu2 %vm724_vm10, %v1144_v7  ;;  %1229 = vmatpush.msra.mxu3 %v1138_v52  ;;  %v1289_v26 = vsub.f32 %v1287_v16, %v1288_v56  ;;  %v1329_v52 = vperm.slane %v1326_v58, 7  ;;  %v1369_v16 = vunpack.c.l.bf16 %v1368_v36  ;;  %v1392_v56 = vld [vmem:[%s2782_s2 + $0x28] sm:$0x8]  ;;  %v1451_v58 = vperm.slane %v1448_v46, 3 }
 0x4fe   :  { %1625 = vmatmul.msk.f32.vlgmr.msra.gmra.mxu3 %vm121_vm1, %v1198_v31  ;;  %v2502_v31 = vld [vmem:[%s2782_s2 + $0x34] sm:$0x2]  ;;  %v1393_v57 = vunpack.c.l.bf16 %v1392_v56  ;;  %v2543_v43 = vperm.slane %v1308_v5, 2  ;;  %v1335_v46 = vperm.slane %v1332_v18, 1  ;;  %v2591_v53 = vperm.slane %v1308_v5, 3 }
 0x4ff   :  { %1631 = vmatmul.msk.f32.gmra.mxu0 %vm121_vm1, %v1200_v10  ;;  %v1290_v37 = vsel %vm1283_vm8, %v1289_v26, 0.0  ;;  %v1485_v59 = vunpack.c.l.bf16 %v2502_v31  ;;  %v1425_v26 = vperm.slane %v1424_v38, 4  ;;  %v1370_v29 = vperm.slane %v1369_v16, 0 }
 0x500   :  { %v2463_v41 = vperm.slane %v1290_v37, 0  ;;  %v2537_v37 = vld [vmem:[%s2782_s2 + $0x2c] sm:$0x8]  ;;  %v1333_v51 = vperm.slane %v1332_v18, 0 }
 0x501   :  { %v1430_v42 = vunpack.c.l.bf16 %v2537_v37 }
 0x506   :  { %1626 = vmatmul.msk.f32.gmra.mxu3 %vm121_vm1, %v1199_v8 }
 0x507   :  { %1632 = vmatmul.msk.f32.gmra.mxu0 %vm121_vm1, %v1201_v2 }
 0x50e   :  { %1627 = vmatmul.msk.f32.gmra.mxu3 %vm121_vm1, %v1200_v10  ;;  %v1364_v10 = vperm.slane %v1363_v60, 6 }
 0x516   :  { %1628 = vmatmul.msk.f32.gmra.mxu3 %vm121_vm1, %v1201_v2  ;;  %v1390_v2 = vperm.slane %v1387_v3, 5 }
 0x56c   :  { %v2465_v22 = vpop.f32.mrf.mxu0 }
 0x570   :  { %v1189_v17 = vpop.f32.mrf.mxu2 }
 0x571   :  { %v1190_v20 = vadd.f32 %v1189_v17, %v1151_v14 }
 0x573   :  { %v1292_v47 = vmul.f32 %v2463_v41, %v1190_v20  ;;  %v2559_v20 = vperm.slane %v1393_v57, 7 }
 0x574   :  { %v2504_v54 = vpop.f32.mrf.mxu0 }
 0x575   :  { %v1300_v0 = vmul.f32 %v1299_v23, %v1292_v47  ;;  %v1328_v19 = vmul.f32 %v1327_v25, %v1292_v47  ;;  %v1361_v8 = vmul.f32 %v1360_v6, %v1292_v47  ;;  %v1389_v61 = vmul.f32 %v1388_v34, %v1292_v47  ;;  %v1313_v25 = vld [vmem:[%s2782_s2 + $0x20] sm:$0x4]  ;;  %v2576_v6 = vld [vmem:[%s2782_s2 + $0x28] sm:$0x2] }
 0x576   :  { %v2506_v7 = vmul.f32 %v1421_v48, %v1292_v47  ;;  %v2524_v40 = vmul.f32 %v1449_v32, %v1292_v47  ;;  %v2526_v33 = vmul.f32 %v1482_v49, %v1292_v47  ;;  %v2550_v44 = vmul.f32 %v1510_v45, %v1292_v47  ;;  %v1161_v49 = vpop.permute.xlu0 %1160 }
 0x577   :  { %v2552_v55 = vmul.f32 %v1543_v30, %v1292_v47  ;;  %v2563_v23 = vperm.slane %v1430_v42, 6  ;;  %v1337_v47 = vld [vmem:[%s2782_s2 + $0x24] sm:$0x2]  ;;  %v1454_v32 = vunpack.c.l.bf16 %v2548_v63  ;;  %v1314_v30 = vunpack.c.l.bf16 %v1313_v25 }
 0x578   :  { %v1192_v15 = vpop.f32.mrf.mxu2 }
 0x579   :  { %v1193_v24 = vadd.f32 %v1192_v15, %v1156_v12  ;;  %v1398_v12 = vld [vmem:[%s2782_s2 + $0x2c] sm:$0x1]  ;;  %v2598_v56 = vperm.slane %v1314_v30, 4  ;;  %v2605_v5 = vperm.slane %v1314_v30, 5  ;;  %v1455_v30 = vperm.slane %v1454_v32, 4 }
 0x57b   :  { %v2540_v27 = vmul.f32 %v2463_v41, %v1193_v24  ;;  %v1375_v24 = vunpack.c.l.bf16 %v2576_v6 }
 0x57d   :  { %v1304_v9 = vmul.f32 %v1303_v62, %v2540_v27  ;;  %v1330_v13 = vmul.f32 %v1329_v52, %v2540_v27  ;;  %v1365_v14 = vmul.f32 %v1364_v10, %v2540_v27  ;;  %v1391_v17 = vmul.f32 %v1390_v2, %v2540_v27  ;;  %v1266_v52 = vpop.f32.mrf.mxu0 }
 0x57e   :  { %v1426_v34 = vmul.f32 %v1425_v26, %v2540_v27  ;;  %v1452_v48 = vmul.f32 %v1451_v58, %v2540_v27  ;;  %v1305_v10 = vperm.slane %v1302_v28, 1  ;;  %v1338_v2 = vunpack.c.l.bf16 %v1337_v47  ;;  %v1435_v28 = vld [vmem:[%s2782_s2 + $0x30] sm:$0x1]  ;;  %v1459_v47 = vld [vmem:[%s2782_s2 + $0x30] sm:$0x8] }
 0x57f   :  { %v2568_v11 = vadd.f32 %v1304_v9, %v1300_v0  ;;  %v2581_v39 = vadd.f32 %v1330_v13, %v1328_v19  ;;  %v2583_v0 = vadd.f32 %v1365_v14, %v1361_v8  ;;  %v2588_v15 = vadd.f32 %v1391_v17, %v1389_v61  ;;  %v1343_v14 = vld [vmem:[%s2782_s2 + $0x24] sm:$0x4] }
 0x580   :  { %v1195_v45 = vpop.f32.mrf.mxu2  ;;  %v1366_v19 = vperm.slane %v1363_v60, 7  ;;  %v1399_v8 = vunpack.c.l.bf16 %v1398_v12  ;;  %v1394_v61 = vperm.slane %v1393_v57, 6  ;;  %v1427_v26 = vperm.slane %v1424_v38, 5 }
 0x581   :  { %v1196_v62 = vadd.f32 %v1195_v45, %v1161_v49  ;;  %v2607_v18 = vperm.slane %v1338_v2, 2  ;;  %v2609_v1 = vperm.slane %v1338_v2, 3  ;;  %v2611_v60 = vperm.slane %v1375_v24, 2  ;;  %v1231_v58 = vpop.f32.mrf.mxu3  ;;  %v1404_v49 = vld [vmem:[%s2782_s2 + $0x2c] sm:$0x2] }
 0x582   :  { %v2614_v9 = vperm.slane %v1369_v16, 1  ;;  %v2616_v57 = vperm.slane %v1399_v8, 0  ;;  %v2618_v35 = vperm.slane %v1399_v8, 1  ;;  %v1272_v38 = vsub.f32 %v1231_v58, %v1266_v52  ;;  %v1465_v2 = vld [vmem:[%s2782_s2 + $0x34] sm:$0x1] }
 0x583   :  { %v2596_v36 = vmul.f32 %v2463_v41, %v1196_v62  ;;  %v1436_v25 = vunpack.c.l.bf16 %v1435_v28  ;;  %v1344_v16 = vunpack.c.l.bf16 %v1343_v14  ;;  %v1433_v62 = vperm.slane %v1430_v42, 7 }
 0x584   :  { %v2634_v12 = vmul.f32 %v2463_v41, %v1272_v38  ;;  %v1441_v52 = vadd.f32 %v1426_v34, %v2506_v7  ;;  %v1466_v58 = vunpack.c.l.bf16 %v1465_v2  ;;  %v1469_v38 = vadd.f32 %v1452_v48, %v2524_v40 }
 0x585   :  { %v1306_v63 = vmul.f32 %v1305_v10, %v2596_v36  ;;  %v1334_v13 = vmul.f32 %v1333_v51, %v2596_v36  ;;  %v1367_v17 = vmul.f32 %v1366_v19, %v2596_v36  ;;  %v1395_v6 = vmul.f32 %v1394_v61, %v2596_v36  ;;  %v1269_v42 = vpop.f32.mrf.mxu0 }
 0x586   :  { %v1428_v45 = vmul.f32 %v1427_v26, %v2596_v36  ;;  %v1457_v10 = vperm.slane %v1454_v32, 5  ;;  %v2642_v51 = vperm.slane %v1344_v16, 4  ;;  %v1405_v19 = vunpack.c.l.bf16 %v1404_v49 }
 0x587   :  { %v2644_v8 = vperm.slane %v1436_v25, 0  ;;  %v1460_v61 = vunpack.c.l.bf16 %v1459_v47  ;;  %v1310_v26 = vmul.f32 %v2543_v43, %v2634_v12  ;;  %v1336_v28 = vmul.f32 %v1335_v46, %v2634_v12 }
 0x588   :  { %v1371_v37 = vmul.f32 %v1370_v29, %v2634_v12  ;;  %v1456_v7 = vmul.f32 %v1455_v30, %v2596_v36  ;;  %v1397_v34 = vmul.f32 %v2559_v20, %v2634_v12  ;;  %v1432_v32 = vmul.f32 %v2563_v23, %v2634_v12  ;;  %v1490_v20 = vld [vmem:[%s2782_s2 + $0x34] sm:$0x4] }
 0x589   :  { %v1320_v14 = vadd.f32 %v1310_v26, %v1306_v63  ;;  %v1348_v47 = vadd.f32 %v1336_v28, %v1334_v13  ;;  %v2656_v16 = vperm.slane %v1375_v24, 3  ;;  %v1234_v46 = vpop.f32.mrf.mxu3  ;;  %v2658_v49 = vperm.slane %v1405_v19, 2  ;;  %v1514_v24 = vld [vmem:[%s2782_s2 + $0x38] sm:$0x2] }
 0x58a   :  { %v1381_v43 = vadd.f32 %v1371_v37, %v1367_v17  ;;  %v1409_v29 = vadd.f32 %v1397_v34, %v1395_v6  ;;  %v1442_v30 = vadd.f32 %v1432_v32, %v1428_v45  ;;  %v1458_v3 = vmul.f32 %v1457_v10, %v2634_v12 }
 0x58b   :  { %v1273_v23 = vsub.f32 %v1234_v46, %v1269_v42  ;;  %v2664_v2 = vperm.slane %v1436_v25, 1  ;;  %v1461_v40 = vperm.slane %v1460_v61, 6  ;;  %v1463_v48 = vperm.slane %v1460_v61, 7  ;;  %v1496_v25 = vld [vmem:[%s2782_s2 + $0x34] sm:$0x8] }
 0x58c   :  { %v2670_v63 = vadd.f32 %v1320_v14, %v2568_v11  ;;  %v2673_v13 = vadd.f32 %v1348_v47, %v2581_v39  ;;  %v2676_v17 = vadd.f32 %v1381_v43, %v2583_v0  ;;  %v1470_v6 = vadd.f32 %v1458_v3, %v1456_v7 }
 0x58d   :  { %v2682_v45 = vmul.f32 %v2463_v41, %v1273_v23  ;;  %v1486_v10 = vperm.slane %v1485_v59, 2  ;;  %v1488_v11 = vperm.slane %v1485_v59, 3  ;;  %v1491_v19 = vunpack.c.l.bf16 %v1490_v20 }
 0x58e   :  { %v2689_v39 = vadd.f32 %v1409_v29, %v2588_v15  ;;  %v2691_v0 = vadd.f32 %v1442_v30, %v1441_v52  ;;  %v1512_v3 = vperm.slane %v1509_v21, 1  ;;  %v1515_v61 = vunpack.c.l.bf16 %v1514_v24  ;;  %v1520_v21 = vld [vmem:[%s2782_s2 + $0x38] sm:$0x4] }
 0x58f   :  { %v1312_v26 = vmul.f32 %v2591_v53, %v2682_v45  ;;  %v2697_v28 = vperm.slane %v1466_v58, 0  ;;  %v2699_v37 = vadd.f32 %v1470_v6, %v1469_v38  ;;  %v1497_v7 = vunpack.c.l.bf16 %v1496_v25 }
 0x590   :  { %v1340_v31 = vmul.f32 %v2607_v18, %v2682_v45  ;;  %v1373_v59 = vmul.f32 %v2614_v9, %v2682_v45  ;;  %v1401_v15 = vmul.f32 %v2616_v57, %v2682_v45  ;;  %v1487_v4 = vmul.f32 %v1486_v10, %v2540_v27  ;;  %v1526_v18 = vld [vmem:[%s2782_s2 + $0x38] sm:$0x8] }
 0x591   :  { %v1434_v53 = vmul.f32 %v1433_v62, %v2682_v45  ;;  %v1489_v52 = vmul.f32 %v1488_v11, %v2596_v36  ;;  %v1492_v42 = vperm.slane %v1491_v19, 4  ;;  %v1494_v34 = vperm.slane %v1491_v19, 5  ;;  %v1237_v9 = vpop.f32.mrf.mxu3 }
 0x592   :  { %v1462_v32 = vmul.f32 %v1461_v40, %v2682_v45  ;;  %v1513_v57 = vmul.f32 %v1512_v3, %v2540_v27  ;;  %v1516_v58 = vperm.slane %v1515_v61, 2  ;;  %v1518_v38 = vperm.slane %v1515_v61, 3 }
 0x593   :  { %v1274_v14 = vadd.f32 %v2465_v22, %v1237_v9  ;;  %v1493_v47 = vmul.f32 %v1492_v42, %v2634_v12  ;;  %v1498_v62 = vperm.slane %v1497_v7, 6  ;;  %v1521_v43 = vunpack.c.l.bf16 %v1520_v21 }
 0x594   :  { %v1500_v46 = vperm.slane %v1497_v7, 7  ;;  %v1502_v29 = vadd.f32 %v1487_v4, %v2526_v33  ;;  %v1517_v30 = vmul.f32 %v1516_v58, %v2596_v36  ;;  %v1527_v20 = vunpack.c.l.bf16 %v1526_v18 }
 0x595   :  { %v2723_v23 = vmul.f32 %v2463_v41, %v1274_v14  ;;  %v1495_v40 = vmul.f32 %v1494_v34, %v2682_v45  ;;  %v1503_v24 = vadd.f32 %v1493_v47, %v1489_v52  ;;  %v1519_v6 = vmul.f32 %v1518_v38, %v2634_v12 }
 0x596   :  { %v1522_v25 = vperm.slane %v1521_v43, 4  ;;  %v1524_v22 = vperm.slane %v1521_v43, 5  ;;  %v1528_v10 = vperm.slane %v1527_v20, 6  ;;  %v1530_v11 = vadd.f32 %v1513_v57, %v2550_v44 }
 0x597   :  { %v1316_v19 = vmul.f32 %v2598_v56, %v2723_v23  ;;  %v1531_v33 = vadd.f32 %v1519_v6, %v1517_v30  ;;  %v2795_v3 = vunpack.c.l.bf16 %v2513_v50  ;;  %v1342_v21 = vmul.f32 %v2609_v1, %v2723_v23  ;;  %v1551_v50 = vld [vmem:[%s2782_s2 + $0x3c] sm:$0x2]  ;;  %v1557_v1 = vld [vmem:[%s2782_s2 + $0x3c] sm:$0x4]  ;;  %s1721_s2 = smov [#allocation4]  }
 0x598   :  { %v1377_v52 = vmul.f32 %v2611_v60, %v2723_v23  ;;  %v1403_v42 = vmul.f32 %v2618_v35, %v2723_v23  ;;  %v1438_v44 = vmul.f32 %v2644_v8, %v2723_v23  ;;  %v1464_v34 = vmul.f32 %v1463_v48, %v2723_v23  ;;  %s1575_s30 = sshll.u32 %s1721_s2, 4  ;;  %s1576_s30 = int_to_ptr.vmem [resolvable:$true] %s1575_s30 }
 0x599   :  { %v1547_v61 = vperm.slane %v2795_v3, 0  ;;  %v2796_v7 = vmov %v2795_v3  ;;  %v1321_v56 = vadd.f32 %v1316_v19, %v1312_v26  ;;  %v1499_v18 = vmul.f32 %v1498_v62, %v2723_v23  ;;  %v1240_v60 = vpop.f32.mrf.mxu3 }
 0x59a   :  { %v1549_v4 = vperm.slane %v2796_v7, 1  ;;  %v1505_v9 = vadd.f32 %v1503_v24, %v1502_v29  ;;  %v1349_v57 = vadd.f32 %v1342_v21, %v1340_v31  ;;  %v1382_v35 = vadd.f32 %v1377_v52, %v1373_v59 }
 0x59b   :  { %v1410_v58 = vadd.f32 %v1403_v42, %v1401_v15  ;;  %v1523_v8 = vmul.f32 %v1522_v25, %v2682_v45  ;;  %v1275_v26 = vadd.f32 %v2504_v54, %v1240_v60  ;;  %v1443_v48 = vadd.f32 %v1438_v44, %v1434_v53 }
 0x59c   :  { %v1471_v38 = vadd.f32 %v1464_v34, %v1462_v32  ;;  %v1525_v14 = vmul.f32 %v1524_v22, %v2723_v23  ;;  %v1504_v47 = vadd.f32 %v1499_v18, %v1495_v40  ;;  %v1533_v62 = vadd.f32 %v1531_v33, %v1530_v11 }
 0x59d   :  { %v1552_v43 = vunpack.c.l.bf16 %v1551_v50  ;;  %v1558_v29 = vunpack.c.l.bf16 %v1557_v1  ;;  %v1298_v30 = vmul.f32 %v2463_v41, %v1275_v26  ;;  %v1548_v24 = vmul.f32 %v1547_v61, %v2540_v27 }
 0x59e   :  { %v1532_v20 = vadd.f32 %v1525_v14, %v1523_v8  ;;  %v1550_v31 = vmul.f32 %v1549_v4, %v2596_v36 }
 0x59f   :  { %v1553_v59 = vperm.slane %v1552_v43, 2  ;;  %v1555_v15 = vperm.slane %v1552_v43, 3  ;;  %v1559_v6 = vperm.slane %v1558_v29, 4  ;;  %v1561_v25 = vperm.slane %v1558_v29, 5 }
 0x5a0   :  { %v1318_v54 = vmul.f32 %v2605_v5, %v1298_v30  ;;  %v1346_v53 = vmul.f32 %v2642_v51, %v1298_v30  ;;  %v1379_v32 = vmul.f32 %v2656_v16, %v1298_v30  ;;  %v1407_v40 = vmul.f32 %v2658_v49, %v1298_v30 }
 0x5a1   :  { %v1440_v22 = vmul.f32 %v2664_v2, %v1298_v30  ;;  %v1468_v41 = vmul.f32 %v2697_v28, %v1298_v30  ;;  %v1501_v11 = vmul.f32 %v1500_v46, %v1298_v30  ;;  %v1529_v27 = vmul.f32 %v1528_v10, %v1298_v30 }
 0x5a2   :  { %v1323_v19 = vadd.f32 %v1321_v56, %v1318_v54  ;;  %v1351_v36 = vadd.f32 %v1349_v57, %v1346_v53  ;;  %v1384_v33 = vadd.f32 %v1382_v35, %v1379_v32  ;;  %v1412_v3 = vadd.f32 %v1410_v58, %v1407_v40 }
 0x5a3   :  { %v1445_v61 = vadd.f32 %v1443_v48, %v1440_v22  ;;  %v1473_v7 = vadd.f32 %v1471_v38, %v1468_v41  ;;  %v1506_v4 = vadd.f32 %v1504_v47, %v1501_v11  ;;  %v1534_v5 = vadd.f32 %v1532_v20, %v1529_v27 }
 0x5a4   :  { %v1324_v51 = vadd.f32 %v1323_v19, %v2670_v63  ;;  %v1352_v16 = vadd.f32 %v1351_v36, %v2673_v13  ;;  %v1385_v49 = vadd.f32 %v1384_v33, %v2676_v17  ;;  %v1413_v2 = vadd.f32 %v1412_v3, %v2689_v39 }
 0x5a5   :  { %v1446_v28 = vadd.f32 %v1445_v61, %v2691_v0  ;;  %v1474_v46 = vadd.f32 %v1473_v7, %v2699_v37  ;;  %v1507_v10 = vadd.f32 %v1506_v4, %v1505_v9  ;;  %v1535_v21 = vadd.f32 %v1534_v5, %v1533_v62 }
 0x5a6   :  { %v1354_v52 = vrot.slane %v1352_v16, 4  ;;  %v1415_v42 = vrot.slane %v1413_v2, 4  ;;  %v1554_v44 = vmul.f32 %v1553_v59, %v2634_v12  ;;  %v1556_v56 = vmul.f32 %v1555_v15, %v2682_v45 }
 0x5a7   :  { %v1476_v34 = vrot.slane %v1474_v46, 4  ;;  %v1537_v63 = vrot.slane %v1535_v21, 4  ;;  %v1560_v13 = vmul.f32 %v1559_v6, %v2723_v23  ;;  %v1562_v18 = vmul.f32 %v1561_v25, %v1298_v30 }
 0x5a8   :  { %v1356_v17 = vsel %vm682_vm9, %v1324_v51, %v1354_v52  ;;  %v1417_v39 = vsel %vm682_vm9, %v1385_v49, %v1415_v42  ;;  %v1564_v0 = vadd.f32 %v1554_v44, %v1550_v31  ;;  %v1563_v50 = vadd.f32 %v1548_v24, %v2552_v55 }
 0x5a9   :  { %1357 = vst [vmem:[#allocation4] sm:$0xff] %v1356_v17  ;;  %v1478_v37 = vsel %vm682_vm9, %v1446_v28, %v1476_v34  ;;  %v1539_v9 = vsel %vm682_vm9, %v1507_v10, %v1537_v63  ;;  %v1565_v12 = vadd.f32 %v1560_v13, %v1556_v56 }
 0x5aa   :  { %1418 = vst [vmem:[#allocation4 + $0x8] sm:$0xff] %v1417_v39  ;;  %v1566_v45 = vadd.f32 %v1564_v0, %v1563_v50 }
 0x5ab   :  { %1479 = vst [vmem:[#allocation4 + $0x10] sm:$0xff] %v1478_v37  ;;  %v1567_v23 = vadd.f32 %v1565_v12, %v1562_v18 }
 0x5ac   :  { %1540 = vst [vmem:[#allocation4 + $0x18] sm:$0xff] %v1539_v9 }
 0x5ad   :  { %v1568_v1 = vadd.f32 %v1567_v23, %v1566_v45 }
 0x5af   :  { %v1569_v60 = vsel %vm682_vm9, %v1568_v1, 0.0 }
 0x5b0   :  { %1570 = vst [vmem:[#allocation4 + $0x20] sm:$0xff] %v1569_v60 }
 0x5b1   :  { %1583 = dma.vmem_to_hbm [thread:$0]  %s1576_s30, 640, %s1578_s13, [#allocation5], %s1722_s14, %s1722_s14, %s1723_s15  }
 0x5b2   :  { %1717 = dma.done.wait [#allocation5], 640  }
 0x5b3   :  { %1718 = vsyncadd [#allocation5], 4294966656 }
 0x5b4   :  { %1588 = vsyncpa [#allocation5], 1 }

</bundles_post_ra>
